<compile_context>
chip_gen: v5e
topology: v5e:2x2
jax: 0.10.0
libtpu: 0.0.40
codegen_flags: <defaults>
</compile_context>

<pallas_src>
import functools
import math

import jax
import jax.numpy as jnp
from jax.experimental import pallas as pl
from jax.experimental.pallas import tpu as pltpu

LN_EPS = 1e-5


def _layernorm(x, gamma, beta, eps=LN_EPS):
    mean = jnp.mean(x, axis=-1, keepdims=True)
    var = jnp.mean((x - mean) ** 2, axis=-1, keepdims=True)
    return (x - mean) * jax.lax.rsqrt(var + eps) * gamma + beta


# ---------------------------------------------------------------------------
# One grid step == one encoder layer.  Activation layout: (R, E) rows with
# R = S*B; row r holds token (seq = r // B, batch = r % B)  (row-major collapse
# of the PyTorch (S, B, E) input, done for free in the wrapper).
# The activation is carried across layers in o_ref (resident output block).
# ---------------------------------------------------------------------------
def encoder_layer_kernel(x_ref, hsel_ref, bias_ref,
                         wqkv_ref, bqkv_ref, wo_ref, bo_ref,
                         g1_ref, be1_ref, w1_ref, fb1_ref, w2_ref, fb2_ref,
                         g2_ref, be2_ref,
                         o_ref, *, num_heads):
    l = pl.program_id(0)

    @pl.when(l == 0)
    def _():
        o_ref[...] = x_ref[...]          # seed the resident activation with the input

    R, E = x_ref.shape
    H = num_heads
    cdt = wqkv_ref.dtype                 # MXU operand dtype (bf16 by default)

    x = o_ref[...]                       # (R, E) f32 activation, resident across layers
    hsel = hsel_ref[...]                 # (H*R, E) 0/1 head-column mask, compute dtype

    # ---- fused QKV projection (softmax scale already folded into the Q weights) ----
    qkv = jnp.dot(x.astype(cdt), wqkv_ref[...],
                  preferred_element_type=jnp.float32) + bqkv_ref[...]     # (R, 3E) f32
    q = qkv[:, :E]
    k = qkv[:, E:2 * E]
    v = qkv[:, 2 * E:]

    # ---- head-masked replicated K / V: row block g keeps only head-g columns ----
    k_blk = jnp.concatenate([k.astype(cdt)] * H, axis=0) * hsel           # (H*R, E)
    v_blk = jnp.concatenate([v.astype(cdt)] * H, axis=0) * hsel           # (H*R, E)

    # scores[r, g*R + j] = q_head_g[r] . k_head_g[j]   (lane-dense N = H*R)
    scores = jax.lax.dot_general(q.astype(cdt), k_blk, (((1,), (1,)), ((), ())),
                                 preferred_element_type=jnp.float32)      # (R, H*R) f32
    scores = scores + bias_ref[...]                                       # -1e30 on cross-batch pairs
    # Global row max is valid for the per-head softmax (shift invariance per segment).
    scores = scores - jnp.max(scores, axis=-1, keepdims=True)
    probs = jnp.exp(scores).astype(cdt)                                   # masked entries are exactly 0

    ctx_num = jnp.dot(probs, v_blk, preferred_element_type=jnp.float32)   # (R, E) un-normalized
    denom = jnp.dot(probs, hsel, preferred_element_type=jnp.float32)      # per-head sums, bcast over head cols
    ctx = ctx_num * pl.reciprocal(denom, approx=True)                     # (R, E)

    # ---- output projection + residual + LayerNorm1 (post-norm) ----
    attn = jnp.dot(ctx.astype(cdt), wo_ref[...],
                   preferred_element_type=jnp.float32) + bo_ref[...]
    x = _layernorm(x + attn, g1_ref[...], be1_ref[...])

    # ---- feed-forward (Linear -> ReLU -> Linear) + residual + LayerNorm2 ----
    h = jnp.dot(x.astype(cdt), w1_ref[...],
                preferred_element_type=jnp.float32) + fb1_ref[...]
    h = jnp.maximum(h, 0.0)
    y = jnp.dot(h.astype(cdt), w2_ref[...],
                preferred_element_type=jnp.float32) + fb2_ref[...]
    x = _layernorm(x + y, g2_ref[...], be2_ref[...])

    o_ref[...] = x


# ---------------------------------------------------------------------------
# Host-side preparation
# ---------------------------------------------------------------------------
def prepare_params(layer_params, num_heads, compute_dtype=jnp.bfloat16):
    """Stack per-layer params along a leading L axis; fold 1/sqrt(Dh) into the Q
    columns of the fused QKV weight/bias; cast big weights to compute_dtype."""
    E = layer_params[0]["wq"].shape[0]
    scale = 1.0 / math.sqrt(E // num_heads)

    def stack(fn, dtype=jnp.float32):
        return jnp.stack([fn(p) for p in layer_params], axis=0).astype(dtype)

    return (
        stack(lambda p: jnp.concatenate([p["wq"] * scale, p["wk"], p["wv"]], axis=1),
              compute_dtype),
        stack(lambda p: jnp.concatenate([p["bq"] * scale, p["bk"], p["bv"]], axis=1)),
        stack(lambda p: p["wo"], compute_dtype),
        stack(lambda p: p["bo"]),
        stack(lambda p: p["ln1_g"]),
        stack(lambda p: p["ln1_b"]),
        stack(lambda p: p["w1"], compute_dtype),
        stack(lambda p: p["b1"]),
        stack(lambda p: p["w2"], compute_dtype),
        stack(lambda p: p["b2"]),
        stack(lambda p: p["ln2_g"]),
        stack(lambda p: p["ln2_b"]),
    )


def make_attention_masks(S, B, E, num_heads, compute_dtype=jnp.bfloat16):
    """Constant masks for the K/V-replicated attention formulation."""
    R = S * B
    H = num_heads
    Dh = E // H
    rows = jnp.arange(H * R)
    cols = jnp.arange(E)
    # head_sel[g*R + j, e] == 1 iff embedding column e belongs to head g
    head_sel = ((rows[:, None] // R) == (cols[None, :] // Dh)).astype(compute_dtype)
    # attn_bias[r, g*R + j] == 0 iff query row r and key row j are the same batch element
    q_batch = jnp.arange(R) % B
    k_batch = (jnp.arange(H * R) % R) % B
    attn_bias = jnp.where(q_batch[:, None] == k_batch[None, :],
                          jnp.float32(0.0), jnp.float32(-1e30))
    return head_sel, attn_bias


def transformer_encoder_forward(x_sbe, packed_params, masks, num_heads):
    """x_sbe: (S, B, E) float32, PyTorch batch_first=False convention."""
    S, B, E = x_sbe.shape
    R = S * B
    H = num_heads
    L = packed_params[0].shape[0]
    head_sel, attn_bias = masks
    # Free row-major collapse (no transpose): row r = (seq r // B, batch r % B).
    x_rows = x_sbe.reshape(R, E)

    def w_spec(arr):
        zeros = (0,) * (arr.ndim - 1)
        return pl.BlockSpec((None,) + arr.shape[1:], lambda l, z=zeros: (l,) + z)

    in_specs = [
        pl.BlockSpec((R, E), lambda l: (0, 0)),          # activation input (loaded once)
        pl.BlockSpec((H * R, E), lambda l: (0, 0)),      # head_sel constant
        pl.BlockSpec((R, H * R), lambda l: (0, 0)),      # same-batch additive bias constant
    ] + [w_spec(p) for p in packed_params]               # per-layer weights, double-buffered

    kernel = functools.partial(encoder_layer_kernel, num_heads=num_heads)
    out_rows = pl.pallas_call(
        kernel,
        out_shape=jax.ShapeDtypeStruct((R, E), jnp.float32),
        grid_spec=pltpu.PrefetchScalarGridSpec(
            num_scalar_prefetch=0,
            grid=(L,),
            in_specs=in_specs,
            out_specs=pl.BlockSpec((R, E), lambda l: (0, 0)),
        ),
        compiler_params=pltpu.CompilerParams(
            dimension_semantics=("arbitrary",),
            vmem_limit_bytes=32 * 1024 * 1024,
        ),
    )(x_rows, head_sel, attn_bias, *packed_params)
    return out_rows.reshape(S, B, E)


# ---------------------------------------------------------------------------
# Deterministic parameter construction (synthetic weights, no checkpoint)
# ---------------------------------------------------------------------------
def make_params(key, num_layers, E, FF):
    layers = []
    for _ in range(num_layers):
        keys = jax.random.split(key, 8)
        key = keys[0]
        s_e = 1.0 / math.sqrt(E)
        s_f = 1.0 / math.sqrt(FF)
        p = {
            # weights stored in "x @ W" orientation (i.e. PyTorch weight^T)
            "wq": jax.random.normal(keys[1], (E, E), jnp.float32) * s_e,
            "wk": jax.random.normal(keys[2], (E, E), jnp.float32) * s_e,
            "wv": jax.random.normal(keys[3], (E, E), jnp.float32) * s_e,
            "wo": jax.random.normal(keys[4], (E, E), jnp.float32) * s_e,
            "w1": jax.random.normal(keys[5], (E, FF), jnp.float32) * s_e,
            "w2": jax.random.normal(keys[6], (FF, E), jnp.float32) * s_f,
            "bq": jnp.zeros((1, E), jnp.float32),
            "bk": jnp.full((1, E), 0.01, jnp.float32),
            "bv": jnp.full((1, E), -0.01, jnp.float32),
            "bo": jnp.zeros((1, E), jnp.float32),
            "b1": jnp.full((1, FF), 0.02, jnp.float32),
            "b2": jnp.zeros((1, E), jnp.float32),
            "ln1_g": jnp.ones((1, E), jnp.float32),
            "ln1_b": jnp.zeros((1, E), jnp.float32),
            "ln2_g": jnp.ones((1, E), jnp.float32),
            "ln2_b": jnp.zeros((1, E), jnp.float32),
        }
        layers.append(p)
    return layers


# ---------------------------------------------------------------------------
# Pure-JAX reference (same math as nn.TransformerEncoder in eval mode; mirrors the
# kernel's mixed precision: bf16 MXU operands everywhere, f32 accumulation, f32
# softmax / LayerNorm / residual).
# ---------------------------------------------------------------------------
def reference_forward(x_sbe, layer_params, num_heads, compute_dtype=jnp.bfloat16):
    y = jnp.transpose(x_sbe, (1, 0, 2))        # (B, S, E)
    B, S, E = y.shape
    Dh = E // num_heads

    def mm(a, w):
        return jnp.dot(a.astype(compute_dtype), w.astype(compute_dtype),
                       preferred_element_type=jnp.float32)

    for p in layer_params:
        q = mm(y, p["wq"]) + p["bq"][0]
        k = mm(y, p["wk"]) + p["bk"][0]
        v = mm(y, p["wv"]) + p["bv"][0]
        q = q.reshape(B, S, num_heads, Dh).transpose(0, 2, 1, 3)
        k = k.reshape(B, S, num_heads, Dh).transpose(0, 2, 1, 3)
        v = v.reshape(B, S, num_heads, Dh).transpose(0, 2, 1, 3)
        s = jnp.einsum("bhqd,bhkd->bhqk", q.astype(compute_dtype), k.astype(compute_dtype),
                       preferred_element_type=jnp.float32) / math.sqrt(Dh)
        pattn = jax.nn.softmax(s, axis=-1)
        o = jnp.einsum("bhqk,bhkd->bhqd", pattn.astype(compute_dtype),
                       v.astype(compute_dtype), preferred_element_type=jnp.float32)
        o = o.transpose(0, 2, 1, 3).reshape(B, S, E)
        o = mm(o, p["wo"]) + p["bo"][0]
        y = _layernorm(y + o, p["ln1_g"][0], p["ln1_b"][0])
        h = jnp.maximum(mm(y, p["w1"]) + p["b1"][0], 0.0)
        y = _layernorm(y + mm(h, p["w2"]) + p["b2"][0], p["ln2_g"][0], p["ln2_b"][0])
    return jnp.transpose(y, (1, 0, 2))


if __name__ == "__main__":
    # Small shapes consistent with the module: nhead=8 (fixed), dim_feedforward=2048
    # (PyTorch default), num_layers=2, small embedding_dim=128, seq=8, batch=2.
    S, B, E = 8, 2, 128
    NUM_HEADS = 8
    FF = 2048
    NUM_LAYERS = 2

    key = jax.random.PRNGKey(0)
    k_x, k_p = jax.random.split(key)
    x = jax.random.normal(k_x, (S, B, E), jnp.float32)   # PyTorch (S, B, E) layout
    params = make_params(k_p, NUM_LAYERS, E, FF)
    packed = prepare_params(params, NUM_HEADS, compute_dtype=jnp.bfloat16)
    masks = make_attention_masks(S, B, E, NUM_HEADS, compute_dtype=jnp.bfloat16)

    out = transformer_encoder_forward(x, packed, masks, NUM_HEADS)
    out = jax.block_until_ready(out)

    # TODO(synk): dropout layers inside nn.TransformerEncoderLayer are identity in eval mode
    # and are intentionally not implemented.
    ref = reference_forward(x, params, NUM_HEADS, compute_dtype=jnp.bfloat16)
    assert out.shape == (S, B, E)
    max_err = float(jnp.max(jnp.abs(out - ref)))
    assert jnp.allclose(out, ref, atol=2e-2, rtol=2e-2), (
        f"mismatch vs reference (max abs err {max_err})")

    print("KERNEL_OK")
</pallas_src>

<mosaic_0001>
module attributes {stable_mosaic.version = 11 : i64} {
  func.func @encoder_layer_kernel(%arg0: i32, %arg1: memref<16x128xf32, #tpu.memory_space<vmem>>, %arg2: memref<128x128xbf16, #tpu.memory_space<vmem>>, %arg3: memref<16x128xf32, #tpu.memory_space<vmem>>, %arg4: memref<1x128x384xbf16, #tpu.memory_space<vmem>>, %arg5: memref<1x1x384xf32, #tpu.memory_space<vmem>>, %arg6: memref<1x128x128xbf16, #tpu.memory_space<vmem>>, %arg7: memref<1x1x128xf32, #tpu.memory_space<vmem>>, %arg8: memref<1x1x128xf32, #tpu.memory_space<vmem>>, %arg9: memref<1x1x128xf32, #tpu.memory_space<vmem>>, %arg10: memref<1x128x2048xbf16, #tpu.memory_space<vmem>>, %arg11: memref<1x1x2048xf32, #tpu.memory_space<vmem>>, %arg12: memref<1x2048x128xbf16, #tpu.memory_space<vmem>>, %arg13: memref<1x1x128xf32, #tpu.memory_space<vmem>>, %arg14: memref<1x1x128xf32, #tpu.memory_space<vmem>>, %arg15: memref<1x1x128xf32, #tpu.memory_space<vmem>>, %arg16: memref<16x128xf32, #tpu.memory_space<vmem>>) attributes {dimension_semantics = [#tpu.dimension_semantics<arbitrary>], iteration_bounds = array<i64: 2>, scalar_prefetch = 0 : i64, scratch_operands = 0 : i64, tpu.core_type = #tpu.core_type<tc>, window_params = [{pipeline_mode = #tpu.pipeline_mode<synchronous>, transform_indices = @transform_0, window_bounds = array<i64: 16, 128>}, {pipeline_mode = #tpu.pipeline_mode<synchronous>, transform_indices = @transform_1, window_bounds = array<i64: 128, 128>}, {pipeline_mode = #tpu.pipeline_mode<synchronous>, transform_indices = @transform_2, window_bounds = array<i64: 16, 128>}, {transform_indices = @transform_3, window_bounds = array<i64: 1, 128, 384>}, {transform_indices = @transform_4, window_bounds = array<i64: 1, 1, 384>}, {transform_indices = @transform_5, window_bounds = array<i64: 1, 128, 128>}, {transform_indices = @transform_6, window_bounds = array<i64: 1, 1, 128>}, {transform_indices = @transform_7, window_bounds = array<i64: 1, 1, 128>}, {transform_indices = @transform_8, window_bounds = array<i64: 1, 1, 128>}, {transform_indices = @transform_9, window_bounds = array<i64: 1, 128, 2048>}, {transform_indices = @transform_10, window_bounds = array<i64: 1, 1, 2048>}, {transform_indices = @transform_11, window_bounds = array<i64: 1, 2048, 128>}, {transform_indices = @transform_12, window_bounds = array<i64: 1, 1, 128>}, {transform_indices = @transform_13, window_bounds = array<i64: 1, 1, 128>}, {transform_indices = @transform_14, window_bounds = array<i64: 1, 1, 128>}, {pipeline_mode = #tpu.pipeline_mode<synchronous>, transform_indices = @transform_15, window_bounds = array<i64: 16, 128>}]} {
    %c0_i32 = arith.constant 0 : i32
    %0 = arith.cmpi eq, %arg0, %c0_i32 : i32
    %1 = arith.extui %0 : i1 to i32
    %c0_i32_0 = arith.constant 0 : i32
    %2 = arith.cmpi ne, %1, %c0_i32_0 : i32
    scf.if %2 {
      %c0_62 = arith.constant 0 : index
      %c0_63 = arith.constant 0 : index
      %117 = vector.load %arg1[%c0_62, %c0_63] : memref<16x128xf32, #tpu.memory_space<vmem>>, vector<16x128xf32>
      %c0_64 = arith.constant 0 : index
      %c0_65 = arith.constant 0 : index
      %118 = vector.load %arg16[%c0_64, %c0_65] : memref<16x128xf32, #tpu.memory_space<vmem>>, vector<16x128xf32>
      tpu.vector_store %arg16[%c0_64, %c0_65], %117 {strides = array<i32>} : memref<16x128xf32, #tpu.memory_space<vmem>>, vector<16x128xf32>,
    } else {
    }
    %c0 = arith.constant 0 : index
    %c0_1 = arith.constant 0 : index
    %3 = vector.load %arg16[%c0, %c0_1] : memref<16x128xf32, #tpu.memory_space<vmem>>, vector<16x128xf32>
    %c0_2 = arith.constant 0 : index
    %c0_3 = arith.constant 0 : index
    %4 = vector.load %arg2[%c0_2, %c0_3] : memref<128x128xbf16, #tpu.memory_space<vmem>>, vector<128x128xbf16>
    %5 = arith.truncf %3 : vector<16x128xf32> to vector<16x128xbf16>
    %c0_4 = arith.constant 0 : index
    %c0_5 = arith.constant 0 : index
    %c0_6 = arith.constant 0 : index
    %6 = vector.load %arg4[%c0_4, %c0_5, %c0_6] : memref<1x128x384xbf16, #tpu.memory_space<vmem>>, vector<1x128x384xbf16>
    %7 = vector.shape_cast %6 : vector<1x128x384xbf16> to vector<128x384xbf16>
    %cst = arith.constant dense<0.000000e+00> : vector<16x384xf32>
    %8 = tpu.matmul %5, %7, %cst {dimension_numbers = #tpu.dot_dimension_numbers<[1], [0], [0], [1], [0, 0, 1, 1], [], []>} : vector<16x128xbf16>, vector<128x384xbf16>, vector<16x384xf32> -> vector<16x384xf32>
    %c0_7 = arith.constant 0 : index
    %c0_8 = arith.constant 0 : index
    %c0_9 = arith.constant 0 : index
    %9 = vector.load %arg5[%c0_7, %c0_8, %c0_9] : memref<1x1x384xf32, #tpu.memory_space<vmem>>, vector<1x1x384xf32>
    %10 = vector.shape_cast %9 : vector<1x1x384xf32> to vector<1x384xf32>
    %11 = vector.broadcast %10 : vector<1x384xf32> to vector<16x384xf32>
    %12 = arith.addf %8, %11 : vector<16x384xf32>
    %13 = vector.extract_strided_slice %12 {offsets = [0, 0], sizes = [16, 128], strides = [1, 1]} : vector<16x384xf32> to vector<16x128xf32>
    %14 = vector.extract_strided_slice %12 {offsets = [0, 128], sizes = [16, 128], strides = [1, 1]} : vector<16x384xf32> to vector<16x128xf32>
    %15 = vector.extract_strided_slice %12 {offsets = [0, 256], sizes = [16, 128], strides = [1, 1]} : vector<16x384xf32> to vector<16x128xf32>
    %16 = arith.truncf %14 : vector<16x128xf32> to vector<16x128xbf16>
    %17 = tpu.concatenate %16, %16, %16, %16, %16, %16, %16, %16 in 0 : vector<16x128xbf16>, vector<16x128xbf16>, vector<16x128xbf16>, vector<16x128xbf16>, vector<16x128xbf16>, vector<16x128xbf16>, vector<16x128xbf16>, vector<16x128xbf16> -> vector<128x128xbf16>
    %18 = arith.mulf %17, %4 : vector<128x128xbf16>
    %19 = arith.truncf %15 : vector<16x128xf32> to vector<16x128xbf16>
    %20 = tpu.concatenate %19, %19, %19, %19, %19, %19, %19, %19 in 0 : vector<16x128xbf16>, vector<16x128xbf16>, vector<16x128xbf16>, vector<16x128xbf16>, vector<16x128xbf16>, vector<16x128xbf16>, vector<16x128xbf16>, vector<16x128xbf16> -> vector<128x128xbf16>
    %21 = arith.mulf %20, %4 : vector<128x128xbf16>
    %22 = arith.truncf %13 : vector<16x128xf32> to vector<16x128xbf16>
    %cst_10 = arith.constant dense<0.000000e+00> : vector<16x128xf32>
    %23 = tpu.matmul %22, %18, %cst_10 {dimension_numbers = #tpu.dot_dimension_numbers<[1], [1], [0], [0], [0, 0, 1, 0], [], []>} : vector<16x128xbf16>, vector<128x128xbf16>, vector<16x128xf32> -> vector<16x128xf32>
    %c0_11 = arith.constant 0 : index
    %c0_12 = arith.constant 0 : index
    %24 = vector.load %arg3[%c0_11, %c0_12] : memref<16x128xf32, #tpu.memory_space<vmem>>, vector<16x128xf32>
    %25 = arith.addf %23, %24 : vector<16x128xf32>
    %cst_13 = arith.constant dense<0xFF800000> : vector<16xf32>
    %26 = vector.multi_reduction <maximumf>, %25, %cst_13 [1] : vector<16x128xf32> to vector<16xf32>
    %27 = vector.shape_cast %26 : vector<16xf32> to vector<16x1xf32>
    %28 = vector.broadcast %27 : vector<16x1xf32> to vector<16x128xf32>
    %29 = arith.subf %25, %28 : vector<16x128xf32>
    %30 = math.exp %29 : vector<16x128xf32>
    %31 = arith.truncf %30 : vector<16x128xf32> to vector<16x128xbf16>
    %cst_14 = arith.constant dense<0.000000e+00> : vector<16x128xf32>
    %32 = tpu.matmul %31, %21, %cst_14 {dimension_numbers = #tpu.dot_dimension_numbers<[1], [0], [0], [1], [0, 0, 1, 1], [], []>} : vector<16x128xbf16>, vector<128x128xbf16>, vector<16x128xf32> -> vector<16x128xf32>
    %cst_15 = arith.constant dense<0.000000e+00> : vector<16x128xf32>
    %33 = tpu.matmul %31, %4, %cst_15 {dimension_numbers = #tpu.dot_dimension_numbers<[1], [0], [0], [1], [0, 0, 1, 1], [], []>} : vector<16x128xbf16>, vector<128x128xbf16>, vector<16x128xf32> -> vector<16x128xf32>
    %34 = tpu.reciprocal %33 {approx = true} : vector<16x128xf32> -> vector<16x128xf32>
    %35 = arith.mulf %32, %34 : vector<16x128xf32>
    %36 = arith.truncf %35 : vector<16x128xf32> to vector<16x128xbf16>
    %c0_16 = arith.constant 0 : index
    %c0_17 = arith.constant 0 : index
    %c0_18 = arith.constant 0 : index
    %37 = vector.load %arg6[%c0_16, %c0_17, %c0_18] : memref<1x128x128xbf16, #tpu.memory_space<vmem>>, vector<1x128x128xbf16>
    %38 = vector.shape_cast %37 : vector<1x128x128xbf16> to vector<128x128xbf16>
    %cst_19 = arith.constant dense<0.000000e+00> : vector<16x128xf32>
    %39 = tpu.matmul %36, %38, %cst_19 {dimension_numbers = #tpu.dot_dimension_numbers<[1], [0], [0], [1], [0, 0, 1, 1], [], []>} : vector<16x128xbf16>, vector<128x128xbf16>, vector<16x128xf32> -> vector<16x128xf32>
    %c0_20 = arith.constant 0 : index
    %c0_21 = arith.constant 0 : index
    %c0_22 = arith.constant 0 : index
    %40 = vector.load %arg7[%c0_20, %c0_21, %c0_22] : memref<1x1x128xf32, #tpu.memory_space<vmem>>, vector<1x1x128xf32>
    %41 = vector.shape_cast %40 : vector<1x1x128xf32> to vector<1x128xf32>
    %42 = vector.broadcast %41 : vector<1x128xf32> to vector<16x128xf32>
    %43 = arith.addf %39, %42 : vector<16x128xf32>
    %44 = arith.addf %3, %43 : vector<16x128xf32>
    %c0_23 = arith.constant 0 : index
    %c0_24 = arith.constant 0 : index
    %c0_25 = arith.constant 0 : index
    %45 = vector.load %arg8[%c0_23, %c0_24, %c0_25] : memref<1x1x128xf32, #tpu.memory_space<vmem>>, vector<1x1x128xf32>
    %46 = vector.shape_cast %45 : vector<1x1x128xf32> to vector<1x128xf32>
    %c0_26 = arith.constant 0 : index
    %c0_27 = arith.constant 0 : index
    %c0_28 = arith.constant 0 : index
    %47 = vector.load %arg9[%c0_26, %c0_27, %c0_28] : memref<1x1x128xf32, #tpu.memory_space<vmem>>, vector<1x1x128xf32>
    %48 = vector.shape_cast %47 : vector<1x1x128xf32> to vector<1x128xf32>
    %cst_29 = arith.constant dense<0.000000e+00> : vector<16xf32>
    %49 = vector.multi_reduction <add>, %44, %cst_29 [1] : vector<16x128xf32> to vector<16xf32>
    %50 = vector.shape_cast %49 : vector<16xf32> to vector<16x1xf32>
    %cst_30 = arith.constant 1.280000e+02 : f32
    %51 = vector.broadcast %cst_30 : f32 to vector<16x1xf32>
    %52 = arith.divf %50, %51 : vector<16x1xf32>
    %53 = vector.broadcast %52 : vector<16x1xf32> to vector<16x128xf32>
    %54 = arith.subf %44, %53 : vector<16x128xf32>
    %55 = arith.mulf %54, %54 : vector<16x128xf32>
    %cst_31 = arith.constant dense<0.000000e+00> : vector<16xf32>
    %56 = vector.multi_reduction <add>, %55, %cst_31 [1] : vector<16x128xf32> to vector<16xf32>
    %57 = vector.shape_cast %56 : vector<16xf32> to vector<16x1xf32>
    %cst_32 = arith.constant 1.280000e+02 : f32
    %58 = vector.broadcast %cst_32 : f32 to vector<16x1xf32>
    %59 = arith.divf %57, %58 : vector<16x1xf32>
    %60 = vector.broadcast %52 : vector<16x1xf32> to vector<16x128xf32>
    %61 = arith.subf %44, %60 : vector<16x128xf32>
    %cst_33 = arith.constant 9.99999974E-6 : f32
    %62 = vector.broadcast %cst_33 : f32 to vector<16x1xf32>
    %63 = arith.addf %59, %62 : vector<16x1xf32>
    %64 = math.rsqrt %63 : vector<16x1xf32>
    %65 = vector.broadcast %64 : vector<16x1xf32> to vector<16x128xf32>
    %66 = arith.mulf %61, %65 : vector<16x128xf32>
    %67 = vector.broadcast %46 : vector<1x128xf32> to vector<16x128xf32>
    %68 = arith.mulf %66, %67 : vector<16x128xf32>
    %69 = vector.broadcast %48 : vector<1x128xf32> to vector<16x128xf32>
    %70 = arith.addf %68, %69 : vector<16x128xf32>
    %71 = arith.truncf %70 : vector<16x128xf32> to vector<16x128xbf16>
    %c0_34 = arith.constant 0 : index
    %c0_35 = arith.constant 0 : index
    %c0_36 = arith.constant 0 : index
    %72 = vector.load %arg10[%c0_34, %c0_35, %c0_36] : memref<1x128x2048xbf16, #tpu.memory_space<vmem>>, vector<1x128x2048xbf16>
    %73 = vector.shape_cast %72 : vector<1x128x2048xbf16> to vector<128x2048xbf16>
    %cst_37 = arith.constant dense<0.000000e+00> : vector<16x2048xf32>
    %74 = tpu.matmul %71, %73, %cst_37 {dimension_numbers = #tpu.dot_dimension_numbers<[1], [0], [0], [1], [0, 0, 1, 1], [], []>} : vector<16x128xbf16>, vector<128x2048xbf16>, vector<16x2048xf32> -> vector<16x2048xf32>
    %c0_38 = arith.constant 0 : index
    %c0_39 = arith.constant 0 : index
    %c0_40 = arith.constant 0 : index
    %75 = vector.load %arg11[%c0_38, %c0_39, %c0_40] : memref<1x1x2048xf32, #tpu.memory_space<vmem>>, vector<1x1x2048xf32>
    %76 = vector.shape_cast %75 : vector<1x1x2048xf32> to vector<1x2048xf32>
    %77 = vector.broadcast %76 : vector<1x2048xf32> to vector<16x2048xf32>
    %78 = arith.addf %74, %77 : vector<16x2048xf32>
    %cst_41 = arith.constant 0.000000e+00 : f32
    %79 = vector.broadcast %cst_41 : f32 to vector<16x2048xf32>
    %80 = arith.maximumf %78, %79 : vector<16x2048xf32>
    %81 = arith.truncf %80 : vector<16x2048xf32> to vector<16x2048xbf16>
    %c0_42 = arith.constant 0 : index
    %c0_43 = arith.constant 0 : index
    %c0_44 = arith.constant 0 : index
    %82 = vector.load %arg12[%c0_42, %c0_43, %c0_44] : memref<1x2048x128xbf16, #tpu.memory_space<vmem>>, vector<1x2048x128xbf16>
    %83 = vector.shape_cast %82 : vector<1x2048x128xbf16> to vector<2048x128xbf16>
    %cst_45 = arith.constant dense<0.000000e+00> : vector<16x128xf32>
    %84 = tpu.matmul %81, %83, %cst_45 {dimension_numbers = #tpu.dot_dimension_numbers<[1], [0], [0], [1], [0, 0, 1, 1], [], []>} : vector<16x2048xbf16>, vector<2048x128xbf16>, vector<16x128xf32> -> vector<16x128xf32>
    %c0_46 = arith.constant 0 : index
    %c0_47 = arith.constant 0 : index
    %c0_48 = arith.constant 0 : index
    %85 = vector.load %arg13[%c0_46, %c0_47, %c0_48] : memref<1x1x128xf32, #tpu.memory_space<vmem>>, vector<1x1x128xf32>
    %86 = vector.shape_cast %85 : vector<1x1x128xf32> to vector<1x128xf32>
    %87 = vector.broadcast %86 : vector<1x128xf32> to vector<16x128xf32>
    %88 = arith.addf %84, %87 : vector<16x128xf32>
    %89 = arith.addf %70, %88 : vector<16x128xf32>
    %c0_49 = arith.constant 0 : index
    %c0_50 = arith.constant 0 : index
    %c0_51 = arith.constant 0 : index
    %90 = vector.load %arg14[%c0_49, %c0_50, %c0_51] : memref<1x1x128xf32, #tpu.memory_space<vmem>>, vector<1x1x128xf32>
    %91 = vector.shape_cast %90 : vector<1x1x128xf32> to vector<1x128xf32>
    %c0_52 = arith.constant 0 : index
    %c0_53 = arith.constant 0 : index
    %c0_54 = arith.constant 0 : index
    %92 = vector.load %arg15[%c0_52, %c0_53, %c0_54] : memref<1x1x128xf32, #tpu.memory_space<vmem>>, vector<1x1x128xf32>
    %93 = vector.shape_cast %92 : vector<1x1x128xf32> to vector<1x128xf32>
    %cst_55 = arith.constant dense<0.000000e+00> : vector<16xf32>
    %94 = vector.multi_reduction <add>, %89, %cst_55 [1] : vector<16x128xf32> to vector<16xf32>
    %95 = vector.shape_cast %94 : vector<16xf32> to vector<16x1xf32>
    %cst_56 = arith.constant 1.280000e+02 : f32
    %96 = vector.broadcast %cst_56 : f32 to vector<16x1xf32>
    %97 = arith.divf %95, %96 : vector<16x1xf32>
    %98 = vector.broadcast %97 : vector<16x1xf32> to vector<16x128xf32>
    %99 = arith.subf %89, %98 : vector<16x128xf32>
    %100 = arith.mulf %99, %99 : vector<16x128xf32>
    %cst_57 = arith.constant dense<0.000000e+00> : vector<16xf32>
    %101 = vector.multi_reduction <add>, %100, %cst_57 [1] : vector<16x128xf32> to vector<16xf32>
    %102 = vector.shape_cast %101 : vector<16xf32> to vector<16x1xf32>
    %cst_58 = arith.constant 1.280000e+02 : f32
    %103 = vector.broadcast %cst_58 : f32 to vector<16x1xf32>
    %104 = arith.divf %102, %103 : vector<16x1xf32>
    %105 = vector.broadcast %97 : vector<16x1xf32> to vector<16x128xf32>
    %106 = arith.subf %89, %105 : vector<16x128xf32>
    %cst_59 = arith.constant 9.99999974E-6 : f32
    %107 = vector.broadcast %cst_59 : f32 to vector<16x1xf32>
    %108 = arith.addf %104, %107 : vector<16x1xf32>
    %109 = math.rsqrt %108 : vector<16x1xf32>
    %110 = vector.broadcast %109 : vector<16x1xf32> to vector<16x128xf32>
    %111 = arith.mulf %106, %110 : vector<16x128xf32>
    %112 = vector.broadcast %91 : vector<1x128xf32> to vector<16x128xf32>
    %113 = arith.mulf %111, %112 : vector<16x128xf32>
    %114 = vector.broadcast %93 : vector<1x128xf32> to vector<16x128xf32>
    %115 = arith.addf %113, %114 : vector<16x128xf32>
    %c0_60 = arith.constant 0 : index
    %c0_61 = arith.constant 0 : index
    %116 = vector.load %arg16[%c0_60, %c0_61] : memref<16x128xf32, #tpu.memory_space<vmem>>, vector<16x128xf32>
    tpu.vector_store %arg16[%c0_60, %c0_61], %115 {strides = array<i32>} : memref<16x128xf32, #tpu.memory_space<vmem>>, vector<16x128xf32>,
    return
  }
  func.func @transform_0(%arg0: i32) -> (i32, i32) {
    %c0_i32 = arith.constant 0 : i32
    %c0_i32_0 = arith.constant 0 : i32
    %c0_i32_1 = arith.constant 0 : i32
    return %c0_i32, %c0_i32_0 : i32, i32
  }
  func.func @transform_1(%arg0: i32) -> (i32, i32) {
    %c0_i32 = arith.constant 0 : i32
    %c0_i32_0 = arith.constant 0 : i32
    %c0_i32_1 = arith.constant 0 : i32
    return %c0_i32, %c0_i32_0 : i32, i32
  }
  func.func @transform_2(%arg0: i32) -> (i32, i32) {
    %c0_i32 = arith.constant 0 : i32
    %c0_i32_0 = arith.constant 0 : i32
    %c0_i32_1 = arith.constant 0 : i32
    return %c0_i32, %c0_i32_0 : i32, i32
  }
  func.func @transform_3(%arg0: i32) -> (i32, i32, i32) {
    %c0_i32 = arith.constant 0 : i32
    %c0_i32_0 = arith.constant 0 : i32
    %c0_i32_1 = arith.constant 0 : i32
    return %arg0, %c0_i32, %c0_i32_0 : i32, i32, i32
  }
  func.func @transform_4(%arg0: i32) -> (i32, i32, i32) {
    %c0_i32 = arith.constant 0 : i32
    %c0_i32_0 = arith.constant 0 : i32
    %c0_i32_1 = arith.constant 0 : i32
    return %arg0, %c0_i32, %c0_i32_0 : i32, i32, i32
  }
  func.func @transform_5(%arg0: i32) -> (i32, i32, i32) {
    %c0_i32 = arith.constant 0 : i32
    %c0_i32_0 = arith.constant 0 : i32
    %c0_i32_1 = arith.constant 0 : i32
    return %arg0, %c0_i32, %c0_i32_0 : i32, i32, i32
  }
  func.func @transform_6(%arg0: i32) -> (i32, i32, i32) {
    %c0_i32 = arith.constant 0 : i32
    %c0_i32_0 = arith.constant 0 : i32
    %c0_i32_1 = arith.constant 0 : i32
    return %arg0, %c0_i32, %c0_i32_0 : i32, i32, i32
  }
  func.func @transform_7(%arg0: i32) -> (i32, i32, i32) {
    %c0_i32 = arith.constant 0 : i32
    %c0_i32_0 = arith.constant 0 : i32
    %c0_i32_1 = arith.constant 0 : i32
    return %arg0, %c0_i32, %c0_i32_0 : i32, i32, i32
  }
  func.func @transform_8(%arg0: i32) -> (i32, i32, i32) {
    %c0_i32 = arith.constant 0 : i32
    %c0_i32_0 = arith.constant 0 : i32
    %c0_i32_1 = arith.constant 0 : i32
    return %arg0, %c0_i32, %c0_i32_0 : i32, i32, i32
  }
  func.func @transform_9(%arg0: i32) -> (i32, i32, i32) {
    %c0_i32 = arith.constant 0 : i32
    %c0_i32_0 = arith.constant 0 : i32
    %c0_i32_1 = arith.constant 0 : i32
    return %arg0, %c0_i32, %c0_i32_0 : i32, i32, i32
  }
  func.func @transform_10(%arg0: i32) -> (i32, i32, i32) {
    %c0_i32 = arith.constant 0 : i32
    %c0_i32_0 = arith.constant 0 : i32
    %c0_i32_1 = arith.constant 0 : i32
    return %arg0, %c0_i32, %c0_i32_0 : i32, i32, i32
  }
  func.func @transform_11(%arg0: i32) -> (i32, i32, i32) {
    %c0_i32 = arith.constant 0 : i32
    %c0_i32_0 = arith.constant 0 : i32
    %c0_i32_1 = arith.constant 0 : i32
    return %arg0, %c0_i32, %c0_i32_0 : i32, i32, i32
  }
  func.func @transform_12(%arg0: i32) -> (i32, i32, i32) {
    %c0_i32 = arith.constant 0 : i32
    %c0_i32_0 = arith.constant 0 : i32
    %c0_i32_1 = arith.constant 0 : i32
    return %arg0, %c0_i32, %c0_i32_0 : i32, i32, i32
  }
  func.func @transform_13(%arg0: i32) -> (i32, i32, i32) {
    %c0_i32 = arith.constant 0 : i32
    %c0_i32_0 = arith.constant 0 : i32
    %c0_i32_1 = arith.constant 0 : i32
    return %arg0, %c0_i32, %c0_i32_0 : i32, i32, i32
  }
  func.func @transform_14(%arg0: i32) -> (i32, i32, i32) {
    %c0_i32 = arith.constant 0 : i32
    %c0_i32_0 = arith.constant 0 : i32
    %c0_i32_1 = arith.constant 0 : i32
    return %arg0, %c0_i32, %c0_i32_0 : i32, i32, i32
  }
  func.func @transform_15(%arg0: i32) -> (i32, i32) {
    %c0_i32 = arith.constant 0 : i32
    %c0_i32_0 = arith.constant 0 : i32
    %c0_i32_1 = arith.constant 0 : i32
    return %c0_i32, %c0_i32_0 : i32, i32
  }
}

</mosaic_0001>

<bundles_post_ra>
// kernel: tpu_custom_call.1
= control target key start
LH: loop header
LB: loop body
LE: loop exit
PB: predicated region body
PF: predicated region fallthrough
CT: control target
= control target key end

     0   :  { %s7126_s0 = inlined_call_operand.hbm [shape: f32[16,128], index: 0, kind: input, shape index: {}]   ;;  %s7127_s1 = inlined_call_operand.hbm [shape: bf16[128,128], index: 1, kind: input, shape index: {}]   ;;  %s7128_s2 = inlined_call_operand.hbm [shape: f32[16,128], index: 2, kind: input, shape index: {}]   ;;  %s7129_s3 = inlined_call_operand.hbm [shape: bf16[2,128,384], index: 3, kind: input, shape index: {}]   ;;  %s7130_s4 = inlined_call_operand.hbm [shape: f32[2,1,384], index: 4, kind: input, shape index: {}]   ;;  %s7131_s5 = inlined_call_operand.hbm [shape: bf16[2,128,128], index: 5, kind: input, shape index: {}]   ;;  %s7132_s6 = inlined_call_operand.vmem [shape: f32[2,1,128], index: 6, kind: input, shape index: {}]   ;;  %s7133_s7 = inlined_call_operand.vmem [shape: f32[2,1,128], index: 7, kind: input, shape index: {}]   ;;  %s7134_s8 = inlined_call_operand.vmem [shape: f32[2,1,128], index: 8, kind: input, shape index: {}]   ;;  %s7135_s9 = inlined_call_operand.hbm [shape: bf16[2,128,2048], index: 9, kind: input, shape index: {}]   ;;  %s7136_s10 = inlined_call_operand.hbm [shape: f32[2,1,2048], index: 10, kind: input, shape index: {}]   ;;  %s7137_s11 = inlined_call_operand.hbm [shape: bf16[2,2048,128], index: 11, kind: input, shape index: {}]   ;;  %s7138_s12 = inlined_call_operand.vmem [shape: f32[2,1,128], index: 12, kind: input, shape index: {}]   ;;  %s7139_s13 = inlined_call_operand.vmem [shape: f32[2,1,128], index: 13, kind: input, shape index: {}]   ;;  %s7140_s14 = inlined_call_operand.vmem [shape: f32[2,1,128], index: 14, kind: input, shape index: {}]   ;;  %s7141_s15 = inlined_call_operand.hbm [shape: f32[16,128], index: 15, kind: output, shape index: {}]  }
   0x1   :  { %7154 = sst [smem:[#allocation29_spill]] %s7126_s0 }
   0x2   :  { %7155 = sst [smem:[#allocation30_spill]] %s7127_s1 }
   0x3   :  { %7156 = sst [smem:[#allocation31_spill]] %s7128_s2 }
   0x4   :  { %7157 = sst [smem:[#allocation32_spill]] %s7129_s3 }
   0x5   :  { %7158 = sst [smem:[#allocation33_spill]] %s7130_s4 }
   0x6   :  { %7159 = sst [smem:[#allocation34_spill]] %s7131_s5 }
   0x7   :  { %7160 = sst [smem:[#allocation35_spill]] %s7132_s6 }
   0x8   :  { %7161 = sst [smem:[#allocation36_spill]] %s7133_s7 }
   0x9   :  { %7162 = sst [smem:[#allocation37_spill]] %s7134_s8 }
   0xa   :  { %7163 = sst [smem:[#allocation38_spill]] %s7135_s9 }
   0xb   :  { %7164 = sst [smem:[#allocation39_spill]] %s7138_s12 }
   0xc   :  { %7165 = sst [smem:[#allocation40_spill]] %s7139_s13 }
   0xd   :  { %7166 = sst [smem:[#allocation41_spill]] %s7140_s14 }
   0xe   :  { %7167 = sst [smem:[#allocation42_spill]] %s7141_s15 }
   0xf   :  { %20 = vsyncpa [#allocation3], 0 }
  0x10   :  { %21 = vsyncpa [#allocation6], 0 }
  0x11   :  { %22 = vsyncpa [#allocation9], 0 }
  0x12   :  { %24 = vsyncpa [#allocation9 + $0x1], 0 }
  0x13   :  { %25 = vsyncpa [#allocation12], 0 }
  0x14   :  { %27 = vsyncpa [#allocation12 + $0x1], 0 }
  0x15   :  { %28 = vsyncpa [#allocation15], 0 }
  0x16   :  { %30 = vsyncpa [#allocation15 + $0x1], 0 }
  0x17   :  { %31 = vsyncpa [#allocation4], 0  ;;  %s6146_s18 = smov 0   ;;  %s6148_s19 = smov 0  }
  0x18   :  { %s6150_s20 = smov 0   ;;  %s6152_s21 = smov 0  }
  0x19 LB: > { %7168 = sst [smem:[#allocation24_spill]] %s6042_s19  ;;  %s6165_s22 = sadd.s32 4294967295, %s6050_s21   ;;  %s6050_s21 = sphi %s6152_s21, %s7207_s21   ;;  %s6046_s20 = sphi %s6150_s20, %s7210_s20   ;;  %s6042_s19 = sphi %s6148_s19, %s7209_s19   ;;  %s6038_s18 = sphi %s6146_s18, %s7208_s18  }
  0x1a   : > { %7169 = sst [smem:[#allocation25_spill]] %s6046_s20  ;;  %p120_p0 = scmp.ne.s32.totalorder %s6042_s19, %s6038_s18 }
  0x1b   : > { %p121_p1 = scmp.eq.s32.totalorder %s6165_s22, 0  ;;  %p4043_p2 = scmp.ge.s32.totalorder %s6050_s21, 1 }
  0x1c   : > { %p438_p3 = scmp.lt.s32.totalorder %s6050_s21, 3  ;;  %p4044_p4 = scmp.ne.s32.totalorder %s6165_s22, 0 }
  0x1d   : > { %p6174_p5 = por %p121_p1, %p120_p0  ;;  %s7172_s1 = sld [smem:[#allocation30_spill]] }
  0x1e   : > { %p6181_p6 = pnand %p4043_p2, %p438_p3  ;;  %s6052_s28 = smov [#allocation5]  }
  0x1f   : > { %s7170_s23 = scalar_select %p6174_p5, 1, 0 }
  0x20   : > { %p5590_p7 = pneg %p6181_p6  ;;  %s465_s29 = sshll.u32 %s6052_s28, 4  ;;  %s466_s29 = int_to_ptr.vmem [resolvable:$true] %s465_s29 }
  0x21   : > { %7171 = sst [smem:[#allocation26_spill]] %s7170_s23  ;;  %s6194_s16 = sadd.s32 1, %s6050_s21  }
  0x22   : > { %p6189_p8 = pnand %p5590_p7, %p121_p1  ;;  %7175 = sst [smem:[#allocation27_spill]] %s6194_s16 }
  0x23   : > { %s463_s26 = sshll.u32 %s7172_s1, 4  ;;  %s7142_s17 = smov 64   ;;  %s464_s26 = int_to_ptr.hbm [resolvable:$true] %s463_s26 }
  0x24   : > { %s7144_s18 = smov 4   ;;  %s104_s24 = ssub.s32 %s6050_s21, %s6194_s16 }
  0x25   : > { %5596 = dma.hbm_to_vmem [thread:$0]  (!%p6189_p8), %s464_s26, 1024, %s466_s29, [#allocation6], %s7142_s17, %s7142_s17, %s7144_s18  }
  0x26   : > { %s107_s25 = sadd.s32 1, %s6046_s20  ;;  %p105_p9 = scmp.eq.s32.totalorder %s104_s24, 0 }
  0x27   : > { %p114_p10 = scmp.ne.s32.totalorder %s6046_s20, %s6042_s19  ;;  %p115_p11 = scmp.eq.s32.totalorder %s6050_s21, 0 }
  0x28   : > { %p5622_p12 = scmp.lt.s32.totalorder %s6050_s21, 2  ;;  %s6212_s1 = sand.u32 1, %s6050_s21  }
  0x29   : > { %s6209_s28 = scalar_select %p105_p9, %s6046_s20, %s107_s25  }
  0x2a   : > { %p116_p13 = por %p115_p11, %p114_p10  ;;  %s6215_s15 = sand.u32 1, %s6046_s20  }
  0x2b   : > { %7176 = sst [smem:[#allocation28_spill]] %s6209_s28  ;;  %s5556_s14 = smul.u32 192, %s6215_s15 }
  0x2c   : > { %p6218_p0 = pnand %p5622_p12, %p116_p13  ;;  %s5557_s26 = smul.u32 192, %s6050_s21 }
  0x2d   : > { %s7178_s3 = sld [smem:[#allocation32_spill]]  ;;  %s497_s25 = scalar_lea.vmem [#allocation8], %s5556_s14 }
  0x2e   : > { %s505_s18 = sshll.u32 %s497_s25, 4  ;;  %p6229_p3 = pneg %p6218_p0  ;;  %s506_s18 = int_to_ptr.vmem [resolvable:$true] %s505_s18 }
  0x33   : > { %s502_s17 = scalar_lea.hbm %s7178_s3, %s5557_s26 }
  0x34   : > { %s503_s28 = sshll.u32 %s502_s17, 4  ;;  %s5735_s17 = scalar_lea.hbm %s7178_s3, 384  ;;  %s504_s28 = int_to_ptr.hbm [resolvable:$true] %s503_s28 }
  0x35   : > { %s5728_s20 = sshra.s32 %s504_s28, 4  ;;  %s5729_s20 = int_to_ptr.hbm [resolvable:$true] %s5728_s20 }
  0x36   : > { %s5730_s12 = scalar_lea.hbm %s5729_s20, 192  ;;  %p5736_p10 = scmp.lt.s32.totalorder %s5729_s20, %s7178_s3 }
  0x37   : > { %p5731_p2 = scmp.ne.s32.totalorder %s5729_s20, %s5730_s12  ;;  %p5737_p11 = scmp.lt.s32.totalorder %s5735_s17, %s5730_s12 }
  0x39   : > { %p5733_p7 = pnand %p6229_p3, %p5731_p2  ;;  %p5738_p12 = por %p5737_p11, %p5736_p10 }
  0x3b   : > { %p5734_p9 = pneg %p5733_p7 }
  0x3d   : > { %p5739_p13 = pnand %p5738_p12, %p5734_p9 }
  0x3f   : > { %5742 = shalt.err (!%p5739_p13)
}
  0x40   : > { %s6055_s25 = smov 192   ;;  %s6056_s16 = smov 12  }
  0x41   : > { %s7180_s7 = scalar_lea.sflag [#allocation9], %s6212_s1  ;;  %s4049_s26 = sshll.u32 %s6215_s15, 6 }
  0x42   : > { %5603 = dma.hbm_to_vmem [thread:$0]  (!%p6218_p0), %s504_s28, 3072, %s506_s18, %s7180_s7, %s6055_s25, %s6055_s25, %s6056_s16  }
  0x43   : > { %s5257_s14 = sshll.u32 %s6050_s21, 6  ;;  %s7181_s5 = sld [smem:[#allocation34_spill]] }
  0x44   : > { %s538_s20 = scalar_lea.vmem [#allocation11], %s4049_s26  ;;  %s7152_s3 = scalar_lea.sflag [#allocation12], %s6212_s1 }
  0x45   : > { %s546_s17 = sshll.u32 %s538_s20, 4  ;;  %s547_s17 = int_to_ptr.vmem [resolvable:$true] %s546_s17 }
  0x49   : > { %s543_s12 = scalar_lea.hbm %s7181_s5, %s5257_s14  ;;  %s5765_s18 = scalar_lea.hbm %s7181_s5, 128 }
  0x4a   : > { %s544_s24 = sshll.u32 %s543_s12, 4  ;;  %s545_s24 = int_to_ptr.hbm [resolvable:$true] %s544_s24 }
  0x4b   : > { %s5758_s23 = sshra.s32 %s545_s24, 4  ;;  %s5759_s23 = int_to_ptr.hbm [resolvable:$true] %s5758_s23 }
  0x4c   : > { %s5760_s19 = scalar_lea.hbm %s5759_s23, 64  ;;  %p5766_p10 = scmp.lt.s32.totalorder %s5759_s23, %s7181_s5 }
  0x4d   : > { %p5761_p2 = scmp.ne.s32.totalorder %s5759_s23, %s5760_s19  ;;  %p5767_p11 = scmp.lt.s32.totalorder %s5765_s18, %s5760_s19 }
  0x4f   : > { %p5763_p7 = pnand %p5761_p2, %p6229_p3  ;;  %p5768_p12 = por %p5767_p11, %p5766_p10 }
  0x51   : > { %p5764_p9 = pneg %p5763_p7 }
  0x53   : > { %p5769_p13 = pnand %p5768_p12, %p5764_p9 }
  0x55   : > { %5772 = shalt.err (!%p5769_p13)
}
  0x56   : > { %s7182_s25 = smov 4   ;;  %s7183_s26 = smov 64  }
  0x57   : > { %5609 = dma.hbm_to_vmem [thread:$0]  (!%p6218_p0), %s545_s24, 1024, %s547_s17, %s7152_s3, %s7183_s26, %s7183_s26, %s7182_s25  }
  0x58   : > { %s4055_s14 = sshll.u32 %s6215_s15, 4  ;;  %s4056_s29 = sshll.u32 %s6050_s21, 4 }
  0x59   : > { %s604_s19 = scalar_lea.hbm %s7136_s10, %s4056_s29  ;;  %s600_s7 = scalar_lea.vmem [#allocation14], %s4055_s14 }
  0x5a   : > { %s606_s20 = sshll.u32 %s604_s19, 4  ;;  %s608_s16 = sshll.u32 %s600_s7, 4  ;;  %s607_s20 = int_to_ptr.hbm [resolvable:$true] %s606_s20  ;;  %s609_s16 = int_to_ptr.vmem [resolvable:$true] %s608_s16 }
  0x5b   : > { %s7153_s18 = scalar_lea.sflag [#allocation15], %s6212_s1  ;;  %s5788_s28 = sshra.s32 %s607_s20, 4  ;;  %s5789_s28 = int_to_ptr.hbm [resolvable:$true] %s5788_s28 }
  0x5c   : > { %s5790_s6 = scalar_lea.hbm %s5789_s28, 16  ;;  %s5795_s3 = scalar_lea.hbm %s7136_s10, 32 }
  0x5d   : > { %p5791_p2 = scmp.ne.s32.totalorder %s5789_s28, %s5790_s6  ;;  %p5796_p10 = scmp.lt.s32.totalorder %s5789_s28, %s7136_s10 }
  0x5e   : > { %p5797_p11 = scmp.lt.s32.totalorder %s5795_s3, %s5790_s6 }
  0x5f   : > { %p5793_p7 = pnand %p5791_p2, %p6229_p3 }
  0x60   : > { %p5798_p12 = por %p5797_p11, %p5796_p10 }
  0x61   : > { %p5794_p9 = pneg %p5793_p7 }
  0x63   : > { %p5799_p13 = pnand %p5798_p12, %p5794_p9 }
  0x65   : > { %5802 = shalt.err (!%p5799_p13)
}
  0x66   : > { %5615 = dma.hbm_to_vmem [thread:$0]  (!%p6218_p0), %s607_s20, 256, %s609_s16, %s7153_s18  }
  0x67   : > { %s7184_s0 = sld [smem:[#allocation29_spill]]  ;;  %s6057_s5 = smov [#allocation2]  }
  0x68   : > { %s451_s19 = sshll.u32 %s6057_s5, 4  ;;  %s7185_s2 = sld [smem:[#allocation31_spill]]  ;;  %s452_s19 = int_to_ptr.vmem [resolvable:$true] %s451_s19 }
  0x69   : > { %s6058_s6 = smov 128   ;;  %s6059_s17 = smov 8  }
  0x6a   : > { %s6060_s24 = smov [#allocation7]   ;;  %s5558_s16 = smul.u32 3, %s6215_s15 }
  0x6b   : > { %s479_s20 = sshll.u32 %s6060_s24, 4  ;;  %s5559_s12 = smul.u32 3, %s6050_s21  ;;  %s480_s20 = int_to_ptr.vmem [resolvable:$true] %s479_s20 }
  0x6c   : > { %s7186_s4 = sld [smem:[#allocation33_spill]]  ;;  %s519_s3 = scalar_lea.vmem [#allocation10], %s5558_s16 }
  0x6d   : > { %s449_s23 = sshll.u32 %s7184_s0, 4  ;;  %s527_s7 = sshll.u32 %s519_s3, 4  ;;  %s450_s23 = int_to_ptr.hbm [resolvable:$true] %s449_s23  ;;  %s528_s7 = int_to_ptr.vmem [resolvable:$true] %s527_s7 }
  0x6e   : > { %s477_s28 = sshll.u32 %s7185_s2, 4  ;;  %s478_s28 = int_to_ptr.hbm [resolvable:$true] %s477_s28 }
  0x6f   : > { %5593 = dma.hbm_to_vmem [thread:$0]  (!%p6189_p8), %s450_s23, 256, %s452_s19, [#allocation3], %s6058_s6, %s6058_s6, %s6059_s17  }
  0x70   : > { %5599 = dma.hbm_to_vmem [thread:$0]  (!%p6189_p8), %s478_s28, 256, %s480_s20, [#allocation6], %s6058_s6, %s6058_s6, %s6059_s17  }
  0x72   : > { %s523_s5 = scalar_lea.hbm %s7186_s4, %s5559_s12  ;;  %s5885_s30 = scalar_lea.hbm %s7186_s4, 6 }
  0x73   : > { %s525_s18 = sshll.u32 %s523_s5, 4  ;;  %s526_s18 = int_to_ptr.hbm [resolvable:$true] %s525_s18 }
  0x74   : > { %s5878_s0 = sshra.s32 %s526_s18, 4  ;;  %s5879_s0 = int_to_ptr.hbm [resolvable:$true] %s5878_s0 }
  0x75   : > { %s5880_s23 = scalar_lea.hbm %s5879_s0, 3  ;;  %p5886_p8 = scmp.lt.s32.totalorder %s5879_s0, %s7186_s4 }
  0x76   : > { %p5881_p2 = scmp.ne.s32.totalorder %s5879_s0, %s5880_s23  ;;  %p5887_p10 = scmp.lt.s32.totalorder %s5885_s30, %s5880_s23 }
  0x78   : > { %p5883_p7 = pnand %p5881_p2, %p6229_p3  ;;  %p5888_p11 = por %p5887_p10, %p5886_p8 }
  0x7a   : > { %p5884_p9 = pneg %p5883_p7 }
  0x7c   : > { %p5889_p12 = pnand %p5888_p11, %p5884_p9 }
  0x7e   : > { %5892 = shalt.err (!%p5889_p12)
}
  0x7f   : > { %s7187_s17 = scalar_lea.sflag [#allocation9], %s6212_s1  ;;  %s4052_s20 = sshll.u32 %s6215_s15, 10 }
  0x80   : > { %5606 = dma.hbm_to_vmem [thread:$0]  (!%p6218_p0), %s526_s18, 48, %s528_s7, %s7187_s17  }
  0x81   : > { %s5258_s16 = sshll.u32 %s6050_s21, 10  ;;  %s7188_s9 = sld [smem:[#allocation38_spill]] }
  0x82   : > { %s578_s0 = scalar_lea.vmem [#allocation13], %s4052_s20 }
  0x83   : > { %s586_s3 = sshll.u32 %s578_s0, 4  ;;  %s587_s3 = int_to_ptr.vmem [resolvable:$true] %s586_s3 }
  0x87   : > { %s583_s29 = scalar_lea.hbm %s7188_s9, %s5258_s16  ;;  %s5915_s15 = scalar_lea.hbm %s7188_s9, 2048 }
  0x88   : > { %s584_s5 = sshll.u32 %s583_s29, 4  ;;  %s585_s5 = int_to_ptr.hbm [resolvable:$true] %s584_s5 }
  0x89   : > { %s5908_s23 = sshra.s32 %s585_s5, 4  ;;  %s5909_s23 = int_to_ptr.hbm [resolvable:$true] %s5908_s23 }
  0x8a   : > { %s5910_s19 = scalar_lea.hbm %s5909_s23, 1024  ;;  %p5916_p9 = scmp.lt.s32.totalorder %s5909_s23, %s7188_s9 }
  0x8b   : > { %p5911_p13 = scmp.ne.s32.totalorder %s5909_s23, %s5910_s19  ;;  %p5917_p8 = scmp.lt.s32.totalorder %s5915_s15, %s5910_s19 }
  0x8d   : > { %p5913_p2 = pnand %p5911_p13, %p6229_p3  ;;  %p5918_p10 = por %p5917_p8, %p5916_p9 }
  0x8f   : > { %p5914_p7 = pneg %p5913_p2 }
  0x91   : > { %p5919_p11 = pnand %p5918_p10, %p5914_p7 }
  0x93   : > { %5922 = shalt.err (!%p5919_p11)
}
  0x94   : > { %s6061_s30 = smov 1024   ;;  %s7189_s28 = scalar_lea.sflag [#allocation12], %s6212_s1 }
  0x95   : > { %5612 = dma.hbm_to_vmem [thread:$0]  (!%p6218_p0), %s585_s5, 16384, %s587_s3, %s7189_s28, %s6061_s30, %s6061_s30, %s7183_s26  }
  0x96   : > { %s624_s12 = scalar_lea.hbm %s7137_s11, %s5258_s16  ;;  %s619_s14 = scalar_lea.vmem [#allocation16], %s4052_s20 }
  0x97   : > { %s627_s29 = sshll.u32 %s619_s14, 4  ;;  %s625_s0 = sshll.u32 %s624_s12, 4  ;;  %s628_s29 = int_to_ptr.vmem [resolvable:$true] %s627_s29  ;;  %s626_s0 = int_to_ptr.hbm [resolvable:$true] %s625_s0 }
  0x98   : > { %s5938_s23 = sshra.s32 %s626_s0, 4  ;;  %s5945_s5 = scalar_lea.hbm %s7137_s11, 2048  ;;  %s5939_s23 = int_to_ptr.hbm [resolvable:$true] %s5938_s23 }
  0x99   : > { %s5940_s19 = scalar_lea.hbm %s5939_s23, 1024  ;;  %p5946_p7 = scmp.lt.s32.totalorder %s5939_s23, %s7137_s11 }
  0x9a   : > { %p5941_p12 = scmp.ne.s32.totalorder %s5939_s23, %s5940_s19  ;;  %p5947_p9 = scmp.lt.s32.totalorder %s5945_s5, %s5940_s19 }
  0x9c   : > { %p5943_p13 = pnand %p5941_p12, %p6229_p3  ;;  %p5948_p8 = por %p5947_p9, %p5946_p7 }
  0x9e   : > { %p5944_p2 = pneg %p5943_p13 }
  0xa0   : > { %p5949_p10 = pnand %p5948_p8, %p5944_p2 }
  0xa2   : > { %5952 = shalt.err (!%p5949_p10)
}
  0xa3   : > { %s7190_s8 = scalar_lea.sflag [#allocation15], %s6212_s1  ;;  %657 = sbr.rel (%p6181_p6) target bundleno = 1907 (0x773), region = 80 }
  0xa4   : > { %5618 = dma.hbm_to_vmem [thread:$0]  (!%p6218_p0), %s626_s0, 16384, %s628_s29, %s7190_s8, %s7183_s26, %s7183_s26, %s7182_s25  }
  0xa8   : > { %6013 = dma.done.wait (%p121_p1), [#allocation3], 256  }
  0xa9   : > { %6015 = vsyncadd (%p121_p1), [#allocation3], 4294967040 }
  0xaa   : > { %6017 = dma.done.wait (%p121_p1), [#allocation6], 1280  }
  0xab   : > { %6019 = vsyncadd (%p121_p1), [#allocation6], 4294966016  ;;  %s7191_s13 = sld [smem:[#allocation24_spill]]  ;;  %s674_s1 = sand.u32 1, %s6165_s22  }
  0xac   : > { %s675_s27 = scalar_lea.sflag [#allocation9], %s674_s1 }
  0xb1   : > { %s676_s25 = sand.u32 1, %s7191_s13  }
  0xb2   : > { %s5560_s26 = smul.u32 192, %s676_s25 }
  0xb4   : > { %s6359_s16 = scalar_lea.vmem [#allocation8], %s5560_s26 }
  0xb5   : > { %6021 = dma.done.wait (%p6174_p5), %s675_s27, 3120  }
  0xb6   : > { %6023 = vsyncadd (%p6174_p5), %s675_s27, 4294964176  ;;  %s5561_s21 = smul.u32 3, %s676_s25  ;;  %s4064_s7 = sshll.u32 %s676_s25, 6 }
  0xb7   : > { %s695_s28 = scalar_lea.sflag [#allocation12], %s674_s1  ;;  %s6367_s6 = scalar_lea.vmem [#allocation11], %s4064_s7 }
  0xb8   : > { %s6365_s30 = scalar_lea.vmem [#allocation10], %s5561_s21 }
  0xb9   : > { %6025 = dma.done.wait (%p6174_p5), %s695_s28, 17408  }
  0xba   : > { %6027 = vsyncadd (%p6174_p5), %s695_s28, 4294949888  ;;  %s4065_s17 = sshll.u32 %s676_s25, 10  ;;  %s4066_s12 = sshll.u32 %s676_s25, 4 }
  0xbb   : > { %s6373_s14 = scalar_lea.vmem [#allocation13], %s4065_s17  ;;  %s715_s29 = scalar_lea.sflag [#allocation15], %s674_s1 }
  0xbc   : > { %s6375_s0 = scalar_lea.vmem [#allocation14], %s4066_s12 }
  0xbd   : > { %6029 = dma.done.wait (%p6174_p5), %s715_s29, 16640  }
  0xbe   : > { %6031 = vsyncadd (%p6174_p5), %s715_s29, 4294950656  ;;  %p814_p1 = scmp.lt.s32.totalorder %s6165_s22, 1  ;;  %s7194_s8 = sld [smem:[#allocation36_spill]] }
  0xbf   : > { %s7195_s25 = sld [smem:[#allocation37_spill]]  ;;  %s6409_s5 = scalar_lea.vmem [#allocation16], %s4065_s17 }
  0xc0   : > { %s6383_s23 = scalar_select %p814_p1, %s6165_s22, 1 }
  0xc1   : > { %s7196_s7 = sld [smem:[#allocation39_spill]] }
  0xc2   : > { %s7197_s19 = sld [smem:[#allocation40_spill]] }
  0xc3   : > { %s7198_s9 = sld [smem:[#allocation41_spill]] }
  0xc4   : > { %s819_s13 = scalar_lea.vmem %s7194_s8, %s6383_s23 }
  0xc5   : > { %s822_s26 = scalar_lea.vmem %s7195_s25, %s6383_s23  ;;  %835 = sbr.rel (%p4044_p4) target bundleno = 205 (0xcd), region = 120 }
  0xc7   : > { %s825_s28 = scalar_lea.vmem %s7196_s7, %s6383_s23 }
  0xc8   : > { %s828_s24 = scalar_lea.vmem %s7197_s19, %s6383_s23 }
  0xc9   : > { %s831_s18 = scalar_lea.vmem %s7198_s9, %s6383_s23 }
  0xca   : > { %v836_v0 = vld [vmem:[#allocation2] sm:$0xff]  ;;  %v837_v1 = vld [vmem:[#allocation2 + $0x8] sm:$0xff] }
  0xcb   : > { %838 = vst [vmem:[#allocation17] sm:$0xff] %v836_v0 }
  0xcc   : > { %839 = vst [vmem:[#allocation17 + $0x8] sm:$0xff] %v837_v1 }
  0xcd PF: > { %v5289_v2 = vld [vmem:[%s6359_s16 + $0xac] sm:$0xf]  ;;  %v4157_v3 = vld [vmem:[%s6359_s16 + $0xb4] sm:$0xf0]  ;;  %v5286_v4 = vld [vmem:[%s6359_s16 + $0x94] sm:$0xf] }
  0xce   : > { %v4160_v5 = vor.u32 %v5289_v2, %v4157_v3  ;;  %v4145_v6 = vld [vmem:[%s6359_s16 + $0x9c] sm:$0xf0]  ;;  %v5283_v8 = vld [vmem:[%s6359_s16 + $0x7c] sm:$0xf]  ;;  %v4133_v9 = vld [vmem:[%s6359_s16 + $0x84] sm:$0xf0] }
  0xcf   : > { %v4148_v7 = vor.u32 %v5286_v4, %v4145_v6  ;;  %v4155_v10 = vld [vmem:[%s6359_s16 + $0xa8] sm:$0xf]  ;;  %v5290_v11 = vld [vmem:[%s6359_s16 + $0xb0] sm:$0xf0]  ;;  %v4143_v12 = vld [vmem:[%s6359_s16 + $0x90] sm:$0xf]  ;;  %v4136_v13 = vor.u32 %v5283_v8, %v4133_v9 }
  0xd0   : > { %1041 = vmatpush.bf16.msra.mxu1 %v4160_v5  ;;  %v4156_v14 = vor.u32 %v5290_v11, %v4155_v10  ;;  %v5287_v15 = vld [vmem:[%s6359_s16 + $0x98] sm:$0xf0]  ;;  %v5280_v16 = vld [vmem:[%s6359_s16 + $0x64] sm:$0xf]  ;;  %v4121_v17 = vld [vmem:[%s6359_s16 + $0x6c] sm:$0xf0] }
  0xd1   : > { %v4144_v18 = vor.u32 %v5287_v15, %v4143_v12  ;;  %v4131_v19 = vld [vmem:[%s6359_s16 + $0x78] sm:$0xf]  ;;  %v5284_v20 = vld [vmem:[%s6359_s16 + $0x80] sm:$0xf0]  ;;  %v4124_v21 = vor.u32 %v5280_v16, %v4121_v17  ;;  %v5277_v22 = vld [vmem:[%s6359_s16 + $0x4c] sm:$0xf] }
  0xd2   : > { %1027 = vmatpush.bf16.msra.mxu0 %v4156_v14  ;;  %v4109_v23 = vld [vmem:[%s6359_s16 + $0x54] sm:$0xf0]  ;;  %v4132_v24 = vor.u32 %v5284_v20, %v4131_v19  ;;  %v4119_v25 = vld [vmem:[%s6359_s16 + $0x60] sm:$0xf]  ;;  %v5281_v26 = vld [vmem:[%s6359_s16 + $0x68] sm:$0xf0] }
  0xd3   : > { %v4112_v27 = vor.u32 %v5277_v22, %v4109_v23  ;;  %v5274_v28 = vld [vmem:[%s6359_s16 + $0x34] sm:$0xf]  ;;  %v4097_v29 = vld [vmem:[%s6359_s16 + $0x3c] sm:$0xf0]  ;;  %v4120_v30 = vor.u32 %v5281_v26, %v4119_v25  ;;  %v4107_v31 = vld [vmem:[%s6359_s16 + $0x48] sm:$0xf] }
  0xd4   : > { %1042 = vmatpush.bf16.msra.mxu1 %v4148_v7  ;;  %v5278_v32 = vld [vmem:[%s6359_s16 + $0x50] sm:$0xf0]  ;;  %v4100_v33 = vor.u32 %v5274_v28, %v4097_v29  ;;  %v5271_v34 = vld [vmem:[%s6359_s16 + $0x1c] sm:$0xf]  ;;  %v4085_v35 = vld [vmem:[%s6359_s16 + $0x24] sm:$0xf0] }
  0xd5   : > { %v4108_v36 = vor.u32 %v5278_v32, %v4107_v31  ;;  %v4095_v37 = vld [vmem:[%s6359_s16 + $0x30] sm:$0xf]  ;;  %v5275_v38 = vld [vmem:[%s6359_s16 + $0x38] sm:$0xf0]  ;;  %v4088_v39 = vor.u32 %v5271_v34, %v4085_v35  ;;  %v5268_v40 = vld [vmem:[%s6359_s16 + $0x4] sm:$0xf] }
  0xd6   : > { %1028 = vmatpush.bf16.msra.mxu0 %v4144_v18  ;;  %v4073_v41 = vld [vmem:[%s6359_s16 + $0xc] sm:$0xf0]  ;;  %v4096_v42 = vor.u32 %v5275_v38, %v4095_v37  ;;  %v4083_v43 = vld [vmem:[%s6359_s16 + $0x18] sm:$0xf]  ;;  %v5272_v44 = vld [vmem:[%s6359_s16 + $0x20] sm:$0xf0] }
  0xd7   : > { %v4076_v45 = vor.u32 %v5268_v40, %v4073_v41  ;;  %v6443_v46 = vld [vmem:[#allocation17] sm:$0xff]  ;;  %v6445_v47 = vld [vmem:[#allocation17 + $0x8] sm:$0xff]  ;;  %v4084_v48 = vor.u32 %v5272_v44, %v4083_v43  ;;  %v4071_v50 = vld [vmem:[%s6359_s16] sm:$0xf]  ;;  %s7199_s9 = sld [smem:[#allocation35_spill]]  ;;  %s6063_s21 = smov [#allocation17]  }
  0xd8   : > { %1043 = vmatpush.bf16.msra.mxu1 %v4136_v13  ;;  %v6449_v49 = vpack.c.bf16 %v6445_v47, %v6443_v46  ;;  %v5269_v51 = vld [vmem:[%s6359_s16 + $0x8] sm:$0xf0]  ;;  %v6456_v53 = vld [vmem:[%s6365_s30] sm:$0x7]  ;;  %v6483_v13 = vld [vmem:[#allocation5 + $0x28] sm:$0xff]   ;;  %s3795_s7 = sshll.u32 %s6063_s21, 4  ;;  %s3796_s7 = int_to_ptr.vmem [resolvable:$true] %s3795_s7 }
  0xd9   : > { %v4072_v52 = vor.u32 %v5269_v51, %v4071_v50  ;;  %v894_v55 = vperm.slane %v6456_v53, 1  ;;  %v6459_v61 = vld [vmem:[#allocation5 + $0x38] sm:$0xff]   ;;  %v6467_v5 = vld [vmem:[#allocation5 + $0x30] sm:$0xff]   ;;  %v1089_v15 = vunpack.c.l.bf16 %v6483_v13  ;;  %v1090_v16 = vunpack.c.h.bf16 %v6483_v13  ;;  %v6493_v19 = vld [vmem:[#allocation5 + $0x20] sm:$0xff]   ;;  %s7206_s29 = sld [smem:[#allocation42_spill]]  ;;  %p5626_p4 = scmp.eq.s32.totalorder %s6165_s22, 1 }
  0xda   : > { %1029 = vmatpush.bf16.msra.mxu0 %v4132_v24  ;;  %v1093_v1 = vunpack.c.l.bf16 %v6459_v61  ;;  %v1094_v2 = vunpack.c.h.bf16 %v6459_v61  ;;  %v1091_v9 = vunpack.c.l.bf16 %v6467_v5  ;;  %v1092_v10 = vunpack.c.h.bf16 %v6467_v5  ;;  %v6503_v25 = vld [vmem:[#allocation5 + $0x18] sm:$0xff]   ;;  %v6513_v31 = vld [vmem:[#allocation5 + $0x10] sm:$0xff]   ;;  %v4163_v35 = vld [vmem:[%s6359_s16 + $0xb0] sm:$0xf] }
  0xdb   : > { %v1088_v22 = vunpack.c.h.bf16 %v6493_v19  ;;  %v1086_v28 = vunpack.c.h.bf16 %v6503_v25  ;;  %v1084_v34 = vunpack.c.h.bf16 %v6513_v31  ;;  %v4151_v37 = vld [vmem:[%s6359_s16 + $0x98] sm:$0xf]  ;;  %v4139_v44 = vld [vmem:[%s6359_s16 + $0x80] sm:$0xf] }
  0xdc   : > { %1044 = vmatpush.bf16.msra.mxu1 %v4124_v21  ;;  %v1087_v21 = vunpack.c.l.bf16 %v6493_v19  ;;  %v6527_v43 = vld [vmem:[#allocation5 + $0x8] sm:$0xff]  }
  0xdd   : > { %v1081_v50 = vunpack.c.l.bf16 %v6527_v43  ;;  %v1082_v51 = vunpack.c.h.bf16 %v6527_v43  ;;  %v5265_v61 = vld [vmem:[#allocation5 + $0x28] sm:$0xff]  ;;  %v5262_v43 = vld [vmem:[#allocation5 + $0x10] sm:$0xff] }
  0xde   : > { %1030 = vmatpush.bf16.msra.mxu0 %v4120_v30 }
  0xdf   : > { %s3797_s19 = sshll.u32 %s7206_s29, 4  ;;  %s3798_s19 = int_to_ptr.hbm [resolvable:$true] %s3797_s19 }
  0xe0   : > { %1045 = vmatpush.bf16.msra.mxu1 %v4112_v27  ;;  %v1085_v27 = vunpack.c.l.bf16 %v6503_v25 }
  0xe2   : > { %1031 = vmatpush.bf16.msra.mxu0 %v4108_v36  ;;  %v5291_v36 = vld [vmem:[%s6359_s16 + $0xb8] sm:$0xf0] }
  0xe3   : > { %v4164_v38 = vor.u32 %v5291_v36, %v4163_v35  ;;  %v5270_v35 = vld [vmem:[%s6359_s16 + $0x10] sm:$0xf0] }
  0xe4   : > { %1046 = vmatpush.bf16.msra.mxu1 %v4100_v33  ;;  %v1083_v33 = vunpack.c.l.bf16 %v6513_v31 }
  0xe5   : > { %1055 = vmatpush.bf16.msra.mxu2 %v4164_v38 }
  0xe6   : > { %1032 = vmatpush.bf16.msra.mxu0 %v4096_v42 }
  0xe8   : > { %1047 = vmatpush.bf16.msra.mxu1 %v4088_v39  ;;  %v5288_v39 = vld [vmem:[%s6359_s16 + $0xa0] sm:$0xf0] }
  0xe9   : > { %v4152_v42 = vor.u32 %v5288_v39, %v4151_v37 }
  0xea   : > { %1033 = vmatpush.bf16.msra.mxu0 %v4084_v48 }
  0xeb   : > { %1056 = vmatpush.bf16.msra.mxu2 %v4152_v42 }
  0xec   : > { %1048 = vmatpush.bf16.msra.mxu1 %v4076_v45  ;;  %v5285_v45 = vld [vmem:[%s6359_s16 + $0x88] sm:$0xf0] }
  0xee   : > { %1034 = vmatpush.bf16.msra.mxu0 %v4072_v52  ;;  %v4140_v52 = vor.u32 %v5285_v45, %v4139_v44  ;;  %v1155_v45 = vld [vmem:[#allocation7 + $0x8] sm:$0xff] }
  0xef   : > { %1049 = vmatmul.bf16.vlgmr.msra.gmra.mxu1 %v6449_v49 }
  0xf0   : > { %1057 = vmatpush.bf16.msra.mxu2 %v4140_v52 }
  0xf1   : > { %1035 = vmatmul.bf16.vlgmr.msra.gmra.mxu0 %v6449_v49 }
 0x16c   : > { %v1050_v54 = vpop.f32.mrf.mxu1 }
 0x16d   : > { %v1051_v56 = vadd.f32 %v1050_v54, %v894_v55  ;;  %v4127_v54 = vld [vmem:[%s6359_s16 + $0x68] sm:$0xf] }
 0x16f   : > { %v1069_v58 = vpack.c.bf16 %v1051_v56, %v1051_v56 }
 0x171   : > { %v1073_v62 = vunpack.c.l.b16 %v1069_v58 }
 0x174   : > { %v1052_v57 = vpop.f32.mrf.mxu1 }
 0x175   : > { %v1053_v59 = vadd.f32 %v1052_v57, %v894_v55  ;;  %v5282_v55 = vld [vmem:[%s6359_s16 + $0x70] sm:$0xf0] }
 0x176   : > { %v4128_v58 = vor.u32 %v5282_v55, %v4127_v54 }
 0x177   : > { %v1070_v60 = vpack.c.bf16 %v1053_v59, %v1053_v59  ;;  %v6541_v59 = vld [vmem:[#allocation5] sm:$0xff]  }
 0x178   : > { %1058 = vmatpush.bf16.msra.mxu2 %v4128_v58 }
 0x179   : > { %v1074_v63 = vunpack.c.l.b16 %v1070_v60  ;;  %v4115_v60 = vld [vmem:[%s6359_s16 + $0x50] sm:$0xf] }
 0x17b   : > { %v1075_v0 = vpack.c.b16 %v1074_v63, %v1073_v62  ;;  %v5279_v62 = vld [vmem:[%s6359_s16 + $0x58] sm:$0xf0]  ;;  %v1036_v63 = vpop.f32.mrf.mxu0 }
 0x17d   : > { %v6463_v3 = vunpack.c.l.bf16 %v1075_v0  ;;  %v6465_v4 = vunpack.c.h.bf16 %v1075_v0 }
 0x17f   : > { %v1109_v6 = vmul.f32 %v1093_v1, %v6463_v3  ;;  %v1110_v7 = vmul.f32 %v1094_v2, %v6465_v4  ;;  %v1107_v11 = vmul.f32 %v1091_v9, %v6463_v3  ;;  %v1108_v12 = vmul.f32 %v1092_v10, %v6465_v4 }
 0x180   : > { %v1105_v17 = vmul.f32 %v1089_v15, %v6463_v3  ;;  %v1106_v18 = vmul.f32 %v1090_v16, %v6465_v4  ;;  %v1103_v23 = vmul.f32 %v1087_v21, %v6463_v3  ;;  %v1104_v24 = vmul.f32 %v1088_v22, %v6465_v4 }
 0x181   : > { %v1118_v8 = vpack.c.bf16 %v1110_v7, %v1109_v6  ;;  %v1117_v14 = vpack.c.bf16 %v1108_v12, %v1107_v11  ;;  %v1101_v29 = vmul.f32 %v1085_v27, %v6463_v3  ;;  %v1102_v30 = vmul.f32 %v1086_v28, %v6465_v4  ;;  %v4103_v11 = vld [vmem:[%s6359_s16 + $0x38] sm:$0xf]  ;;  %v5276_v12 = vld [vmem:[%s6359_s16 + $0x40] sm:$0xf0] }
 0x182   : > { %v1116_v20 = vpack.c.bf16 %v1106_v18, %v1105_v17  ;;  %v1115_v26 = vpack.c.bf16 %v1104_v24, %v1103_v23  ;;  %v1099_v40 = vmul.f32 %v1083_v33, %v6463_v3  ;;  %v1100_v41 = vmul.f32 %v1084_v34, %v6465_v4  ;;  %v5273_v23 = vld [vmem:[%s6359_s16 + $0x28] sm:$0xf0] }
 0x183   : > { %1156 = vmatpush.bf16.xpose.msra.mxu3 %v1118_v8  ;;  %v1114_v32 = vpack.c.bf16 %v1102_v30, %v1101_v29  ;;  %v1097_v56 = vmul.f32 %v1081_v50, %v6463_v3  ;;  %v1098_v57 = vmul.f32 %v1082_v51, %v6465_v4  ;;  %v1079_v6 = vunpack.c.l.bf16 %v6541_v59 }
 0x184   : > { %v1113_v48 = vpack.c.bf16 %v1100_v41, %v1099_v40  ;;  %v1080_v7 = vunpack.c.h.bf16 %v6541_v59  ;;  %v4116_v8 = vor.u32 %v5279_v62, %v4115_v60  ;;  %v4104_v18 = vor.u32 %v5276_v12, %v4103_v11  ;;  %v5267_v12 = vld [vmem:[#allocation5 + $0x38] sm:$0xff] }
 0x185   : > { %v1112_v0 = vpack.c.bf16 %v1098_v57, %v1097_v56  ;;  %v893_v24 = vperm.slane %v6456_v53, 0  ;;  %v895_v41 = vperm.slane %v6456_v53, 2  ;;  %1243 = vmatpush.bf16.msrb.mxu1 %v5267_v12  ;;  %v5297_v59 = vld [vmem:[%s6367_s6 + $0x28] sm:$0xff] }
 0x186   : > { %v1096_v17 = vmul.f32 %v1080_v7, %v6465_v4  ;;  %1059 = vmatpush.bf16.msra.mxu2 %v4116_v8  ;;  %v1154_v4 = vld [vmem:[#allocation7] sm:$0xff] }
 0x187   : > { %v1037_v36 = vadd.f32 %v1036_v63, %v893_v24 }
 0x18a   : > { %1060 = vmatpush.bf16.msra.mxu2 %v4104_v18 }
 0x18b   : > { %1157 = vmatpush.bf16.xpose.msra.mxu3 %v1117_v14  ;;  %v1095_v14 = vmul.f32 %v1079_v6, %v6463_v3 }
 0x18d   : > { %v1111_v29 = vpack.c.bf16 %v1096_v17, %v1095_v14  ;;  %v5266_v17 = vld [vmem:[#allocation5 + $0x30] sm:$0xff] }
 0x18e   : > { %1244 = vmatpush.bf16.msrb.mxu1 %v5266_v17  ;;  %v4679_v17 = vld [vmem:[%s6373_s14 + $0x380] sm:$0xf] }
 0x192   : > { %1245 = vmatpush.bf16.msrb.mxu1 %v5265_v61  ;;  %v4687_v61 = vld [vmem:[%s6373_s14 + $0x388] sm:$0xf] }
 0x193   : > { %1158 = vmatpush.bf16.xpose.msra.mxu3 %v1116_v20  ;;  %v4091_v20 = vld [vmem:[%s6359_s16 + $0x20] sm:$0xf] }
 0x194   : > { %v4092_v30 = vor.u32 %v5273_v23, %v4091_v20 }
 0x196   : > { %1061 = vmatpush.bf16.msra.mxu2 %v4092_v30 }
 0x19b   : > { %1159 = vmatpush.bf16.xpose.msra.mxu3 %v1115_v26  ;;  %v1038_v26 = vpop.f32.mrf.mxu0 }
 0x19c   : > { %v1039_v37 = vadd.f32 %v1038_v26, %v893_v24  ;;  %v5299_v26 = vld [vmem:[%s6367_s6 + $0x38] sm:$0xff] }
 0x19e   : > { %v1153_v38 = vpack.c.bf16 %v1039_v37, %v1037_v36 }
 0x1a3   : > { %1160 = vmatpush.bf16.xpose.msra.mxu3 %v1114_v32  ;;  %v4079_v32 = vld [vmem:[%s6359_s16 + $0x8] sm:$0xf]  ;;  %s7200_s16 = scalar_lea.vmem %s7199_s9, %s6383_s23  ;;  %s6064_s23 = smov 128  }
 0x1a4   : > { %v4080_v3 = vor.u32 %v5270_v35, %v4079_v32 }
 0x1a6   : > { %1062 = vmatpush.bf16.msra.mxu2 %v4080_v3 }
 0x1a9   : > { %1063 = vmatmul.bf16.vlgmr.msra.gmra.mxu2 %v6449_v49 }
 0x1aa   : > { %1330 = vmatpush.bf16.msrb.mxu2 %v5299_v26  ;;  %v4553_v26 = vld [vmem:[%s6373_s14 + $0x2c0] sm:$0xf0] }
 0x1ab   : > { %1161 = vmatpush.bf16.xpose.msra.mxu3 %v1113_v48 }
 0x1b3   : > { %1162 = vmatpush.bf16.xpose.msra.mxu3 %v1112_v0 }
 0x1bb   : > { %1163 = vmatpush.bf16.xpose.msra.mxu3 %v1111_v29 }
 0x1c2   : > { %1164 = vmatmul.bf16.vlgmr.msra.gmra.mxu3 %v1153_v38 }
 0x22c   : > { %v1064_v42 = vpop.f32.mrf.mxu2 }
 0x22d   : > { %v1065_v44 = vadd.f32 %v1064_v42, %v895_v41  ;;  %v5292_v42 = vld [vmem:[%s6367_s6] sm:$0xff] }
 0x22f   : > { %v1119_v54 = vpack.c.bf16 %v1065_v44, %v1065_v44 }
 0x231   : > { %v1123_v49 = vunpack.c.l.b16 %v1119_v54 }
 0x234   : > { %v1066_v55 = vpop.f32.mrf.mxu2 }
 0x235   : > { %v1067_v56 = vadd.f32 %v1066_v55, %v895_v41  ;;  %v5293_v41 = vld [vmem:[%s6367_s6 + $0x8] sm:$0xff] }
 0x237   : > { %v1120_v57 = vpack.c.bf16 %v1067_v56, %v1067_v56 }
 0x239   : > { %v1124_v58 = vunpack.c.l.b16 %v1120_v57 }
 0x23b   : > { %v1125_v60 = vpack.c.b16 %v1124_v58, %v1123_v49  ;;  %v5674_v58 = vld [vmem:[%s7200_s16] ss:$0 sm:$0xff] }
 0x23d   : > { %v1127_v62 = vunpack.c.l.bf16 %v1125_v60  ;;  %v1128_v63 = vunpack.c.h.bf16 %v1125_v60 }
 0x23f   : > { %v1143_v53 = vmul.f32 %v1127_v62, %v1093_v1  ;;  %v1144_v0 = vmul.f32 %v1128_v63, %v1094_v2  ;;  %v1141_v8 = vmul.f32 %v1127_v62, %v1091_v9  ;;  %v1142_v11 = vmul.f32 %v1128_v63, %v1092_v10 }
 0x240   : > { %v1139_v20 = vmul.f32 %v1127_v62, %v1089_v15  ;;  %v1140_v1 = vmul.f32 %v1128_v63, %v1090_v16  ;;  %v1137_v5 = vmul.f32 %v1127_v62, %v1087_v21  ;;  %v1138_v9 = vmul.f32 %v1128_v63, %v1088_v22 }
 0x241   : > { %v1152_v14 = vpack.c.bf16 %v1144_v0, %v1143_v53  ;;  %v1151_v18 = vpack.c.bf16 %v1142_v11, %v1141_v8  ;;  %v1135_v23 = vmul.f32 %v1127_v62, %v1085_v27  ;;  %v1136_v13 = vmul.f32 %v1128_v63, %v1086_v28 }
 0x242   : > { %v1150_v2 = vpack.c.bf16 %v1140_v1, %v1139_v20  ;;  %v1149_v10 = vpack.c.bf16 %v1138_v9, %v1137_v5  ;;  %v1133_v16 = vmul.f32 %v1127_v62, %v1083_v33  ;;  %v1134_v21 = vmul.f32 %v1128_v63, %v1084_v34  ;;  %v5264_v33 = vld [vmem:[#allocation5 + $0x20] sm:$0xff]  ;;  %v5263_v34 = vld [vmem:[#allocation5 + $0x18] sm:$0xff] }
 0x243   : > { %1181 = vmatpush.bf16.msrb.mxu0 %v1152_v14  ;;  %v1148_v15 = vpack.c.bf16 %v1136_v13, %v1135_v23  ;;  %v1131_v22 = vmul.f32 %v1127_v62, %v1081_v50  ;;  %v1132_v24 = vmul.f32 %v1128_v63, %v1082_v51  ;;  %v1129_v27 = vmul.f32 %v1127_v62, %v1079_v6  ;;  %v5261_v50 = vld [vmem:[#allocation5 + $0x8] sm:$0xff]  ;;  %v5260_v51 = vld [vmem:[#allocation5] sm:$0xff]  ;;  %v5412_v20 = vld [vmem:[%s6373_s14 + $0x384] sm:$0xf] }
 0x244   : > { %v1147_v19 = vpack.c.bf16 %v1134_v21, %v1133_v16  ;;  %v1130_v28 = vmul.f32 %v1128_v63, %v1080_v7  ;;  %1246 = vmatpush.bf16.msrb.mxu1 %v5264_v33  ;;  %v5298_v6 = vld [vmem:[%s6367_s6 + $0x30] sm:$0xff]  ;;  %v6062_v11 = vmov 128.0   ;;  %v4681_v1 = vld [vmem:[%s6373_s14 + $0x3c0] sm:$0xf0]  ;;  %v4689_v23 = vld [vmem:[%s6373_s14 + $0x3c8] sm:$0xf0] }
 0x245   : > { %v1165_v39 = vpop.f32.mrf.mxu3  ;;  %v1146_v25 = vpack.c.bf16 %v1132_v24, %v1131_v22  ;;  %1331 = vmatpush.bf16.msrb.mxu2 %v5298_v6  ;;  %v4684_v5 = vor.u32 %v5412_v20, %v4681_v1  ;;  %v4615_v13 = vld [vmem:[%s6373_s14 + $0x300] sm:$0xf]  ;;  %v5396_v21 = vld [vmem:[%s6373_s14 + $0x304] sm:$0xf]  ;;  %v4625_v33 = vld [vmem:[%s6373_s14 + $0x348] sm:$0xf0] }
 0x246   : > { %v6561_v40 = vadd.f32 %v1165_v39, %v1154_v4  ;;  %v1145_v31 = vpack.c.bf16 %v1130_v28, %v1129_v27  ;;  %v5296_v4 = vld [vmem:[%s6367_s6 + $0x20] sm:$0xff]  ;;  %v5295_v39 = vld [vmem:[%s6367_s6 + $0x18] sm:$0xff]  ;;  %v5405_v27 = vld [vmem:[%s6373_s14 + $0x344] sm:$0xf0] }
 0x247   : > { %1182 = vmatpush.bf16.msrb.mxu0 %v1151_v18  ;;  %v5420_v18 = vld [vmem:[%s6373_s14 + $0x3bc] sm:$0xf0]  ;;  %v5397_v28 = vld [vmem:[%s6373_s14 + $0x30c] sm:$0xf]  ;;  %v4559_v6 = vld [vmem:[%s6373_s14 + $0x288] sm:$0xf] }
 0x248   : > { %1170 = vmax.xlane.f32.xlu0 %v6561_v40  ;;  %1247 = vmatpush.bf16.msrb.mxu1 %v5263_v34  ;;  %v5404_v16 = vld [vmem:[%s6373_s14 + $0x33c] sm:$0xf0] }
 0x249   : > { %1332 = vmatpush.bf16.msrb.mxu2 %v5297_v59  ;;  %v4616_v22 = vor.u32 %v5404_v16, %v4615_v13  ;;  %v4551_v34 = vld [vmem:[%s6373_s14 + $0x280] sm:$0xf]  ;;  %v4367_v16 = vld [vmem:[%s6373_s14 + $0x108] sm:$0xf] }
 0x24b   : > { %1183 = vmatpush.bf16.msrb.mxu0 %v1150_v2  ;;  %v5421_v2 = vld [vmem:[%s6373_s14 + $0x3c4] sm:$0xf0] }
 0x24c   : > { %1248 = vmatpush.bf16.msrb.mxu1 %v5262_v43  ;;  %v4688_v9 = vor.u32 %v5421_v2, %v4687_v61  ;;  %v5388_v43 = vld [vmem:[%s6373_s14 + $0x2bc] sm:$0xf0] }
 0x24d   : > { %v1167_v48 = vpop.f32.mrf.mxu3  ;;  %1333 = vmatpush.bf16.msrb.mxu2 %v5296_v4 }
 0x24e   : > { %v6565_v52 = vadd.f32 %v1167_v48, %v1155_v45 }
 0x24f   : > { %1184 = vmatpush.bf16.msrb.mxu0 %v1149_v10  ;;  %v5413_v10 = vld [vmem:[%s6373_s14 + $0x38c] sm:$0xf] }
 0x250   : > { %1172 = vmax.xlane.f32.xlu0 %v6565_v52  ;;  %1249 = vmatpush.bf16.msrb.mxu1 %v5261_v50  ;;  %v4628_v50 = vor.u32 %v5397_v28, %v4625_v33  ;;  %v5324_v28 = vld [vmem:[%s6373_s14 + $0xbc] sm:$0xf0] }
 0x251   : > { %1334 = vmatpush.bf16.msrb.mxu2 %v5295_v39  ;;  %v4489_v39 = vld [vmem:[%s6373_s14 + $0x240] sm:$0xf0] }
 0x253   : > { %1185 = vmatpush.bf16.msrb.mxu0 %v1148_v15  ;;  %v4692_v15 = vor.u32 %v5413_v10, %v4689_v23  ;;  %v5340_v10 = vld [vmem:[%s6373_s14 + $0x13c] sm:$0xf0]  ;;  %v5332_v23 = vld [vmem:[%s6373_s14 + $0x104] sm:$0xf] }
 0x254   : > { %1250 = vmatpush.bf16.msrb.mxu1 %v5260_v51  ;;  %v5380_v51 = vld [vmem:[%s6373_s14 + $0x284] sm:$0xf] }
 0x255   : > { %2252 = vmatpush.bf16.msrb.mxu3 %v4692_v15  ;;  %v4361_v15 = vld [vmem:[%s6373_s14 + $0x140] sm:$0xf0] }
 0x257   : > { %1186 = vmatpush.bf16.msrb.mxu0 %v1147_v19  ;;  %v4617_v19 = vld [vmem:[%s6373_s14 + $0x340] sm:$0xf0] }
 0x258   : > { %2224 = vmatpush.bf16.msra.mxu1 %v4684_v5  ;;  %v4620_v24 = vor.u32 %v5396_v21, %v4617_v19  ;;  %v5341_v21 = vld [vmem:[%s6373_s14 + $0x144] sm:$0xf0]  ;;  %v4364_v19 = vor.u32 %v5332_v23, %v4361_v15  ;;  %v4575_v15 = vld [vmem:[%s6373_s14 + $0x298] sm:$0xf] }
 0x259   : > { %2253 = vmatpush.bf16.msrb.mxu3 %v4628_v50  ;;  %v5325_v50 = vld [vmem:[%s6373_s14 + $0xc4] sm:$0xf0] }
 0x25b   : > { %1187 = vmatpush.bf16.msrb.mxu0 %v1146_v25  ;;  %v4623_v25 = vld [vmem:[%s6373_s14 + $0x308] sm:$0xf] }
 0x25c   : > { %2225 = vmatpush.bf16.msra.mxu1 %v4620_v24  ;;  %v4369_v24 = vld [vmem:[%s6373_s14 + $0x148] sm:$0xf0] }
 0x25f   : > { %1188 = vmatpush.bf16.msrb.mxu0 %v1145_v31  ;;  %v4624_v31 = vor.u32 %v5405_v27, %v4623_v25  ;;  %v4295_v27 = vld [vmem:[%s6373_s14 + $0x80] sm:$0xf] }
 0x260   : > { %v4296_v33 = vor.u32 %v5324_v28, %v4295_v27  ;;  %v5374_v27 = vld [vmem:[%s6373_s14 + $0x24c] sm:$0xf0]  ;;  %v5366_v28 = vld [vmem:[%s6373_s14 + $0x214] sm:$0xf] }
 0x2bb   : > { %v1171_v7 = vpop.xlane.xlu0 %1170 }
 0x2bc   : > { %v1174_v29 = vsub.f32 %v6561_v40, %v1171_v7  ;;  %v5294_v40 = vld [vmem:[%s6367_s6 + $0x10] sm:$0xff]  ;;  %v4552_v7 = vor.u32 %v5388_v43, %v4551_v34  ;;  %v4297_v34 = vld [vmem:[%s6373_s14 + $0xc0] sm:$0xf0]  ;;  %v4303_v43 = vld [vmem:[%s6373_s14 + $0x88] sm:$0xf] }
 0x2bd   : > { %1335 = vmatpush.bf16.msrb.mxu2 %v5294_v40  ;;  %v4495_v40 = vld [vmem:[%s6373_s14 + $0x208] sm:$0xf] }
 0x2be   : > { %v1176_v30 = vmul.f32 1.442695, %v1174_v29  ;;  %v5389_v29 = vld [vmem:[%s6373_s14 + $0x2c4] sm:$0xf0] }
 0x2c0   : > { %5680 = vpow2.f32 %v1176_v30  ;;  %v5381_v30 = vld [vmem:[%s6373_s14 + $0x28c] sm:$0xf] }
 0x2c1   : > { %1336 = vmatpush.bf16.msrb.mxu2 %v5293_v41  ;;  %v5373_v41 = vld [vmem:[%s6373_s14 + $0x244] sm:$0xf0] }
 0x2c3   : > { %v1173_v32 = vpop.xlane.xlu0 %1172 }
 0x2c4   : > { %v1175_v35 = vsub.f32 %v6565_v52, %v1173_v32  ;;  %v4561_v32 = vld [vmem:[%s6373_s14 + $0x2c8] sm:$0xf0] }
 0x2c5   : > { %1337 = vmatpush.bf16.msrb.mxu2 %v5292_v42  ;;  %v4564_v4 = vor.u32 %v5381_v30, %v4561_v32  ;;  %v5365_v42 = vld [vmem:[%s6373_s14 + $0x20c] sm:$0xf]  ;;  %v5308_v30 = vld [vmem:[%s6373_s14 + $0x3c] sm:$0xf0]  ;;  %v5300_v32 = vld [vmem:[%s6373_s14 + $0x4] sm:$0xf] }
 0x2c6   : > { %v1178_v36 = vmul.f32 1.442695, %v1175_v35  ;;  %v5681_v37 = vpop.eup %5680  ;;  %v4556_v35 = vor.u32 %v5380_v51, %v4553_v26  ;;  %v4304_v26 = vor.u32 %v5325_v50, %v4303_v43  ;;  %v5375_v43 = vld [vmem:[%s6373_s14 + $0x254] sm:$0xf0] }
 0x2c7   : > { %2254 = vmatpush.bf16.msrb.mxu3 %v4564_v4 }
 0x2c8   : > { %5682 = vpow2.f32 %v1178_v36  ;;  %v4560_v36 = vor.u32 %v5389_v29, %v4559_v6  ;;  %2226 = vmatpush.bf16.msra.mxu1 %v4556_v35  ;;  %v5317_v6 = vld [vmem:[%s6373_s14 + $0x8c] sm:$0xf]  ;;  %v4231_v29 = vld [vmem:[%s6373_s14] sm:$0xf] }
 0x2c9   : > { %2238 = vmatpush.bf16.msra.mxu2 %v4688_v9  ;;  %v4359_v9 = vld [vmem:[%s6373_s14 + $0x100] sm:$0xf]  ;;  %v4232_v35 = vor.u32 %v5308_v30, %v4231_v29  ;;  %v5358_v29 = vld [vmem:[%s6373_s14 + $0x1cc] sm:$0xf0]  ;;  %v5350_v30 = vld [vmem:[%s6373_s14 + $0x194] sm:$0xf] }
 0x2ca   : > { %v4360_v13 = vor.u32 %v5340_v10, %v4359_v9  ;;  %v5390_v9 = vld [vmem:[%s6373_s14 + $0x2cc] sm:$0xf0]  ;;  %v5382_v10 = vld [vmem:[%s6373_s14 + $0x294] sm:$0xf] }
 0x2cd   : > { %2239 = vmatpush.bf16.msra.mxu2 %v4624_v31  ;;  %v5316_v31 = vld [vmem:[%s6373_s14 + $0x84] sm:$0xf] }
 0x2ce   : > { %v5683_v3 = vpop.eup %5682  ;;  %v4300_v51 = vor.u32 %v5316_v31, %v4297_v34  ;;  %v4511_v34 = vld [vmem:[%s6373_s14 + $0x218] sm:$0xf] }
 0x2cf   : > { %v1180_v38 = vpack.c.bf16 %v5683_v3, %v5681_v37  ;;  %v4487_v37 = vld [vmem:[%s6373_s14 + $0x200] sm:$0xf] }
 0x2d0   : > { %v5372_v3 = vld [vmem:[%s6373_s14 + $0x23c] sm:$0xf0] }
 0x2d1   : > { %1189 = vmatmul.bf16.vlgmr.msrb.gmra.mxu0 %v1180_v38  ;;  %1251 = vmatmul.bf16.vlgmr.msrb.gmra.mxu1 %v1180_v38  ;;  %v5364_v38 = vld [vmem:[%s6373_s14 + $0x204] sm:$0xf] }
 0x2d2   : > { %2240 = vmatpush.bf16.msra.mxu2 %v4560_v36  ;;  %v4233_v36 = vld [vmem:[%s6373_s14 + $0x40] sm:$0xf0] }
 0x34e   : > { %v1252_v44 = vpop.f32.mrf.mxu1  ;;  %v1190_v45 = vpop.f32.mrf.mxu0 }
 0x34f   : > { %5684 = vrcp.f32 %v1252_v44  ;;  %v4497_v44 = vld [vmem:[%s6373_s14 + $0x248] sm:$0xf0] }
 0x355   : > { %v5685_v52 = vpop.eup %5684 }
 0x356   : > { %v1254_v48 = vpop.f32.mrf.mxu1  ;;  %v1192_v55 = vpop.f32.mrf.mxu0  ;;  %v1259_v56 = vmul.f32 %v5685_v52, %v1190_v45  ;;  %v4492_v52 = vor.u32 %v5364_v38, %v4489_v39  ;;  %v4236_v38 = vor.u32 %v5300_v32, %v4233_v36  ;;  %v5301_v39 = vld [vmem:[%s6373_s14 + $0xc] sm:$0xf]  ;;  %v4447_v36 = vld [vmem:[%s6373_s14 + $0x198] sm:$0xf] }
 0x357   : > { %5686 = vrcp.f32 %v1254_v48  ;;  %v4488_v48 = vor.u32 %v5372_v3, %v4487_v37  ;;  %v4239_v37 = vld [vmem:[%s6373_s14 + $0x8] sm:$0xf] }
 0x358   : > { %5688 = vrcp.f32 %v6062_v11  ;;  %2227 = vmatpush.bf16.msra.mxu1 %v4492_v52  ;;  %v5309_v3 = vld [vmem:[%s6373_s14 + $0x44] sm:$0xf0] }
 0x359   : > { %v4240_v4 = vor.u32 %v5309_v3, %v4239_v37  ;;  %v5359_v37 = vld [vmem:[%s6373_s14 + $0x1d4] sm:$0xf0] }
 0x35d   : > { %v5687_v54 = vpop.eup %5686 }
 0x35e   : > { %v1260_v49 = vmul.f32 %v5687_v54, %v1192_v55  ;;  %v6623_v12 = vpop.eup %5688  ;;  %v4496_v54 = vor.u32 %v5373_v41, %v4495_v40  ;;  %v4423_v55 = vld [vmem:[%s6373_s14 + $0x180] sm:$0xf]  ;;  %v4241_v40 = vld [vmem:[%s6373_s14 + $0x48] sm:$0xf0]  ;;  %v4695_v41 = vld [vmem:[%s6373_s14 + $0x390] sm:$0xf] }
 0x35f   : > { %vm1357_vm0 = vweird.f32 %v6623_v12 }
 0x360   : > { %v1261_v57 = vpack.c.bf16 %v1260_v49, %v1259_v56  ;;  %v5356_v56 = vld [vmem:[%s6373_s14 + $0x1bc] sm:$0xf0]  ;;  %v5348_v49 = vld [vmem:[%s6373_s14 + $0x184] sm:$0xf]  ;;  %2241 = vmatpush.bf16.msra.mxu2 %v4496_v54 }
 0x362   : > { %1338 = vmatmul.bf16.vlgmr.msrb.gmra.mxu2 %v1261_v57  ;;  %v4500_v57 = vor.u32 %v5365_v42, %v4497_v44  ;;  %v4244_v42 = vor.u32 %v5301_v39, %v4241_v40  ;;  %v5422_v44 = vld [vmem:[%s6373_s14 + $0x3cc] sm:$0xf0]  ;;  %v4449_v39 = vld [vmem:[%s6373_s14 + $0x1d8] sm:$0xf0] }
 0x363   : > { %v4696_v52 = vor.u32 %v5422_v44, %v4695_v41  ;;  %v5342_v44 = vld [vmem:[%s6373_s14 + $0x14c] sm:$0xf0] }
 0x364   : > { %2255 = vmatpush.bf16.msrb.mxu3 %v4500_v57 }
 0x3e5   : > { %v1339_v60 = vpop.f32.mrf.mxu2 }
 0x3e6   : > { %v1340_v62 = vadd.f32 %v5674_v58, %v1339_v60  ;;  %v4431_v60 = vld [vmem:[%s6373_s14 + $0x188] sm:$0xf] }
 0x3e8   : > { %v6616_v63 = vadd.f32 %v1340_v62, %v6443_v46  ;;  %v1353_v46 = vmul.f32 128.0, %v6623_v12  ;;  %v5357_v62 = vld [vmem:[%s6373_s14 + $0x1c4] sm:$0xf0] }
 0x3ea   : > { %1348 = vadd.xlane.f32.xlu1 %v6616_v63  ;;  %v1354_v14 = vsub.f32 1.0, %v1353_v46  ;;  %v4424_v46 = vor.u32 %v5356_v56, %v4423_v55  ;;  %v4703_v55 = vld [vmem:[%s6373_s14 + $0x398] sm:$0xf] }
 0x3eb   : > { %v5423_v56 = vld [vmem:[%s6373_s14 + $0x3d4] sm:$0xf0] }
 0x3ec   : > { %v1355_v59 = vmul.f32 %v6623_v12, %v1354_v14  ;;  %v4704_v57 = vor.u32 %v5423_v56, %v4703_v55  ;;  %v4383_v55 = vld [vmem:[%s6373_s14 + $0x118] sm:$0xf] }
 0x3ed   : > { %v1341_v53 = vpop.f32.mrf.mxu2  ;;  %v5343_v56 = vld [vmem:[%s6373_s14 + $0x154] sm:$0xf0] }
 0x3ee   : > { %v1342_v0 = vadd.f32 %v5674_v58, %v1341_v53  ;;  %v1356_v45 = vadd.f32 %v6623_v12, %v1355_v59  ;;  %v4425_v58 = vld [vmem:[%s6373_s14 + $0x1c0] sm:$0xf0]  ;;  %v5349_v53 = vld [vmem:[%s6373_s14 + $0x18c] sm:$0xf] }
 0x3ef   : > { %v4428_v14 = vor.u32 %v5348_v49, %v4425_v58  ;;  %v4305_v59 = vld [vmem:[%s6373_s14 + $0xc8] sm:$0xf0]  ;;  %v5415_v49 = vld [vmem:[%s6373_s14 + $0x39c] sm:$0xf] }
 0x3f0   : > { %v6620_v8 = vadd.f32 %v1342_v0, %v6445_v47  ;;  %v4680_v47 = vor.u32 %v5420_v18, %v4679_v17  ;;  %v4433_v0 = vld [vmem:[%s6373_s14 + $0x1c8] sm:$0xf0]  ;;  %v6670_v11 = vsel %vm1357_vm0, %v6623_v12, %v1356_v45  ;;  %v4432_v17 = vor.u32 %v5357_v62, %v4431_v60  ;;  %v5414_v45 = vld [vmem:[%s6373_s14 + $0x394] sm:$0xf]  ;;  %v4705_v58 = vld [vmem:[%s6373_s14 + $0x3d8] sm:$0xf0] }
 0x3f1   : > { %v4436_v20 = vor.u32 %v5349_v53, %v4433_v0  ;;  %2228 = vmatpush.bf16.msra.mxu1 %v4428_v14  ;;  %v4631_v60 = vld [vmem:[%s6373_s14 + $0x310] sm:$0xf]  ;;  %v4708_v53 = vor.u32 %v5415_v49, %v4705_v58  ;;  %v4633_v14 = vld [vmem:[%s6373_s14 + $0x350] sm:$0xf0]  ;;  %v5335_v58 = vld [vmem:[%s6373_s14 + $0x11c] sm:$0xf] }
 0x3f2   : > { %1350 = vadd.xlane.f32.xlu1 %v6620_v8  ;;  %2210 = vmatpush.bf16.msra.mxu0 %v4680_v47  ;;  %v5406_v62 = vld [vmem:[%s6373_s14 + $0x34c] sm:$0xf0] }
 0x3f3   : > { %2242 = vmatpush.bf16.msra.mxu2 %v4432_v17  ;;  %2256 = vmatpush.bf16.msrb.mxu3 %v4436_v20  ;;  %v4632_v0 = vor.u32 %v5406_v62, %v4631_v60  ;;  %v4639_v17 = vld [vmem:[%s6373_s14 + $0x318] sm:$0xf]  ;;  %v4385_v60 = vld [vmem:[%s6373_s14 + $0x158] sm:$0xf0] }
 0x3f4   : > { %v5407_v20 = vld [vmem:[%s6373_s14 + $0x354] sm:$0xf0] }
 0x3f5   : > { %2229 = vmatpush.bf16.msra.mxu1 %v4364_v19 }
 0x3f6   : > { %2211 = vmatpush.bf16.msra.mxu0 %v4616_v22  ;;  %v5333_v22 = vld [vmem:[%s6373_s14 + $0x10c] sm:$0xf] }
 0x3f7   : > { %v4372_v25 = vor.u32 %v5333_v22, %v4369_v24  ;;  %v4577_v22 = vld [vmem:[%s6373_s14 + $0x2d8] sm:$0xf0] }
 0x3f9   : > { %2257 = vmatpush.bf16.msrb.mxu3 %v4372_v25  ;;  %2230 = vmatpush.bf16.msra.mxu1 %v4300_v51  ;;  %v4503_v25 = vld [vmem:[%s6373_s14 + $0x210] sm:$0xf]  ;;  %v4512_v51 = vor.u32 %v5375_v43, %v4511_v34 }
 0x3fa   : > { %2212 = vmatpush.bf16.msra.mxu0 %v4552_v7  ;;  %v4308_v7 = vor.u32 %v5317_v6, %v4305_v59  ;;  %v4504_v31 = vor.u32 %v5374_v27, %v4503_v25  ;;  %v4513_v6 = vld [vmem:[%s6373_s14 + $0x258] sm:$0xf0] }
 0x3fb   : > { %v4257_v27 = vld [vmem:[%s6373_s14 + $0x58] sm:$0xf0] }
 0x3fd   : > { %2258 = vmatpush.bf16.msrb.mxu3 %v4308_v7  ;;  %2231 = vmatpush.bf16.msra.mxu1 %v4236_v38  ;;  %v4439_v7 = vld [vmem:[%s6373_s14 + $0x190] sm:$0xf]  ;;  %v4448_v38 = vor.u32 %v5359_v37, %v4447_v36  ;;  %v5675_v36 = vld [vmem:[%s819_s13] ss:$0 sm:$0xff] }
 0x3fe   : > { %2213 = vmatpush.bf16.msra.mxu0 %v4488_v48  ;;  %v4697_v48 = vld [vmem:[%s6373_s14 + $0x3d0] sm:$0xf0]  ;;  %v4440_v32 = vor.u32 %v5358_v29, %v4439_v7 }
 0x3ff   : > { %v4700_v54 = vor.u32 %v5414_v45, %v4697_v48  ;;  %v5334_v45 = vld [vmem:[%s6373_s14 + $0x114] sm:$0xf] }
 0x401   : > { %2259 = vmatpush.bf16.msrb.mxu3 %v4244_v42  ;;  %2280 = vmatpush.bf16.msrb.mxu1 %v4700_v54  ;;  %v4375_v42 = vld [vmem:[%s6373_s14 + $0x110] sm:$0xf]  ;;  %v4377_v54 = vld [vmem:[%s6373_s14 + $0x150] sm:$0xf0] }
 0x402   : > { %2214 = vmatpush.bf16.msra.mxu0 %v4424_v46  ;;  %v5398_v46 = vld [vmem:[%s6373_s14 + $0x314] sm:$0xf]  ;;  %v4380_v49 = vor.u32 %v5334_v45, %v4377_v54  ;;  %v4713_v45 = vld [vmem:[%s6373_s14 + $0x3e0] sm:$0xf0] }
 0x405   : > { %2308 = vmatpush.bf16.msra.mxu3 %v4708_v53  ;;  %v4388_v53 = vor.u32 %v5335_v58, %v4385_v60  ;;  %v4647_v60 = vld [vmem:[%s6373_s14 + $0x320] sm:$0xf] }
 0x406   : > { %2215 = vmatpush.bf16.msra.mxu0 %v4360_v13  ;;  %v4569_v13 = vld [vmem:[%s6373_s14 + $0x2d0] sm:$0xf0] }
 0x40a   : > { %2216 = vmatpush.bf16.msra.mxu0 %v4296_v33  ;;  %v4505_v33 = vld [vmem:[%s6373_s14 + $0x250] sm:$0xf0] }
 0x40b   : > { %v4508_v50 = vor.u32 %v5366_v28, %v4505_v33 }
 0x40e   : > { %2217 = vmatpush.bf16.msra.mxu0 %v4232_v35  ;;  %v4441_v35 = vld [vmem:[%s6373_s14 + $0x1d0] sm:$0xf0] }
 0x40f   : > { %v4444_v3 = vor.u32 %v5350_v30, %v4441_v35 }
 0x412   : > { %2266 = vmatpush.bf16.msrb.mxu0 %v4696_v52  ;;  %v4376_v52 = vor.u32 %v5342_v44, %v4375_v42  ;;  %v4711_v42 = vld [vmem:[%s6373_s14 + $0x3a0] sm:$0xf]  ;;  %v5416_v44 = vld [vmem:[%s6373_s14 + $0x3a4] sm:$0xf] }
 0x413   : > { %v4716_v58 = vor.u32 %v5416_v44, %v4713_v45  ;;  %v5336_v44 = vld [vmem:[%s6373_s14 + $0x124] sm:$0xf] }
 0x414   : > { %v4393_v45 = vld [vmem:[%s6373_s14 + $0x160] sm:$0xf0] }
 0x416   : > { %2267 = vmatpush.bf16.msrb.mxu0 %v4632_v0  ;;  %v4311_v0 = vld [vmem:[%s6373_s14 + $0x90] sm:$0xf] }
 0x45d   : > { %v1349_v18 = vpop.xlane.xlu1 %1348 }
 0x45e   : > { %v1359_v47 = vmul.f32 %v6670_v11, %v1349_v18  ;;  %v4636_v18 = vor.u32 %v5398_v46, %v4633_v14  ;;  %v5326_v46 = vld [vmem:[%s6373_s14 + $0xcc] sm:$0xf0]  ;;  %v5318_v14 = vld [vmem:[%s6373_s14 + $0x94] sm:$0xf] }
 0x460   : > { %v6674_v1 = vsub.f32 %v6616_v63, %v1359_v47  ;;  %v5399_v47 = vld [vmem:[%s6373_s14 + $0x31c] sm:$0xf]  ;;  %2281 = vmatpush.bf16.msrb.mxu1 %v4636_v18  ;;  %v4313_v18 = vld [vmem:[%s6373_s14 + $0xd0] sm:$0xf0] }
 0x462   : > { %v1363_v12 = vmul.f32 %v6674_v1, %v6674_v1 }
 0x464   : > { %1365 = vadd.xlane.f32.xlu2 %v1363_v12  ;;  %v4641_v12 = vld [vmem:[%s6373_s14 + $0x358] sm:$0xf0] }
 0x465   : > { %v1351_v61 = vpop.xlane.xlu1 %1350 }
 0x466   : > { %v1360_v2 = vmul.f32 %v6670_v11, %v1351_v61  ;;  %v4640_v61 = vor.u32 %v5407_v20, %v4639_v17  ;;  %v4312_v17 = vor.u32 %v5326_v46, %v4311_v0  ;;  %v4319_v20 = vld [vmem:[%s6373_s14 + $0x98] sm:$0xf]  ;;  %v5400_v46 = vld [vmem:[%s6373_s14 + $0x324] sm:$0xf] }
 0x468   : > { %v6680_v5 = vsub.f32 %v6620_v8, %v1360_v2  ;;  %v4368_v8 = vor.u32 %v5341_v21, %v4367_v16  ;;  %v4644_v2 = vor.u32 %v5399_v47, %v4641_v12  ;;  %v5391_v16 = vld [vmem:[%s6373_s14 + $0x2d4] sm:$0xf0]  ;;  %v4572_v21 = vor.u32 %v5382_v10, %v4569_v13  ;;  %v5302_v13 = vld [vmem:[%s6373_s14 + $0x14] sm:$0xf] }
 0x469   : > { %v4576_v19 = vor.u32 %v5391_v16, %v4575_v15  ;;  %v5327_v47 = vld [vmem:[%s6373_s14 + $0xd4] sm:$0xf0]  ;;  %v4316_v12 = vor.u32 %v5318_v14, %v4313_v18  ;;  %v4249_v15 = vld [vmem:[%s6373_s14 + $0x50] sm:$0xf0]  ;;  %v4649_v14 = vld [vmem:[%s6373_s14 + $0x360] sm:$0xf0] }
 0x46a   : > { %v1364_v63 = vmul.f32 %v6680_v5, %v6680_v5  ;;  %2243 = vmatpush.bf16.msra.mxu2 %v4368_v8  ;;  %v5383_v8 = vld [vmem:[%s6373_s14 + $0x29c] sm:$0xf]  ;;  %2309 = vmatpush.bf16.msra.mxu3 %v4644_v2  ;;  %v4252_v25 = vor.u32 %v5302_v13, %v4249_v15  ;;  %v5409_v18 = vld [vmem:[%s6373_s14 + $0x364] sm:$0xf0]  ;;  %v4585_v13 = vld [vmem:[%s6373_s14 + $0x2e0] sm:$0xf0] }
 0x46b   : > { %v4580_v24 = vor.u32 %v5383_v8, %v4577_v22  ;;  %2282 = vmatpush.bf16.msrb.mxu1 %v4572_v21  ;;  %v5319_v2 = vld [vmem:[%s6373_s14 + $0x9c] sm:$0xf]  ;;  %v4255_v21 = vld [vmem:[%s6373_s14 + $0x18] sm:$0xf]  ;;  %v4591_v15 = vld [vmem:[%s6373_s14 + $0x2a8] sm:$0xf] }
 0x46c   : > { %1367 = vadd.xlane.f32.xlu2 %v1364_v63  ;;  %v4567_v63 = vld [vmem:[%s6373_s14 + $0x290] sm:$0xf]  ;;  %v5303_v8 = vld [vmem:[%s6373_s14 + $0x1c] sm:$0xf] }
 0x46d   : > { %v4568_v23 = vor.u32 %v5390_v9, %v4567_v63  ;;  %v4321_v63 = vld [vmem:[%s6373_s14 + $0xd8] sm:$0xf0]  ;;  %v4247_v9 = vld [vmem:[%s6373_s14 + $0x10] sm:$0xf]  ;;  %v4260_v34 = vor.u32 %v5303_v8, %v4257_v27 }
 0x46e   : > { %2244 = vmatpush.bf16.msra.mxu2 %v4304_v26  ;;  %v5367_v26 = vld [vmem:[%s6373_s14 + $0x21c] sm:$0xf]  ;;  %2310 = vmatpush.bf16.msra.mxu3 %v4580_v24  ;;  %v4324_v10 = vor.u32 %v5319_v2, %v4321_v63  ;;  %v4583_v2 = vld [vmem:[%s6373_s14 + $0x2a0] sm:$0xf] }
 0x46f   : > { %2268 = vmatpush.bf16.msrb.mxu0 %v4568_v23  ;;  %v4516_v59 = vor.u32 %v5367_v26, %v4513_v6  ;;  %2283 = vmatpush.bf16.msrb.mxu1 %v4508_v50  ;;  %v5310_v23 = vld [vmem:[%s6373_s14 + $0x4c] sm:$0xf0]  ;;  %v5392_v63 = vld [vmem:[%s6373_s14 + $0x2dc] sm:$0xf0] }
 0x470   : > { %v4248_v24 = vor.u32 %v5310_v23, %v4247_v9  ;;  %v5384_v23 = vld [vmem:[%s6373_s14 + $0x2a4] sm:$0xf]  ;;  %v4584_v8 = vor.u32 %v5392_v63, %v4583_v2  ;;  %v5312_v63 = vld [vmem:[%s6373_s14 + $0x5c] sm:$0xf0] }
 0x472   : > { %2245 = vmatpush.bf16.msra.mxu2 %v4240_v4  ;;  %v5351_v4 = vld [vmem:[%s6373_s14 + $0x19c] sm:$0xf]  ;;  %2311 = vmatpush.bf16.msra.mxu3 %v4516_v59 }
 0x473   : > { %2269 = vmatpush.bf16.msrb.mxu0 %v4504_v31  ;;  %v4452_v40 = vor.u32 %v5351_v4, %v4449_v39  ;;  %2284 = vmatpush.bf16.msrb.mxu1 %v4444_v3  ;;  %v5676_v4 = vld [vmem:[%s822_s26] ss:$0 sm:$0xff] }
 0x476   : > { %2294 = vmatpush.bf16.msrb.mxu2 %v4704_v57  ;;  %v4384_v57 = vor.u32 %v5343_v56, %v4383_v55  ;;  %2312 = vmatpush.bf16.msra.mxu3 %v4452_v40  ;;  %v5425_v55 = vld [vmem:[%s6373_s14 + $0x3e4] sm:$0xf0]  ;;  %v5417_v56 = vld [vmem:[%s6373_s14 + $0x3ac] sm:$0xf] }
 0x477   : > { %2270 = vmatpush.bf16.msrb.mxu0 %v4440_v32  ;;  %2285 = vmatpush.bf16.msrb.mxu1 %v4380_v49 }
 0x47a   : > { %2295 = vmatpush.bf16.msrb.mxu2 %v4640_v61  ;;  %v4320_v61 = vor.u32 %v5327_v47, %v4319_v20  ;;  %2313 = vmatpush.bf16.msra.mxu3 %v4388_v53  ;;  %v5401_v20 = vld [vmem:[%s6373_s14 + $0x32c] sm:$0xf] }
 0x47b   : > { %2271 = vmatpush.bf16.msrb.mxu0 %v4376_v52  ;;  %2286 = vmatpush.bf16.msrb.mxu1 %v4316_v12  ;;  %v4657_v47 = vld [vmem:[%s6373_s14 + $0x368] sm:$0xf0] }
 0x47e   : > { %2296 = vmatpush.bf16.msrb.mxu2 %v4576_v19  ;;  %v5311_v19 = vld [vmem:[%s6373_s14 + $0x54] sm:$0xf0]  ;;  %2314 = vmatpush.bf16.msra.mxu3 %v4324_v10  ;;  %v4660_v10 = vor.u32 %v5401_v20, %v4657_v47  ;;  %v5321_v20 = vld [vmem:[%s6373_s14 + $0xac] sm:$0xf] }
 0x47f   : > { %2272 = vmatpush.bf16.msrb.mxu0 %v4312_v17  ;;  %v4256_v28 = vor.u32 %v5311_v19, %v4255_v21  ;;  %2287 = vmatpush.bf16.msrb.mxu1 %v4252_v25  ;;  %v4655_v17 = vld [vmem:[%s6373_s14 + $0x328] sm:$0xf]  ;;  %v5385_v21 = vld [vmem:[%s6373_s14 + $0x2ac] sm:$0xf]  ;;  %v5376_v25 = vld [vmem:[%s6373_s14 + $0x25c] sm:$0xf0] }
 0x480   : > { %v4656_v9 = vor.u32 %v5409_v18, %v4655_v17  ;;  %v4593_v19 = vld [vmem:[%s6373_s14 + $0x2e8] sm:$0xf0]  ;;  %v4335_v17 = vld [vmem:[%s6373_s14 + $0xa8] sm:$0xf] }
 0x481   : > { %v5329_v18 = vld [vmem:[%s6373_s14 + $0xe4] sm:$0xf0]  ;;  %v4337_v47 = vld [vmem:[%s6373_s14 + $0xe8] sm:$0xf0] }
 0x482   : > { %2297 = vmatpush.bf16.msrb.mxu2 %v4512_v51  ;;  %2315 = vmatpush.bf16.msra.mxu3 %v4260_v34  ;;  %v4527_v34 = vld [vmem:[%s6373_s14 + $0x228] sm:$0xf] }
 0x483   : > { %2273 = vmatpush.bf16.msrb.mxu0 %v4248_v24  ;;  %v4519_v24 = vld [vmem:[%s6373_s14 + $0x220] sm:$0xf] }
 0x486   : > { %2298 = vmatpush.bf16.msrb.mxu2 %v4448_v38 }
 0x48a   : > { %2299 = vmatpush.bf16.msrb.mxu2 %v4384_v57 }
 0x48e   : > { %2300 = vmatpush.bf16.msrb.mxu2 %v4320_v61  ;;  %v4652_v61 = vor.u32 %v5400_v46, %v4649_v14  ;;  %v5320_v46 = vld [vmem:[%s6373_s14 + $0xa4] sm:$0xf] }
 0x48f   : > { %v4329_v14 = vld [vmem:[%s6373_s14 + $0xe0] sm:$0xf0] }
 0x490   : > { %v4332_v2 = vor.u32 %v5320_v46, %v4329_v14  ;;  %v5370_v46 = vld [vmem:[%s6373_s14 + $0x234] sm:$0xf] }
 0x491   : > { %v4537_v14 = vld [vmem:[%s6373_s14 + $0x270] sm:$0xf0] }
 0x492   : > { %2301 = vmatpush.bf16.msrb.mxu2 %v4256_v28  ;;  %v4596_v28 = vor.u32 %v5385_v21, %v4593_v19  ;;  %v5305_v21 = vld [vmem:[%s6373_s14 + $0x2c] sm:$0xf] }
 0x493   : > { %v4273_v19 = vld [vmem:[%s6373_s14 + $0x68] sm:$0xf0] }
 0x4d7   : > { %v1366_v41 = vpop.xlane.xlu2 %1365 }
 0x4d8   : > { %v1369_v48 = vmul.f32 %v1366_v41, %v6670_v11 }
 0x4da   : > { %v1371_v62 = vadd.f32 1e-05, %v1369_v48  ;;  %v4719_v48 = vld [vmem:[%s6373_s14 + $0x3a8] sm:$0xf] }
 0x4db   : > { %v4720_v53 = vor.u32 %v5425_v55, %v4719_v48  ;;  %v4399_v48 = vld [vmem:[%s6373_s14 + $0x128] sm:$0xf] }
 0x4dc   : > { %5690 = vrsqrt.f32 %v1371_v62  ;;  %vm1379_vm2 = vweird.f32 %v1371_v62  ;;  %v5345_v55 = vld [vmem:[%s6373_s14 + $0x164] sm:$0xf0] }
 0x4df   : > { %v1368_v16 = vpop.xlane.xlu2 %1367 }
 0x4e0   : > { %v1370_v22 = vmul.f32 %v1368_v16, %v6670_v11  ;;  %v5393_v16 = vld [vmem:[%s6373_s14 + $0x2e4] sm:$0xf0] }
 0x4e1   : > { %v4592_v27 = vor.u32 %v5393_v16, %v4591_v15  ;;  %v4271_v15 = vld [vmem:[%s6373_s14 + $0x28] sm:$0xf] }
 0x4e2   : > { %v5691_v31 = vpop.eup %5690  ;;  %v1372_v33 = vadd.f32 1e-05, %v1370_v22  ;;  %v4588_v22 = vor.u32 %v5384_v23, %v4585_v13  ;;  %v4336_v23 = vor.u32 %v5329_v18, %v4335_v17  ;;  %v4340_v13 = vor.u32 %v5321_v20, %v4337_v47  ;;  %v5313_v16 = vld [vmem:[%s6373_s14 + $0x64] sm:$0xf0]  ;;  %v4543_v17 = vld [vmem:[%s6373_s14 + $0x238] sm:$0xf] }
 0x4e3   : > { %v1374_v43 = vmul.f32 %v5691_v31, %v1371_v62  ;;  %vm1380_vm1 = vweird.f32 %v5691_v31  ;;  %v5408_v62 = vld [vmem:[%s6373_s14 + $0x35c] sm:$0xf0]  ;;  %v5379_v18 = vld [vmem:[%s6373_s14 + $0x274] sm:$0xf0]  ;;  %v5371_v20 = vld [vmem:[%s6373_s14 + $0x23c] sm:$0xf] }
 0x4e4   : > { %5692 = vrsqrt.f32 %v1372_v33  ;;  %vm1381_vm3 = vmor %vm1379_vm2, %vm1380_vm1  ;;  %vm1389_vm5 = vweird.f32 %v1372_v33  ;;  %v4648_v12 = vor.u32 %v5408_v62, %v4647_v60  ;;  %v4327_v60 = vld [vmem:[%s6373_s14 + $0xa0] sm:$0xf]  ;;  %v4545_v47 = vld [vmem:[%s6373_s14 + $0x278] sm:$0xf0] }
 0x4e5   : > { %v1375_v50 = vmul.f32 %v5691_v31, %v1374_v43  ;;  %v5377_v43 = vld [vmem:[%s6373_s14 + $0x264] sm:$0xf0]  ;;  %v5328_v62 = vld [vmem:[%s6373_s14 + $0xdc] sm:$0xf0] }
 0x4e7   : > { %v1376_v51 = vmul.f32 0.5, %v1375_v50  ;;  %v5369_v50 = vld [vmem:[%s6373_s14 + $0x22c] sm:$0xf] }
 0x4e9   : > { %v1377_v26 = vsub.f32 1.5, %v1376_v51  ;;  %v4529_v51 = vld [vmem:[%s6373_s14 + $0x268] sm:$0xf0] }
 0x4ea   : > { %v5693_v6 = vpop.eup %5692 }
 0x4eb   : > { %v1378_v59 = vmul.f32 %v5691_v31, %v1377_v26  ;;  %v1384_v7 = vmul.f32 %v5693_v6, %v1372_v33  ;;  %vm1390_vm4 = vweird.f32 %v5693_v6  ;;  %v4521_v33 = vld [vmem:[%s6373_s14 + $0x260] sm:$0xf0]  ;;  %v4520_v26 = vor.u32 %v5376_v25, %v4519_v24  ;;  %v5418_v24 = vld [vmem:[%s6373_s14 + $0x3b4] sm:$0xf] }
 0x4ec   : > { %vm1391_vm6 = vmor %vm1389_vm5, %vm1390_vm4  ;;  %v4729_v25 = vld [vmem:[%s6373_s14 + $0x3f0] sm:$0xf0] }
 0x4ed   : > { %v1385_v29 = vmul.f32 %v5693_v6, %v1384_v7  ;;  %v1382_v30 = vsel %vm1381_vm3, %v5691_v31, %v1378_v59  ;;  %v5368_v31 = vld [vmem:[%s6373_s14 + $0x224] sm:$0xf]  ;;  %v4455_v59 = vld [vmem:[%s6373_s14 + $0x1a0] sm:$0xf] }
 0x4ee   : > { %v1393_v37 = vmul.f32 %v1382_v30, %v6674_v1  ;;  %v5424_v1 = vld [vmem:[%s6373_s14 + $0x3dc] sm:$0xf0]  ;;  %v4532_v30 = vor.u32 %v5369_v50, %v4529_v51  ;;  %v4272_v50 = vor.u32 %v5313_v16, %v4271_v15  ;;  %v4276_v51 = vor.u32 %v5305_v21, %v4273_v19  ;;  %v4479_v15 = vld [vmem:[%s6373_s14 + $0x1b8] sm:$0xf]  ;;  %v5355_v21 = vld [vmem:[%s6373_s14 + $0x1bc] sm:$0xf] }
 0x4ef   : > { %v1386_v32 = vmul.f32 0.5, %v1385_v29  ;;  %v4712_v57 = vor.u32 %v5424_v1, %v4711_v42  ;;  %v5360_v7 = vld [vmem:[%s6373_s14 + $0x1dc] sm:$0xf0]  ;;  %v4528_v29 = vor.u32 %v5377_v43, %v4527_v34  ;;  %v5419_v34 = vld [vmem:[%s6373_s14 + $0x3bc] sm:$0xf] }
 0x4f0   : > { %v1398_v39 = vmul.f32 %v5675_v36, %v1393_v37  ;;  %v5361_v37 = vld [vmem:[%s6373_s14 + $0x1e4] sm:$0xf0]  ;;  %v4737_v43 = vld [vmem:[%s6373_s14 + $0x3f8] sm:$0xf0]  ;;  %v5363_v16 = vld [vmem:[%s6373_s14 + $0x1f4] sm:$0xf0] }
 0x4f1   : > { %v1387_v35 = vsub.f32 1.5, %v1386_v32  ;;  %v5352_v32 = vld [vmem:[%s6373_s14 + $0x1a4] sm:$0xf]  ;;  %v4481_v19 = vld [vmem:[%s6373_s14 + $0x1f8] sm:$0xf0] }
 0x4f2   : > { %v6791_v52 = vadd.f32 %v5676_v4, %v1398_v39 }
 0x4f3   : > { %v1388_v3 = vmul.f32 %v5693_v6, %v1387_v35  ;;  %v4457_v35 = vld [vmem:[%s6373_s14 + $0x1e0] sm:$0xf0] }
 0x4f4   : > { %v4460_v39 = vor.u32 %v5352_v32, %v4457_v35  ;;  %v5402_v32 = vld [vmem:[%s6373_s14 + $0x334] sm:$0xf] }
 0x4f5   : > { %v1392_v38 = vsel %vm1391_vm6, %v5693_v6, %v1388_v3  ;;  %v4524_v6 = vor.u32 %v5368_v31, %v4521_v33  ;;  %v5353_v3 = vld [vmem:[%s6373_s14 + $0x1ac] sm:$0xf]  ;;  %v5427_v33 = vld [vmem:[%s6373_s14 + $0x3f4] sm:$0xf0]  ;;  %v4665_v35 = vld [vmem:[%s6373_s14 + $0x370] sm:$0xf0] }
 0x4f6   : > { %v1394_v40 = vmul.f32 %v1392_v38, %v6680_v5  ;;  %v4721_v5 = vld [vmem:[%s6373_s14 + $0x3e8] sm:$0xf0] }
 0x4f7   : > { %v4724_v0 = vor.u32 %v5417_v56, %v4721_v5  ;;  %v4465_v38 = vld [vmem:[%s6373_s14 + $0x1e8] sm:$0xf0] }
 0x4f8   : > { %v1399_v41 = vmul.f32 %v5675_v36, %v1394_v40  ;;  %v4463_v36 = vld [vmem:[%s6373_s14 + $0x1a8] sm:$0xf]  ;;  %v4391_v40 = vld [vmem:[%s6373_s14 + $0x120] sm:$0xf]  ;;  %v4468_v1 = vor.u32 %v5353_v3, %v4465_v38  ;;  %v5337_v56 = vld [vmem:[%s6373_s14 + $0x12c] sm:$0xf] }
 0x4f9   : > { %v4464_v42 = vor.u32 %v5361_v37, %v4463_v36  ;;  %v4401_v5 = vld [vmem:[%s6373_s14 + $0x168] sm:$0xf0]  ;;  %v4671_v36 = vld [vmem:[%s6373_s14 + $0x338] sm:$0xf]  ;;  %v5403_v3 = vld [vmem:[%s6373_s14 + $0x33c] sm:$0xf] }
 0x4fa   : > { %v6793_v54 = vadd.f32 %v5676_v4, %v1399_v41  ;;  %v4456_v4 = vor.u32 %v5360_v7, %v4455_v59  ;;  %v5344_v41 = vld [vmem:[%s6373_s14 + $0x15c] sm:$0xf0]  ;;  %v4663_v59 = vld [vmem:[%s6373_s14 + $0x330] sm:$0xf]  ;;  %v5411_v37 = vld [vmem:[%s6373_s14 + $0x374] sm:$0xf0] }
 0x4fb   : > { %v5410_v7 = vld [vmem:[%s6373_s14 + $0x36c] sm:$0xf0]  ;;  %v4673_v38 = vld [vmem:[%s6373_s14 + $0x378] sm:$0xf0] }
 0x4fc   : > { %v6800_v49 = vpack.c.bf16 %v6793_v54, %v6791_v52 }
 0x4fe   : > { %2218 = vmatmul.bf16.vlgmr.msra.gmra.mxu0 %v6800_v49  ;;  %2232 = vmatmul.bf16.vlgmr.msra.gmra.mxu1 %v6800_v49 }
 0x4ff   : > { %2246 = vmatmul.bf16.vlgmr.msra.gmra.mxu2 %v6800_v49  ;;  %2260 = vmatmul.bf16.vlgmr.msrb.gmra.mxu3 %v6800_v49 }
 0x500   : > { %2322 = vmatpush.bf16.msra.mxu0 %v4712_v57  ;;  %2336 = vmatpush.bf16.msra.mxu1 %v4716_v58  ;;  %v4392_v57 = vor.u32 %v5344_v41, %v4391_v40  ;;  %v4396_v58 = vor.u32 %v5336_v44, %v4393_v45  ;;  %v4599_v40 = vld [vmem:[%s6373_s14 + $0x2b0] sm:$0xf]  ;;  %v5386_v44 = vld [vmem:[%s6373_s14 + $0x2b4] sm:$0xf] }
 0x501   : > { %2350 = vmatpush.bf16.msra.mxu2 %v4720_v53  ;;  %2364 = vmatpush.bf16.msrb.mxu3 %v4724_v0  ;;  %v4400_v53 = vor.u32 %v5345_v55, %v4399_v48  ;;  %v4404_v0 = vor.u32 %v5337_v56, %v4401_v5  ;;  %v5394_v41 = vld [vmem:[%s6373_s14 + $0x2ec] sm:$0xf0]  ;;  %v4601_v45 = vld [vmem:[%s6373_s14 + $0x2f0] sm:$0xf0]  ;;  %v4607_v48 = vld [vmem:[%s6373_s14 + $0x2b8] sm:$0xf] }
 0x502   : > { %v5395_v55 = vld [vmem:[%s6373_s14 + $0x2f4] sm:$0xf0]  ;;  %v5387_v56 = vld [vmem:[%s6373_s14 + $0x2bc] sm:$0xf] }
 0x503   : > { %v4609_v5 = vld [vmem:[%s6373_s14 + $0x2f8] sm:$0xf0] }
 0x504   : > { %2323 = vmatpush.bf16.msra.mxu0 %v4648_v12  ;;  %2337 = vmatpush.bf16.msra.mxu1 %v4652_v61  ;;  %v4263_v12 = vld [vmem:[%s6373_s14 + $0x20] sm:$0xf]  ;;  %v4328_v61 = vor.u32 %v5328_v62, %v4327_v60  ;;  %v4535_v60 = vld [vmem:[%s6373_s14 + $0x230] sm:$0xf] }
 0x505   : > { %2351 = vmatpush.bf16.msra.mxu2 %v4656_v9  ;;  %2365 = vmatpush.bf16.msrb.mxu3 %v4660_v10  ;;  %v5304_v9 = vld [vmem:[%s6373_s14 + $0x24] sm:$0xf]  ;;  %v5378_v62 = vld [vmem:[%s6373_s14 + $0x26c] sm:$0xf0] }
 0x506   : > { %v4265_v10 = vld [vmem:[%s6373_s14 + $0x60] sm:$0xf0] }
 0x507   : > { %v4268_v31 = vor.u32 %v5304_v9, %v4265_v10  ;;  %v4544_v9 = vor.u32 %v5379_v18, %v4543_v17  ;;  %v4548_v10 = vor.u32 %v5371_v20, %v4545_v47  ;;  %v5434_v17 = vld [vmem:[%s6409_s5 + $0x30] sm:$0xff] }
 0x508   : > { %2324 = vmatpush.bf16.msra.mxu0 %v4584_v8  ;;  %2338 = vmatpush.bf16.msra.mxu1 %v4588_v22  ;;  %v4727_v8 = vld [vmem:[%s6373_s14 + $0x3b0] sm:$0xf] }
 0x509   : > { %2352 = vmatpush.bf16.msra.mxu2 %v4592_v27  ;;  %2366 = vmatpush.bf16.msrb.mxu3 %v4596_v28  ;;  %v5426_v22 = vld [vmem:[%s6373_s14 + $0x3ec] sm:$0xf0]  ;;  %v4735_v27 = vld [vmem:[%s6373_s14 + $0x3b8] sm:$0xf]  ;;  %v4264_v28 = vor.u32 %v5312_v63, %v4263_v12  ;;  %v4536_v12 = vor.u32 %v5378_v62, %v4535_v60 }
 0x50a   : > { %v5362_v63 = vld [vmem:[%s6373_s14 + $0x1ec] sm:$0xf0] }
 0x50b   : > { %v5442_v18 = vld [vmem:[%s6409_s5 + $0x70] sm:$0xff] }
 0x50c   : > { %2325 = vmatpush.bf16.msra.mxu0 %v4520_v26  ;;  %2339 = vmatpush.bf16.msra.mxu1 %v4524_v6  ;;  %v4728_v26 = vor.u32 %v5426_v22, %v4727_v8  ;;  %v4732_v6 = vor.u32 %v5418_v24, %v4729_v25  ;;  %v4407_v24 = vld [vmem:[%s6373_s14 + $0x130] sm:$0xf] }
 0x50d   : > { %2353 = vmatpush.bf16.msra.mxu2 %v4528_v29  ;;  %2367 = vmatpush.bf16.msrb.mxu3 %v4532_v30  ;;  %v4736_v29 = vor.u32 %v5427_v33, %v4735_v27  ;;  %v4740_v30 = vor.u32 %v5419_v34, %v4737_v43  ;;  %v5346_v25 = vld [vmem:[%s6373_s14 + $0x16c] sm:$0xf0]  ;;  %v4480_v27 = vor.u32 %v5363_v16, %v4479_v15  ;;  %v4409_v33 = vld [vmem:[%s6373_s14 + $0x170] sm:$0xf0]  ;;  %v4415_v34 = vld [vmem:[%s6373_s14 + $0x138] sm:$0xf] }
 0x50e   : > { %2274 = vmatmul.bf16.vlgmr.msrb.gmra.mxu0 %v6800_v49  ;;  %2288 = vmatmul.bf16.vlgmr.msrb.gmra.mxu1 %v6800_v49  ;;  %v5347_v43 = vld [vmem:[%s6373_s14 + $0x174] sm:$0xf0]  ;;  %v5450_v20 = vld [vmem:[%s6409_s5 + $0xb0] sm:$0xff] }
 0x50f   : > { %2302 = vmatmul.bf16.vlgmr.msrb.gmra.mxu2 %v6800_v49  ;;  %2316 = vmatmul.bf16.vlgmr.msra.gmra.mxu3 %v6800_v49  ;;  %v5458_v47 = vld [vmem:[%s6409_s5 + $0xf0] sm:$0xff]  ;;  %v5439_v15 = vld [vmem:[%s6409_s5 + $0x58] sm:$0xff] }
 0x510   : > { %2326 = vmatpush.bf16.msra.mxu0 %v4456_v4  ;;  %2340 = vmatpush.bf16.msra.mxu1 %v4460_v39  ;;  %v4664_v4 = vor.u32 %v5410_v7, %v4663_v59  ;;  %v4668_v39 = vor.u32 %v5402_v32, %v4665_v35  ;;  %v4343_v59 = vld [vmem:[%s6373_s14 + $0xb0] sm:$0xf]  ;;  %v5322_v32 = vld [vmem:[%s6373_s14 + $0xb4] sm:$0xf]  ;;  %v5447_v16 = vld [vmem:[%s6409_s5 + $0x98] sm:$0xff] }
 0x511   : > { %2354 = vmatpush.bf16.msra.mxu2 %v4464_v42  ;;  %2368 = vmatpush.bf16.msrb.mxu3 %v4468_v1  ;;  %v4672_v42 = vor.u32 %v5411_v37, %v4671_v36  ;;  %v4676_v1 = vor.u32 %v5403_v3, %v4673_v38  ;;  %v5330_v7 = vld [vmem:[%s6373_s14 + $0xec] sm:$0xf0]  ;;  %v4345_v35 = vld [vmem:[%s6373_s14 + $0xf0] sm:$0xf0]  ;;  %v4351_v36 = vld [vmem:[%s6373_s14 + $0xb8] sm:$0xf] }
 0x512   : > { %v5331_v37 = vld [vmem:[%s6373_s14 + $0xf4] sm:$0xf0]  ;;  %v5323_v3 = vld [vmem:[%s6373_s14 + $0xbc] sm:$0xf] }
 0x513   : > { %v4353_v38 = vld [vmem:[%s6373_s14 + $0xf8] sm:$0xf0] }
 0x514   : > { %2327 = vmatpush.bf16.msra.mxu0 %v4392_v57  ;;  %2341 = vmatpush.bf16.msra.mxu1 %v4396_v58  ;;  %v4600_v57 = vor.u32 %v5394_v41, %v4599_v40  ;;  %v4604_v58 = vor.u32 %v5386_v44, %v4601_v45  ;;  %v4279_v40 = vld [vmem:[%s6373_s14 + $0x30] sm:$0xf]  ;;  %v5306_v44 = vld [vmem:[%s6373_s14 + $0x34] sm:$0xf] }
 0x515   : > { %2355 = vmatpush.bf16.msra.mxu2 %v4400_v53  ;;  %2369 = vmatpush.bf16.msrb.mxu3 %v4404_v0  ;;  %v4608_v53 = vor.u32 %v5395_v55, %v4607_v48  ;;  %v4612_v0 = vor.u32 %v5387_v56, %v4609_v5  ;;  %v5314_v41 = vld [vmem:[%s6373_s14 + $0x6c] sm:$0xf0]  ;;  %v4281_v45 = vld [vmem:[%s6373_s14 + $0x70] sm:$0xf0]  ;;  %v4287_v48 = vld [vmem:[%s6373_s14 + $0x38] sm:$0xf] }
 0x516   : > { %v5315_v55 = vld [vmem:[%s6373_s14 + $0x74] sm:$0xf0]  ;;  %v5307_v56 = vld [vmem:[%s6373_s14 + $0x3c] sm:$0xf] }
 0x517   : > { %v4289_v5 = vld [vmem:[%s6373_s14 + $0x78] sm:$0xf0]  ;;  %v4288_v60 = vor.u32 %v5315_v55, %v4287_v48  ;;  %v5470_v48 = vld [vmem:[%s6409_s5 + $0x150] sm:$0xff] }
 0x518   : > { %2328 = vmatpush.bf16.msra.mxu0 %v4328_v61  ;;  %2342 = vmatpush.bf16.msra.mxu1 %v4332_v2  ;;  %v4540_v61 = vor.u32 %v5370_v46, %v4537_v14  ;;  %v4471_v2 = vld [vmem:[%s6373_s14 + $0x1b0] sm:$0xf]  ;;  %v4292_v62 = vor.u32 %v5307_v56, %v4289_v5  ;;  %v5451_v46 = vld [vmem:[%s6409_s5 + $0xb8] sm:$0xff]  ;;  %v5461_v5 = vld [vmem:[%s6409_s5 + $0x108] sm:$0xff] }
 0x519   : > { %2356 = vmatpush.bf16.msra.mxu2 %v4336_v23  ;;  %2370 = vmatpush.bf16.msrb.mxu3 %v4340_v13  ;;  %v5354_v23 = vld [vmem:[%s6373_s14 + $0x1b4] sm:$0xf]  ;;  %v4472_v8 = vor.u32 %v5362_v63, %v4471_v2  ;;  %v5459_v14 = vld [vmem:[%s6409_s5 + $0xf8] sm:$0xff]  ;;  %v5449_v2 = vld [vmem:[%s6409_s5 + $0xa8] sm:$0xff] }
 0x51a   : > { %v4473_v13 = vld [vmem:[%s6373_s14 + $0x1f0] sm:$0xf0]  ;;  %v5457_v63 = vld [vmem:[%s6409_s5 + $0xe8] sm:$0xff] }
 0x51b   : > { %v4476_v22 = vor.u32 %v5354_v23, %v4473_v13  ;;  %v5456_v23 = vld [vmem:[%s6409_s5 + $0xe0] sm:$0xff]  ;;  %v5431_v13 = vld [vmem:[%s6409_s5 + $0x18] sm:$0xff]  ;;  %v5478_v55 = vld [vmem:[%s6409_s5 + $0x190] sm:$0xff] }
 0x51c   : > { %2329 = vmatpush.bf16.msra.mxu0 %v4264_v28  ;;  %2343 = vmatpush.bf16.msra.mxu1 %v4268_v31  ;;  %v4484_v28 = vor.u32 %v5355_v21, %v4481_v19  ;;  %v5338_v31 = vld [vmem:[%s6373_s14 + $0x134] sm:$0xf]  ;;  %v5455_v21 = vld [vmem:[%s6409_s5 + $0xd8] sm:$0xff] }
 0x51d   : > { %2357 = vmatpush.bf16.msra.mxu2 %v4272_v50  ;;  %2371 = vmatpush.bf16.msrb.mxu3 %v4276_v51  ;;  %v5339_v50 = vld [vmem:[%s6373_s14 + $0x13c] sm:$0xf]  ;;  %v5430_v19 = vld [vmem:[%s6409_s5 + $0x10] sm:$0xff] }
 0x51e   : > { %v4417_v51 = vld [vmem:[%s6373_s14 + $0x178] sm:$0xf0]  ;;  %v5486_v56 = vld [vmem:[%s6409_s5 + $0x1d0] sm:$0xff] }
 0x51f   : > { %2330 = vmatmul.bf16.vlgmr.msra.gmra.mxu0 %v6800_v49  ;;  %2344 = vmatmul.bf16.vlgmr.msra.gmra.mxu1 %v6800_v49 }
 0x520   : > { %2378 = vmatpush.bf16.msrb.mxu0 %v4728_v26  ;;  %2392 = vmatpush.bf16.msrb.mxu1 %v4732_v6  ;;  %v4408_v26 = vor.u32 %v5346_v25, %v4407_v24  ;;  %v4412_v6 = vor.u32 %v5338_v31, %v4409_v33  ;;  %v5454_v24 = vld [vmem:[%s6409_s5 + $0xd0] sm:$0xff]  ;;  %v5429_v25 = vld [vmem:[%s6409_s5 + $0x8] sm:$0xff]  ;;  %v5428_v33 = vld [vmem:[%s6409_s5] sm:$0xff] }
 0x521   : > { %2406 = vmatpush.bf16.msrb.mxu2 %v4736_v29  ;;  %2420 = vmatpush.bf16.msra.mxu3 %v4740_v30  ;;  %v4416_v29 = vor.u32 %v5347_v43, %v4415_v34  ;;  %v4420_v30 = vor.u32 %v5339_v50, %v4417_v51  ;;  %v5453_v31 = vld [vmem:[%s6409_s5 + $0xc8] sm:$0xff]  ;;  %v5436_v34 = vld [vmem:[%s6409_s5 + $0x40] sm:$0xff]  ;;  %v5467_v43 = vld [vmem:[%s6409_s5 + $0x138] sm:$0xff] }
 0x522   : > { %2358 = vmatmul.bf16.vlgmr.msra.gmra.mxu2 %v6800_v49  ;;  %2372 = vmatmul.bf16.vlgmr.msrb.gmra.mxu3 %v6800_v49  ;;  %v5475_v50 = vld [vmem:[%s6409_s5 + $0x178] sm:$0xff]  ;;  %v5444_v51 = vld [vmem:[%s6409_s5 + $0x80] sm:$0xff] }
 0x524   : > { %2379 = vmatpush.bf16.msrb.mxu0 %v4664_v4  ;;  %2393 = vmatpush.bf16.msrb.mxu1 %v4668_v39  ;;  %v4344_v4 = vor.u32 %v5330_v7, %v4343_v59  ;;  %v4348_v39 = vor.u32 %v5322_v32, %v4345_v35  ;;  %v5491_v59 = vld [vmem:[%s6409_s5 + $0x1f8] sm:$0xff]  ;;  %v5466_v7 = vld [vmem:[%s6409_s5 + $0x130] sm:$0xff]  ;;  %v5465_v35 = vld [vmem:[%s6409_s5 + $0x128] sm:$0xff] }
 0x525   : > { %2407 = vmatpush.bf16.msrb.mxu2 %v4672_v42  ;;  %2421 = vmatpush.bf16.msra.mxu3 %v4676_v1  ;;  %v4352_v42 = vor.u32 %v5331_v37, %v4351_v36  ;;  %v4356_v1 = vor.u32 %v5323_v3, %v4353_v38  ;;  %v5490_v32 = vld [vmem:[%s6409_s5 + $0x1f0] sm:$0xff]  ;;  %v5473_v36 = vld [vmem:[%s6409_s5 + $0x168] sm:$0xff]  ;;  %v5464_v38 = vld [vmem:[%s6409_s5 + $0x120] sm:$0xff] }
 0x526   : > { %v5481_v37 = vld [vmem:[%s6409_s5 + $0x1a8] sm:$0xff] }
 0x527   : > { %v5489_v3 = vld [vmem:[%s6409_s5 + $0x1e8] sm:$0xff] }
 0x528   : > { %2380 = vmatpush.bf16.msrb.mxu0 %v4600_v57  ;;  %2394 = vmatpush.bf16.msrb.mxu1 %v4604_v58  ;;  %v4280_v57 = vor.u32 %v5314_v41, %v4279_v40  ;;  %v4284_v58 = vor.u32 %v5306_v44, %v4281_v45  ;;  %v5488_v40 = vld [vmem:[%s6409_s5 + $0x1e0] sm:$0xff]  ;;  %v5463_v41 = vld [vmem:[%s6409_s5 + $0x118] sm:$0xff]  ;;  %v5462_v45 = vld [vmem:[%s6409_s5 + $0x110] sm:$0xff] }
 0x529   : > { %2408 = vmatpush.bf16.msrb.mxu2 %v4608_v53  ;;  %2422 = vmatpush.bf16.msra.mxu3 %v4612_v0  ;;  %v5435_v53 = vld [vmem:[%s6409_s5 + $0x38] sm:$0xff] }
 0x52a   : > { %v5443_v0 = vld [vmem:[%s6409_s5 + $0x78] sm:$0xff] }
 0x52b   : > { %v5487_v44 = vld [vmem:[%s6409_s5 + $0x1d8] sm:$0xff] }
 0x52c   : > { %2381 = vmatpush.bf16.msrb.mxu0 %v4536_v12  ;;  %2395 = vmatpush.bf16.msrb.mxu1 %v4540_v61  ;;  %v5433_v12 = vld [vmem:[%s6409_s5 + $0x28] sm:$0xff] }
 0x52d   : > { %2409 = vmatpush.bf16.msrb.mxu2 %v4544_v9  ;;  %2423 = vmatpush.bf16.msra.mxu3 %v4548_v10  ;;  %v5441_v61 = vld [vmem:[%s6409_s5 + $0x68] sm:$0xff]  ;;  %v5440_v9 = vld [vmem:[%s6409_s5 + $0x60] sm:$0xff] }
 0x52e   : > { %v5448_v10 = vld [vmem:[%s6409_s5 + $0xa0] sm:$0xff] }
 0x530   : > { %2382 = vmatpush.bf16.msrb.mxu0 %v4472_v8  ;;  %2396 = vmatpush.bf16.msrb.mxu1 %v4476_v22  ;;  %v5438_v8 = vld [vmem:[%s6409_s5 + $0x50] sm:$0xff] }
 0x531   : > { %2410 = vmatpush.bf16.msrb.mxu2 %v4480_v27  ;;  %2424 = vmatpush.bf16.msra.mxu3 %v4484_v28  ;;  %v5446_v22 = vld [vmem:[%s6409_s5 + $0x90] sm:$0xff]  ;;  %v5437_v27 = vld [vmem:[%s6409_s5 + $0x48] sm:$0xff] }
 0x532   : > { %v5445_v28 = vld [vmem:[%s6409_s5 + $0x88] sm:$0xff] }
 0x534   : > { %2383 = vmatpush.bf16.msrb.mxu0 %v4408_v26  ;;  %2397 = vmatpush.bf16.msrb.mxu1 %v4412_v6  ;;  %v5452_v26 = vld [vmem:[%s6409_s5 + $0xc0] sm:$0xff]  ;;  %v5483_v6 = vld [vmem:[%s6409_s5 + $0x1b8] sm:$0xff] }
 0x535   : > { %2411 = vmatpush.bf16.msrb.mxu2 %v4416_v29  ;;  %2425 = vmatpush.bf16.msra.mxu3 %v4420_v30  ;;  %v5474_v29 = vld [vmem:[%s6409_s5 + $0x170] sm:$0xff] }
 0x536   : > { %v5482_v30 = vld [vmem:[%s6409_s5 + $0x1b0] sm:$0xff] }
 0x538   : > { %2384 = vmatpush.bf16.msrb.mxu0 %v4344_v4  ;;  %2398 = vmatpush.bf16.msrb.mxu1 %v4348_v39  ;;  %v5472_v4 = vld [vmem:[%s6409_s5 + $0x160] sm:$0xff] }
 0x539   : > { %2412 = vmatpush.bf16.msrb.mxu2 %v4352_v42  ;;  %2426 = vmatpush.bf16.msra.mxu3 %v4356_v1  ;;  %v5480_v39 = vld [vmem:[%s6409_s5 + $0x1a0] sm:$0xff]  ;;  %v5471_v42 = vld [vmem:[%s6409_s5 + $0x158] sm:$0xff] }
 0x53a   : > { %v5479_v1 = vld [vmem:[%s6409_s5 + $0x198] sm:$0xff] }
 0x53c   : > { %2385 = vmatpush.bf16.msrb.mxu0 %v4280_v57  ;;  %2399 = vmatpush.bf16.msrb.mxu1 %v4284_v58  ;;  %v5469_v57 = vld [vmem:[%s6409_s5 + $0x148] sm:$0xff] }
 0x53d   : > { %2413 = vmatpush.bf16.msrb.mxu2 %v4288_v60  ;;  %2427 = vmatpush.bf16.msra.mxu3 %v4292_v62  ;;  %v5477_v58 = vld [vmem:[%s6409_s5 + $0x188] sm:$0xff]  ;;  %v5460_v62 = vld [vmem:[%s6409_s5 + $0x100] sm:$0xff] }
 0x53e   : > { %v5485_v60 = vld [vmem:[%s6409_s5 + $0x1c8] sm:$0xff] }
 0x53f   : > { %2386 = vmatmul.bf16.vlgmr.msrb.gmra.mxu0 %v6800_v49  ;;  %2400 = vmatmul.bf16.vlgmr.msrb.gmra.mxu1 %v6800_v49 }
 0x540   : > { %3510 = vmatpush.bf16.msra.mxu0 %v5435_v53  ;;  %3524 = vmatpush.bf16.msra.mxu1 %v5443_v0  ;;  %v5468_v53 = vld [vmem:[%s6409_s5 + $0x140] sm:$0xff] }
 0x541   : > { %2414 = vmatmul.bf16.vlgmr.msrb.gmra.mxu2 %v6800_v49  ;;  %2428 = vmatmul.bf16.vlgmr.msra.gmra.mxu3 %v6800_v49  ;;  %v5432_v49 = vld [vmem:[%s6409_s5 + $0x20] sm:$0xff] }
 0x542   : > { %3538 = vmatpush.bf16.msra.mxu2 %v5451_v46  ;;  %3552 = vmatpush.bf16.msrb.mxu3 %v5459_v14  ;;  %v5476_v0 = vld [vmem:[%s6409_s5 + $0x180] sm:$0xff] }
 0x543   : > { %v5484_v46 = vld [vmem:[%s6409_s5 + $0x1c0] sm:$0xff] }
 0x544   : > { %3511 = vmatpush.bf16.msra.mxu0 %v5434_v17  ;;  %3525 = vmatpush.bf16.msra.mxu1 %v5442_v18  ;;  %v7003_v14 = vld [vmem:[%s6375_s0] sm:$0xff] }
 0x546   : > { %3539 = vmatpush.bf16.msra.mxu2 %v5450_v20  ;;  %3553 = vmatpush.bf16.msrb.mxu3 %v5458_v47  ;;  %v1538_v20 = vperm.slane %v7003_v14, 0  ;;  %v1539_v47 = vperm.slane %v7003_v14, 1 }
 0x548   : > { %3512 = vmatpush.bf16.msra.mxu0 %v5433_v12  ;;  %3526 = vmatpush.bf16.msra.mxu1 %v5441_v61 }
 0x54a   : > { %3540 = vmatpush.bf16.msra.mxu2 %v5449_v2  ;;  %3554 = vmatpush.bf16.msrb.mxu3 %v5457_v63 }
 0x54c   : > { %3513 = vmatpush.bf16.msra.mxu0 %v5432_v49  ;;  %3527 = vmatpush.bf16.msra.mxu1 %v5440_v9 }
 0x54e   : > { %3541 = vmatpush.bf16.msra.mxu2 %v5448_v10  ;;  %3555 = vmatpush.bf16.msrb.mxu3 %v5456_v23 }
 0x550   : > { %3514 = vmatpush.bf16.msra.mxu0 %v5431_v13  ;;  %3528 = vmatpush.bf16.msra.mxu1 %v5439_v15  ;;  %v1540_v13 = vperm.slane %v7003_v14, 2  ;;  %v1541_v15 = vperm.slane %v7003_v14, 3 }
 0x552   : > { %3542 = vmatpush.bf16.msra.mxu2 %v5447_v16  ;;  %3556 = vmatpush.bf16.msrb.mxu3 %v5455_v21 }
 0x554   : > { %3515 = vmatpush.bf16.msra.mxu0 %v5430_v19  ;;  %3529 = vmatpush.bf16.msra.mxu1 %v5438_v8 }
 0x556   : > { %3543 = vmatpush.bf16.msra.mxu2 %v5446_v22  ;;  %3557 = vmatpush.bf16.msrb.mxu3 %v5454_v24  ;;  %v5499_v22 = vld [vmem:[%s6409_s5 + $0x238] sm:$0xff] }
 0x557   : > { %v5507_v24 = vld [vmem:[%s6409_s5 + $0x278] sm:$0xff] }
 0x558   : > { %3516 = vmatpush.bf16.msra.mxu0 %v5429_v25  ;;  %3530 = vmatpush.bf16.msra.mxu1 %v5437_v27 }
 0x55a   : > { %3544 = vmatpush.bf16.msra.mxu2 %v5445_v28  ;;  %3558 = vmatpush.bf16.msrb.mxu3 %v5453_v31 }
 0x55c   : > { %3517 = vmatpush.bf16.msra.mxu0 %v5428_v33  ;;  %3531 = vmatpush.bf16.msra.mxu1 %v5436_v34 }
 0x55e   : > { %3545 = vmatpush.bf16.msra.mxu2 %v5444_v51  ;;  %3559 = vmatpush.bf16.msrb.mxu3 %v5452_v26 }
 0x560   : > { %3566 = vmatpush.bf16.msrb.mxu0 %v5467_v43  ;;  %3580 = vmatpush.bf16.msrb.mxu1 %v5475_v50 }
 0x562   : > { %3594 = vmatpush.bf16.msrb.mxu2 %v5483_v6  ;;  %3608 = vmatpush.bf16.msra.mxu3 %v5491_v59  ;;  %v5498_v6 = vld [vmem:[%s6409_s5 + $0x230] sm:$0xff] }
 0x563   : > { %v5506_v59 = vld [vmem:[%s6409_s5 + $0x270] sm:$0xff] }
 0x564   : > { %3567 = vmatpush.bf16.msrb.mxu0 %v5466_v7  ;;  %3581 = vmatpush.bf16.msrb.mxu1 %v5474_v29 }
 0x566   : > { %3595 = vmatpush.bf16.msrb.mxu2 %v5482_v30  ;;  %3609 = vmatpush.bf16.msra.mxu3 %v5490_v32 }
 0x568   : > { %3568 = vmatpush.bf16.msrb.mxu0 %v5465_v35  ;;  %3582 = vmatpush.bf16.msrb.mxu1 %v5473_v36  ;;  %v1542_v35 = vperm.slane %v7003_v14, 4  ;;  %v1543_v36 = vperm.slane %v7003_v14, 5 }
 0x56a   : > { %3596 = vmatpush.bf16.msrb.mxu2 %v5481_v37  ;;  %3610 = vmatpush.bf16.msra.mxu3 %v5489_v3  ;;  %v5515_v37 = vld [vmem:[%s6409_s5 + $0x2b8] sm:$0xff] }
 0x56b   : > { %v5523_v3 = vld [vmem:[%s6409_s5 + $0x2f8] sm:$0xff] }
 0x56c   : > { %3569 = vmatpush.bf16.msrb.mxu0 %v5464_v38  ;;  %3583 = vmatpush.bf16.msrb.mxu1 %v5472_v4 }
 0x56e   : > { %3597 = vmatpush.bf16.msrb.mxu2 %v5480_v39  ;;  %3611 = vmatpush.bf16.msra.mxu3 %v5488_v40  ;;  %v5497_v39 = vld [vmem:[%s6409_s5 + $0x228] sm:$0xff] }
 0x56f   : > { %v5505_v40 = vld [vmem:[%s6409_s5 + $0x268] sm:$0xff] }
 0x570   : > { %3570 = vmatpush.bf16.msrb.mxu0 %v5463_v41  ;;  %3584 = vmatpush.bf16.msrb.mxu1 %v5471_v42 }
 0x572   : > { %3598 = vmatpush.bf16.msrb.mxu2 %v5479_v1  ;;  %3612 = vmatpush.bf16.msra.mxu3 %v5487_v44 }
 0x574   : > { %3571 = vmatpush.bf16.msrb.mxu0 %v5462_v45  ;;  %3585 = vmatpush.bf16.msrb.mxu1 %v5470_v48  ;;  %v5514_v45 = vld [vmem:[%s6409_s5 + $0x2b0] sm:$0xff] }
 0x575   : > { %v5522_v48 = vld [vmem:[%s6409_s5 + $0x2f0] sm:$0xff] }
 0x576   : > { %3599 = vmatpush.bf16.msrb.mxu2 %v5478_v55  ;;  %3613 = vmatpush.bf16.msra.mxu3 %v5486_v56 }
 0x578   : > { %3572 = vmatpush.bf16.msrb.mxu0 %v5461_v5  ;;  %3586 = vmatpush.bf16.msrb.mxu1 %v5469_v57  ;;  %v5496_v5 = vld [vmem:[%s6409_s5 + $0x220] sm:$0xff] }
 0x579   : > { %v5504_v57 = vld [vmem:[%s6409_s5 + $0x260] sm:$0xff] }
 0x57a   : > { %3600 = vmatpush.bf16.msrb.mxu2 %v5477_v58  ;;  %3614 = vmatpush.bf16.msra.mxu3 %v5485_v60 }
 0x57b   : > { %v2219_v17 = vpop.f32.mrf.mxu0  ;;  %v2233_v18 = vpop.f32.mrf.mxu1 }
 0x57c   : > { %3573 = vmatpush.bf16.msrb.mxu0 %v5460_v62  ;;  %3587 = vmatpush.bf16.msrb.mxu1 %v5468_v53  ;;  %v2220_v12 = vadd.f32 %v2219_v17, %v1538_v20  ;;  %v2234_v61 = vadd.f32 %v2233_v18, %v1539_v47  ;;  %v1544_v62 = vperm.slane %v7003_v14, 6  ;;  %v1545_v53 = vperm.slane %v7003_v14, 7 }
 0x57e   : > { %3601 = vmatpush.bf16.msrb.mxu2 %v5476_v0  ;;  %3615 = vmatpush.bf16.msra.mxu3 %v5484_v46  ;;  %v2434_v16 = vmax.f32 %v2220_v12, 0.0  ;;  %v2435_v21 = vmax.f32 %v2234_v61, 0.0 }
 0x582   : > { %v2247_v2 = vpop.f32.mrf.mxu2  ;;  %v2261_v63 = vpop.f32.mrf.mxu3 }
 0x583   : > { %v2221_v49 = vpop.f32.mrf.mxu0  ;;  %v2235_v9 = vpop.f32.mrf.mxu1  ;;  %v2248_v28 = vadd.f32 %v2247_v2, %v1540_v13  ;;  %v2262_v31 = vadd.f32 %v2261_v63, %v1541_v15  ;;  %v5495_v2 = vld [vmem:[%s6409_s5 + $0x218] sm:$0xff] }
 0x584   : > { %v2222_v10 = vadd.f32 %v2221_v49, %v1538_v20  ;;  %v2236_v23 = vadd.f32 %v2235_v9, %v1539_v47  ;;  %v5513_v20 = vld [vmem:[%s6409_s5 + $0x2a8] sm:$0xff]  ;;  %v5503_v63 = vld [vmem:[%s6409_s5 + $0x258] sm:$0xff] }
 0x585   : > { %v2436_v7 = vmax.f32 %v2248_v28, 0.0  ;;  %v2437_v29 = vmax.f32 %v2262_v31, 0.0  ;;  %v5521_v47 = vld [vmem:[%s6409_s5 + $0x2e8] sm:$0xff] }
 0x586   : > { %v2450_v19 = vmax.f32 %v2222_v10, 0.0  ;;  %v2451_v8 = vmax.f32 %v2236_v23, 0.0  ;;  %v5512_v23 = vld [vmem:[%s6409_s5 + $0x2a0] sm:$0xff] }
 0x588   : > { %v2466_v25 = vpack.c.bf16 %v2450_v19, %v2434_v16  ;;  %v2467_v27 = vpack.c.bf16 %v2451_v8, %v2435_v21  ;;  %v5494_v21 = vld [vmem:[%s6409_s5 + $0x210] sm:$0xff] }
 0x589   : > { %v5502_v19 = vld [vmem:[%s6409_s5 + $0x250] sm:$0xff] }
 0x58a   : > { %v2249_v33 = vpop.f32.mrf.mxu2  ;;  %v2263_v34 = vpop.f32.mrf.mxu3  ;;  %3518 = vmatmul.bf16.vlgmr.msra.gmra.mxu0 %v2466_v25  ;;  %3532 = vmatmul.bf16.vlgmr.msra.gmra.mxu1 %v2467_v27  ;;  %v7034_v27 = vld [vmem:[%s6375_s0 + $0x8] sm:$0xff] }
 0x58b   : > { %v2250_v43 = vadd.f32 %v2249_v33, %v1540_v13  ;;  %v2264_v50 = vadd.f32 %v2263_v34, %v1541_v15  ;;  %3622 = vmatpush.bf16.msra.mxu0 %v5499_v22  ;;  %3636 = vmatpush.bf16.msra.mxu1 %v5507_v24  ;;  %v2275_v51 = vpop.f32.mrf.mxu0  ;;  %v2289_v26 = vpop.f32.mrf.mxu1  ;;  %v5520_v13 = vld [vmem:[%s6409_s5 + $0x2e0] sm:$0xff]  ;;  %v5511_v33 = vld [vmem:[%s6409_s5 + $0x298] sm:$0xff] }
 0x58c   : > { %v2276_v41 = vadd.f32 %v2275_v51, %v1542_v35  ;;  %v2290_v42 = vadd.f32 %v2289_v26, %v1543_v36  ;;  %v5519_v34 = vld [vmem:[%s6409_s5 + $0x2d8] sm:$0xff]  ;;  %v1546_v51 = vperm.slane %v7034_v27, 0  ;;  %v1547_v26 = vperm.slane %v7034_v27, 1 }
 0x58d   : > { %v2452_v30 = vmax.f32 %v2250_v43, 0.0  ;;  %v2453_v32 = vmax.f32 %v2264_v50, 0.0 }
 0x58e   : > { %v2438_v0 = vmax.f32 %v2276_v41, 0.0  ;;  %v2439_v46 = vmax.f32 %v2290_v42, 0.0 }
 0x58f   : > { %v2468_v38 = vpack.c.bf16 %v2452_v30, %v2436_v7  ;;  %v2469_v4 = vpack.c.bf16 %v2453_v32, %v2437_v29  ;;  %3623 = vmatpush.bf16.msra.mxu0 %v5498_v6  ;;  %3637 = vmatpush.bf16.msra.mxu1 %v5506_v59  ;;  %v5493_v6 = vld [vmem:[%s6409_s5 + $0x208] sm:$0xff]  ;;  %v5510_v7 = vld [vmem:[%s6409_s5 + $0x290] sm:$0xff] }
 0x590   : > { %v5501_v59 = vld [vmem:[%s6409_s5 + $0x248] sm:$0xff]  ;;  %v5518_v29 = vld [vmem:[%s6409_s5 + $0x2d0] sm:$0xff] }
 0x591   : > { %3546 = vmatmul.bf16.vlgmr.msra.gmra.mxu2 %v2468_v38  ;;  %3560 = vmatmul.bf16.vlgmr.msrb.gmra.mxu3 %v2469_v4 }
 0x592   : > { %3650 = vmatpush.bf16.msra.mxu2 %v5515_v37  ;;  %3664 = vmatpush.bf16.msrb.mxu3 %v5523_v3  ;;  %v2303_v1 = vpop.f32.mrf.mxu2  ;;  %v2317_v44 = vpop.f32.mrf.mxu3  ;;  %v5492_v37 = vld [vmem:[%s6409_s5 + $0x200] sm:$0xff] }
 0x593   : > { %3624 = vmatpush.bf16.msra.mxu0 %v5497_v39  ;;  %3638 = vmatpush.bf16.msra.mxu1 %v5505_v40  ;;  %v2277_v55 = vpop.f32.mrf.mxu0  ;;  %v2291_v56 = vpop.f32.mrf.mxu1  ;;  %v2304_v49 = vadd.f32 %v2303_v1, %v1544_v62  ;;  %v2318_v14 = vadd.f32 %v2317_v44, %v1545_v53  ;;  %v5500_v3 = vld [vmem:[%s6409_s5 + $0x240] sm:$0xff]  ;;  %v5531_v39 = vld [vmem:[%s6409_s5 + $0x338] sm:$0xff]  ;;  %v5509_v1 = vld [vmem:[%s6409_s5 + $0x288] sm:$0xff] }
 0x594   : > { %v2278_v58 = vadd.f32 %v2277_v55, %v1542_v35  ;;  %v2292_v60 = vadd.f32 %v2291_v56, %v1543_v36  ;;  %v5539_v40 = vld [vmem:[%s6409_s5 + $0x378] sm:$0xff]  ;;  %v5517_v44 = vld [vmem:[%s6409_s5 + $0x2c8] sm:$0xff] }
 0x595   : > { %v2440_v8 = vmax.f32 %v2304_v49, 0.0  ;;  %v2441_v22 = vmax.f32 %v2318_v14, 0.0  ;;  %v5529_v49 = vld [vmem:[%s6409_s5 + $0x328] sm:$0xff] }
 0x596   : > { %v2454_v17 = vmax.f32 %v2278_v58, 0.0  ;;  %v2455_v18 = vmax.f32 %v2292_v60, 0.0  ;;  %3651 = vmatpush.bf16.msra.mxu2 %v5514_v45  ;;  %3665 = vmatpush.bf16.msrb.mxu3 %v5522_v48  ;;  %v1548_v45 = vperm.slane %v7034_v27, 2  ;;  %v1549_v48 = vperm.slane %v7034_v27, 3  ;;  %v5530_v58 = vld [vmem:[%s6409_s5 + $0x330] sm:$0xff]  ;;  %v5537_v14 = vld [vmem:[%s6409_s5 + $0x368] sm:$0xff] }
 0x597   : > { %3625 = vmatpush.bf16.msra.mxu0 %v5496_v5  ;;  %3639 = vmatpush.bf16.msra.mxu1 %v5504_v57  ;;  %v5538_v60 = vld [vmem:[%s6409_s5 + $0x370] sm:$0xff] }
 0x598   : > { %v2470_v12 = vpack.c.bf16 %v2454_v17, %v2438_v0  ;;  %v2471_v61 = vpack.c.bf16 %v2455_v18, %v2439_v46  ;;  %v5508_v0 = vld [vmem:[%s6409_s5 + $0x280] sm:$0xff] }
 0x599   : > { %v5516_v46 = vld [vmem:[%s6409_s5 + $0x2c0] sm:$0xff] }
 0x59a   : > { %3652 = vmatpush.bf16.msra.mxu2 %v5513_v20  ;;  %3666 = vmatpush.bf16.msrb.mxu3 %v5521_v47  ;;  %v2305_v9 = vpop.f32.mrf.mxu2  ;;  %v2319_v10 = vpop.f32.mrf.mxu3  ;;  %v5547_v20 = vld [vmem:[%s6409_s5 + $0x3b8] sm:$0xff] }
 0x59b   : > { %v2306_v15 = vadd.f32 %v2305_v9, %v1544_v62  ;;  %v2320_v16 = vadd.f32 %v2319_v10, %v1545_v53  ;;  %3574 = vmatmul.bf16.vlgmr.msrb.gmra.mxu0 %v2470_v12  ;;  %3588 = vmatmul.bf16.vlgmr.msrb.gmra.mxu1 %v2471_v61  ;;  %v5555_v47 = vld [vmem:[%s6409_s5 + $0x3f8] sm:$0xff] }
 0x59c   : > { %3626 = vmatpush.bf16.msra.mxu0 %v5495_v2  ;;  %3640 = vmatpush.bf16.msra.mxu1 %v5503_v63  ;;  %v2331_v28 = vpop.f32.mrf.mxu0  ;;  %v2345_v31 = vpop.f32.mrf.mxu1 }
 0x59d   : > { %v2456_v24 = vmax.f32 %v2306_v15, 0.0  ;;  %v2457_v25 = vmax.f32 %v2320_v16, 0.0  ;;  %v2332_v30 = vadd.f32 %v2331_v28, %v1546_v51  ;;  %v2346_v32 = vadd.f32 %v2345_v31, %v1547_v26  ;;  %v5546_v15 = vld [vmem:[%s6409_s5 + $0x3b0] sm:$0xff]  ;;  %v5527_v28 = vld [vmem:[%s6409_s5 + $0x318] sm:$0xff] }
 0x59e   : > { %3653 = vmatpush.bf16.msra.mxu2 %v5512_v23  ;;  %3667 = vmatpush.bf16.msrb.mxu3 %v5520_v13  ;;  %v5554_v16 = vld [vmem:[%s6409_s5 + $0x3f0] sm:$0xff]  ;;  %v5535_v31 = vld [vmem:[%s6409_s5 + $0x358] sm:$0xff] }
 0x59f   : > { %v2472_v43 = vpack.c.bf16 %v2456_v24, %v2440_v8  ;;  %v2473_v50 = vpack.c.bf16 %v2457_v25, %v2441_v22  ;;  %v2442_v55 = vmax.f32 %v2332_v30, 0.0  ;;  %v2443_v56 = vmax.f32 %v2346_v32, 0.0  ;;  %v5528_v8 = vld [vmem:[%s6409_s5 + $0x320] sm:$0xff]  ;;  %v5545_v24 = vld [vmem:[%s6409_s5 + $0x3a8] sm:$0xff] }
 0x5a0   : > { %3627 = vmatpush.bf16.msra.mxu0 %v5494_v21  ;;  %3641 = vmatpush.bf16.msra.mxu1 %v5502_v19  ;;  %v5536_v22 = vld [vmem:[%s6409_s5 + $0x360] sm:$0xff]  ;;  %v5553_v25 = vld [vmem:[%s6409_s5 + $0x3e8] sm:$0xff] }
 0x5a1   : > { %3602 = vmatmul.bf16.vlgmr.msrb.gmra.mxu2 %v2472_v43  ;;  %3616 = vmatmul.bf16.vlgmr.msra.gmra.mxu3 %v2473_v50  ;;  %v5526_v43 = vld [vmem:[%s6409_s5 + $0x310] sm:$0xff]  ;;  %v5525_v30 = vld [vmem:[%s6409_s5 + $0x308] sm:$0xff] }
 0x5a2   : > { %3654 = vmatpush.bf16.msra.mxu2 %v5511_v33  ;;  %3668 = vmatpush.bf16.msrb.mxu3 %v5519_v34  ;;  %v5544_v33 = vld [vmem:[%s6409_s5 + $0x3a0] sm:$0xff]  ;;  %v5534_v50 = vld [vmem:[%s6409_s5 + $0x350] sm:$0xff]  ;;  %v5533_v32 = vld [vmem:[%s6409_s5 + $0x348] sm:$0xff] }
 0x5a3   : > { %v5552_v34 = vld [vmem:[%s6409_s5 + $0x3e0] sm:$0xff] }
 0x5a4   : > { %3628 = vmatpush.bf16.msra.mxu0 %v5493_v6  ;;  %3642 = vmatpush.bf16.msra.mxu1 %v5501_v59  ;;  %v2333_v38 = vpop.f32.mrf.mxu0  ;;  %v2347_v4 = vpop.f32.mrf.mxu1  ;;  %v5543_v6 = vld [vmem:[%s6409_s5 + $0x398] sm:$0xff] }
 0x5a5   : > { %v2359_v35 = vpop.f32.mrf.mxu2  ;;  %v2373_v36 = vpop.f32.mrf.mxu3  ;;  %v2334_v41 = vadd.f32 %v2333_v38, %v1546_v51  ;;  %v2348_v42 = vadd.f32 %v2347_v4, %v1547_v26  ;;  %v5551_v59 = vld [vmem:[%s6409_s5 + $0x3d8] sm:$0xff] }
 0x5a6   : > { %3655 = vmatpush.bf16.msra.mxu2 %v5510_v7  ;;  %3669 = vmatpush.bf16.msrb.mxu3 %v5518_v29  ;;  %v2360_v17 = vadd.f32 %v2359_v35, %v1548_v45  ;;  %v2374_v18 = vadd.f32 %v2373_v36, %v1549_v48  ;;  %v1550_v7 = vperm.slane %v7034_v27, 4  ;;  %v1551_v29 = vperm.slane %v7034_v27, 5  ;;  %v5542_v35 = vld [vmem:[%s6409_s5 + $0x390] sm:$0xff] }
 0x5a7   : > { %v2458_v5 = vmax.f32 %v2334_v41, 0.0  ;;  %v2459_v57 = vmax.f32 %v2348_v42, 0.0  ;;  %v5550_v36 = vld [vmem:[%s6409_s5 + $0x3d0] sm:$0xff] }
 0x5a8   : > { %3629 = vmatpush.bf16.msra.mxu0 %v5492_v37  ;;  %3643 = vmatpush.bf16.msra.mxu1 %v5500_v3  ;;  %v2444_v9 = vmax.f32 %v2360_v17, 0.0  ;;  %v2445_v10 = vmax.f32 %v2374_v18, 0.0  ;;  %v5540_v17 = vld [vmem:[%s6409_s5 + $0x380] sm:$0xff] }
 0x5a9   : > { %v2474_v62 = vpack.c.bf16 %v2458_v5, %v2442_v55  ;;  %v2475_v53 = vpack.c.bf16 %v2459_v57, %v2443_v56  ;;  %v5541_v55 = vld [vmem:[%s6409_s5 + $0x388] sm:$0xff] }
 0x5aa   : > { %3656 = vmatpush.bf16.msra.mxu2 %v5509_v1  ;;  %3670 = vmatpush.bf16.msrb.mxu3 %v5517_v44  ;;  %v5549_v56 = vld [vmem:[%s6409_s5 + $0x3c8] sm:$0xff] }
 0x5ab   : > { %3630 = vmatmul.bf16.vlgmr.msra.gmra.mxu0 %v2474_v62  ;;  %3644 = vmatmul.bf16.vlgmr.msra.gmra.mxu1 %v2475_v53 }
 0x5ac   : > { %3678 = vmatpush.bf16.msrb.mxu0 %v5531_v39  ;;  %3692 = vmatpush.bf16.msrb.mxu1 %v5539_v40  ;;  %v5524_v39 = vld [vmem:[%s6409_s5 + $0x300] sm:$0xff] }
 0x5ad   : > { %v2361_v12 = vpop.f32.mrf.mxu2  ;;  %v2375_v61 = vpop.f32.mrf.mxu3  ;;  %v5532_v40 = vld [vmem:[%s6409_s5 + $0x340] sm:$0xff] }
 0x5ae   : > { %v2362_v2 = vadd.f32 %v2361_v12, %v1548_v45  ;;  %v2376_v63 = vadd.f32 %v2375_v61, %v1549_v48  ;;  %3657 = vmatpush.bf16.msra.mxu2 %v5508_v0  ;;  %3671 = vmatpush.bf16.msrb.mxu3 %v5516_v46  ;;  %v1552_v45 = vperm.slane %v7034_v27, 6  ;;  %v1553_v48 = vperm.slane %v7034_v27, 7  ;;  %v5548_v27 = vld [vmem:[%s6409_s5 + $0x3c0] sm:$0xff] }
 0x5b0   : > { %3679 = vmatpush.bf16.msrb.mxu0 %v5530_v58  ;;  %3693 = vmatpush.bf16.msrb.mxu1 %v5538_v60  ;;  %v2460_v23 = vmax.f32 %v2362_v2, 0.0  ;;  %v2461_v13 = vmax.f32 %v2376_v63, 0.0 }
 0x5b2   : > { %3706 = vmatpush.bf16.msrb.mxu2 %v5547_v20  ;;  %3720 = vmatpush.bf16.msra.mxu3 %v5555_v47  ;;  %v2476_v21 = vpack.c.bf16 %v2460_v23, %v2444_v9  ;;  %v2477_v19 = vpack.c.bf16 %v2461_v13, %v2445_v10 }
 0x5b4   : > { %3680 = vmatpush.bf16.msrb.mxu0 %v5529_v49  ;;  %3694 = vmatpush.bf16.msrb.mxu1 %v5537_v14 }
 0x5b5   : > { %3658 = vmatmul.bf16.vlgmr.msra.gmra.mxu2 %v2476_v21  ;;  %3672 = vmatmul.bf16.vlgmr.msrb.gmra.mxu3 %v2477_v19  ;;  %v5677_v19 = vld [vmem:[%s825_s28] ss:$0 sm:$0xff] }
 0x5b6   : > { %3707 = vmatpush.bf16.msrb.mxu2 %v5546_v15  ;;  %3721 = vmatpush.bf16.msra.mxu3 %v5554_v16 }
 0x5b8   : > { %3681 = vmatpush.bf16.msrb.mxu0 %v5528_v8  ;;  %3695 = vmatpush.bf16.msrb.mxu1 %v5536_v22 }
 0x5ba   : > { %3708 = vmatpush.bf16.msrb.mxu2 %v5545_v24  ;;  %3722 = vmatpush.bf16.msra.mxu3 %v5553_v25 }
 0x5bc   : > { %3682 = vmatpush.bf16.msrb.mxu0 %v5527_v28  ;;  %3696 = vmatpush.bf16.msrb.mxu1 %v5535_v31  ;;  %v2387_v51 = vpop.f32.mrf.mxu0  ;;  %v2401_v26 = vpop.f32.mrf.mxu1 }
 0x5bd   : > { %v2388_v37 = vadd.f32 %v2387_v51, %v1550_v7  ;;  %v2402_v3 = vadd.f32 %v2401_v26, %v1551_v29 }
 0x5be   : > { %3709 = vmatpush.bf16.msrb.mxu2 %v5544_v33  ;;  %3723 = vmatpush.bf16.msra.mxu3 %v5552_v34 }
 0x5bf   : > { %v2446_v5 = vmax.f32 %v2388_v37, 0.0  ;;  %v2447_v57 = vmax.f32 %v2402_v3, 0.0 }
 0x5c0   : > { %3683 = vmatpush.bf16.msrb.mxu0 %v5526_v43  ;;  %3697 = vmatpush.bf16.msrb.mxu1 %v5534_v50 }
 0x5c2   : > { %3710 = vmatpush.bf16.msrb.mxu2 %v5543_v6  ;;  %3724 = vmatpush.bf16.msra.mxu3 %v5551_v59 }
 0x5c4   : > { %v2415_v38 = vpop.f32.mrf.mxu2  ;;  %v2429_v4 = vpop.f32.mrf.mxu3  ;;  %3684 = vmatpush.bf16.msrb.mxu0 %v5525_v30  ;;  %3698 = vmatpush.bf16.msrb.mxu1 %v5533_v32 }
 0x5c5   : > { %v2389_v41 = vpop.f32.mrf.mxu0  ;;  %v2403_v42 = vpop.f32.mrf.mxu1  ;;  %v2416_v0 = vadd.f32 %v2415_v38, %v1552_v45  ;;  %v2430_v46 = vadd.f32 %v2429_v4, %v1553_v48 }
 0x5c6   : > { %v2390_v1 = vadd.f32 %v2389_v41, %v1550_v7  ;;  %v2404_v44 = vadd.f32 %v2403_v42, %v1551_v29  ;;  %3711 = vmatpush.bf16.msrb.mxu2 %v5542_v35  ;;  %3725 = vmatpush.bf16.msra.mxu3 %v5550_v36 }
 0x5c7   : > { %v2448_v61 = vmax.f32 %v2416_v0, 0.0  ;;  %v2449_v2 = vmax.f32 %v2430_v46, 0.0 }
 0x5c8   : > { %v2462_v58 = vmax.f32 %v2390_v1, 0.0  ;;  %v2463_v60 = vmax.f32 %v2404_v44, 0.0  ;;  %3685 = vmatpush.bf16.msrb.mxu0 %v5524_v39  ;;  %3699 = vmatpush.bf16.msrb.mxu1 %v5532_v40 }
 0x5ca   : > { %v2478_v62 = vpack.c.bf16 %v2462_v58, %v2446_v5  ;;  %v2479_v53 = vpack.c.bf16 %v2463_v60, %v2447_v57  ;;  %3712 = vmatpush.bf16.msrb.mxu2 %v5541_v55  ;;  %3726 = vmatpush.bf16.msra.mxu3 %v5549_v56 }
 0x5cc   : > { %v2417_v18 = vpop.f32.mrf.mxu2  ;;  %v2431_v20 = vpop.f32.mrf.mxu3  ;;  %3686 = vmatmul.bf16.vlgmr.msrb.gmra.mxu0 %v2478_v62  ;;  %3700 = vmatmul.bf16.vlgmr.msrb.gmra.mxu1 %v2479_v53 }
 0x5cd   : > { %v2418_v47 = vadd.f32 %v2417_v18, %v1552_v45  ;;  %v2432_v12 = vadd.f32 %v2431_v20, %v1553_v48 }
 0x5ce   : > { %3713 = vmatpush.bf16.msrb.mxu2 %v5540_v17  ;;  %3727 = vmatpush.bf16.msra.mxu3 %v5548_v27 }
 0x5cf   : > { %v2464_v63 = vmax.f32 %v2418_v47, 0.0  ;;  %v2465_v49 = vmax.f32 %v2432_v12, 0.0 }
 0x5d1   : > { %v2480_v14 = vpack.c.bf16 %v2464_v63, %v2448_v61  ;;  %v2481_v9 = vpack.c.bf16 %v2465_v49, %v2449_v2 }
 0x5d3   : > { %3714 = vmatmul.bf16.vlgmr.msrb.gmra.mxu2 %v2480_v14  ;;  %3728 = vmatmul.bf16.vlgmr.msra.gmra.mxu3 %v2481_v9 }
 0x607   : > { %v3519_v10 = vpop.f32.mrf.mxu0  ;;  %v3533_v23 = vpop.f32.mrf.mxu1 }
 0x608   : > { %v3520_v25 = vadd.f32 %v5677_v19, %v3519_v10 }
 0x60a   : > { %v3534_v31 = vadd.f32 %v3533_v23, %v3520_v25 }
 0x60f   : > { %v3521_v13 = vpop.f32.mrf.mxu0  ;;  %v3535_v21 = vpop.f32.mrf.mxu1 }
 0x610   : > { %v3522_v51 = vadd.f32 %v5677_v19, %v3521_v13 }
 0x612   : > { %v3536_v6 = vadd.f32 %v3535_v21, %v3522_v51 }
 0x614   : > { %v3547_v15 = vpop.f32.mrf.mxu2  ;;  %v3561_v16 = vpop.f32.mrf.mxu3 }
 0x615   : > { %v3548_v33 = vadd.f32 %v3547_v15, %v3534_v31 }
 0x617   : > { %v3562_v26 = vadd.f32 %v3561_v16, %v3548_v33 }
 0x618   : > { %v3575_v8 = vpop.f32.mrf.mxu0  ;;  %v3589_v28 = vpop.f32.mrf.mxu1 }
 0x619   : > { %v3576_v7 = vadd.f32 %v3575_v8, %v3562_v26 }
 0x61b   : > { %v3590_v36 = vadd.f32 %v3589_v28, %v3576_v7 }
 0x61c   : > { %v3549_v22 = vpop.f32.mrf.mxu2  ;;  %v3563_v24 = vpop.f32.mrf.mxu3 }
 0x61d   : > { %v3550_v29 = vadd.f32 %v3549_v22, %v3536_v6 }
 0x61f   : > { %v3564_v37 = vadd.f32 %v3563_v24, %v3550_v29 }
 0x620   : > { %v3577_v34 = vpop.f32.mrf.mxu0  ;;  %v3591_v59 = vpop.f32.mrf.mxu1 }
 0x621   : > { %v3578_v38 = vadd.f32 %v3577_v34, %v3564_v37 }
 0x623   : > { %v3592_v40 = vadd.f32 %v3591_v59, %v3578_v38  ;;  %v5679_v38 = vld [vmem:[%s831_s18] ss:$0 sm:$0xff] }
 0x624   : > { %v3603_v43 = vpop.f32.mrf.mxu2  ;;  %v3617_v50 = vpop.f32.mrf.mxu3 }
 0x625   : > { %v3604_v3 = vadd.f32 %v3603_v43, %v3590_v36  ;;  %v5678_v36 = vld [vmem:[%s828_s24] ss:$0 sm:$0xff]  ;;  %s6065_s24 = smov 8  }
 0x627   : > { %v3618_v39 = vadd.f32 %v3617_v50, %v3604_v3 }
 0x628   : > { %v3631_v30 = vpop.f32.mrf.mxu0  ;;  %v3645_v4 = vpop.f32.mrf.mxu1 }
 0x629   : > { %v3632_v44 = vadd.f32 %v3631_v30, %v3618_v39 }
 0x62b   : > { %v3646_v48 = vadd.f32 %v3645_v4, %v3632_v44 }
 0x62c   : > { %v3605_v32 = vpop.f32.mrf.mxu2  ;;  %v3619_v35 = vpop.f32.mrf.mxu3 }
 0x62d   : > { %v3606_v45 = vadd.f32 %v3605_v32, %v3592_v40 }
 0x62f   : > { %v3620_v55 = vadd.f32 %v3619_v35, %v3606_v45 }
 0x630   : > { %v3633_v41 = vpop.f32.mrf.mxu0  ;;  %v3647_v56 = vpop.f32.mrf.mxu1 }
 0x631   : > { %v3634_v58 = vadd.f32 %v3633_v41, %v3620_v55 }
 0x633   : > { %v3648_v0 = vadd.f32 %v3647_v56, %v3634_v58 }
 0x638   : > { %v3659_v42 = vpop.f32.mrf.mxu2  ;;  %v3673_v1 = vpop.f32.mrf.mxu3 }
 0x639   : > { %v3660_v5 = vadd.f32 %v3659_v42, %v3646_v48 }
 0x63b   : > { %v3674_v53 = vadd.f32 %v3673_v1, %v3660_v5 }
 0x640   : > { %v3661_v60 = vpop.f32.mrf.mxu2  ;;  %v3675_v62 = vpop.f32.mrf.mxu3 }
 0x641   : > { %v3662_v27 = vadd.f32 %v3661_v60, %v3648_v0 }
 0x643   : > { %v3676_v61 = vadd.f32 %v3675_v62, %v3662_v27 }
 0x649   : > { %v3687_v57 = vpop.f32.mrf.mxu0  ;;  %v3701_v17 = vpop.f32.mrf.mxu1 }
 0x64a   : > { %v3688_v46 = vadd.f32 %v3687_v57, %v3674_v53 }
 0x64c   : > { %v3702_v18 = vadd.f32 %v3701_v17, %v3688_v46 }
 0x651   : > { %v3689_v20 = vpop.f32.mrf.mxu0  ;;  %v3703_v9 = vpop.f32.mrf.mxu1 }
 0x652   : > { %v3690_v63 = vadd.f32 %v3689_v20, %v3676_v61 }
 0x654   : > { %v3704_v10 = vadd.f32 %v3703_v9, %v3690_v63 }
 0x656   : > { %v3715_v47 = vpop.f32.mrf.mxu2  ;;  %v3729_v12 = vpop.f32.mrf.mxu3 }
 0x657   : > { %v3716_v2 = vadd.f32 %v3715_v47, %v3702_v18 }
 0x659   : > { %v3730_v49 = vadd.f32 %v3729_v12, %v3716_v2 }
 0x65b   : > { %v3734_v14 = vadd.f32 %v3730_v49, %v6791_v52 }
 0x65d   : > { %3738 = vadd.xlane.f32.xlu0 %v3734_v14 }
 0x65e   : > { %v3717_v23 = vpop.f32.mrf.mxu2  ;;  %v3731_v15 = vpop.f32.mrf.mxu3 }
 0x65f   : > { %v3718_v13 = vadd.f32 %v3717_v23, %v3704_v10 }
 0x661   : > { %v3732_v16 = vadd.f32 %v3731_v15, %v3718_v13 }
 0x663   : > { %v3735_v21 = vadd.f32 %v3732_v16, %v6793_v54 }
 0x665   : > { %3740 = vadd.xlane.f32.xlu1 %v3735_v21 }
 0x6d0   : > { %v3739_v19 = vpop.xlane.xlu0 %3738 }
 0x6d1   : > { %v3742_v8 = vmul.f32 %v3739_v19, %v6670_v11 }
 0x6d3   : > { %v3744_v22 = vsub.f32 %v3734_v14, %v3742_v8 }
 0x6d5   : > { %v3746_v24 = vmul.f32 %v3744_v22, %v3744_v22 }
 0x6d7   : > { %3748 = vadd.xlane.f32.xlu2 %v3746_v24 }
 0x6d8   : > { %v3741_v25 = vpop.xlane.xlu1 %3740 }
 0x6d9   : > { %v3743_v28 = vmul.f32 %v3741_v25, %v6670_v11 }
 0x6db   : > { %v3745_v52 = vsub.f32 %v3735_v21, %v3743_v28 }
 0x6dd   : > { %v3747_v31 = vmul.f32 %v3745_v52, %v3745_v52 }
 0x6df   : > { %3750 = vadd.xlane.f32.xlu0 %v3747_v31 }
 0x74a   : > { %v3749_v33 = vpop.xlane.xlu2 %3748 }
 0x74b   : > { %v3752_v34 = vmul.f32 %v3749_v33, %v6670_v11 }
 0x74d   : > { %v3754_v43 = vadd.f32 1e-05, %v3752_v34 }
 0x74f   : > { %5694 = vrsqrt.f32 %v3754_v43  ;;  %vm3762_vm8 = vweird.f32 %v3754_v43 }
 0x752   : > { %v3751_v54 = vpop.xlane.xlu0 %3750 }
 0x753   : > { %v3753_v50 = vmul.f32 %v3751_v54, %v6670_v11 }
 0x755   : > { %v5695_v51 = vpop.eup %5694  ;;  %v3755_v26 = vadd.f32 1e-05, %v3753_v50 }
 0x756   : > { %v3757_v6 = vmul.f32 %v5695_v51, %v3754_v43  ;;  %vm3763_vm7 = vweird.f32 %v5695_v51 }
 0x757   : > { %5696 = vrsqrt.f32 %v3755_v26  ;;  %vm3764_vm9 = vmor %vm3762_vm8, %vm3763_vm7  ;;  %vm3772_vm11 = vweird.f32 %v3755_v26 }
 0x758   : > { %v3758_v59 = vmul.f32 %v5695_v51, %v3757_v6 }
 0x75a   : > { %v3759_v7 = vmul.f32 0.5, %v3758_v59 }
 0x75c   : > { %v3760_v29 = vsub.f32 1.5, %v3759_v7 }
 0x75d   : > { %v5697_v30 = vpop.eup %5696 }
 0x75e   : > { %v3761_v32 = vmul.f32 %v5695_v51, %v3760_v29  ;;  %v3767_v35 = vmul.f32 %v5697_v30, %v3755_v26  ;;  %vm3773_vm10 = vweird.f32 %v5697_v30 }
 0x75f   : > { %vm3774_vm12 = vmor %vm3772_vm11, %vm3773_vm10 }
 0x760   : > { %v3765_v11 = vsel %vm3764_vm9, %v5695_v51, %v3761_v32  ;;  %v3768_v37 = vmul.f32 %v5697_v30, %v3767_v35 }
 0x761   : > { %v3776_v3 = vmul.f32 %v3765_v11, %v3744_v22 }
 0x762   : > { %v3769_v4 = vmul.f32 0.5, %v3768_v37 }
 0x763   : > { %v3781_v39 = vmul.f32 %v5678_v36, %v3776_v3 }
 0x764   : > { %v3770_v40 = vsub.f32 1.5, %v3769_v4 }
 0x765   : > { %v3786_v41 = vadd.f32 %v5679_v38, %v3781_v39 }
 0x766   : > { %v3771_v42 = vmul.f32 %v5697_v30, %v3770_v40 }
 0x767   : > { %3788 = vst [vmem:[#allocation17] sm:$0xff] %v3786_v41 }
 0x768   : > { %v3775_v1 = vsel %vm3774_vm12, %v5697_v30, %v3771_v42 }
 0x769   : > { %v3777_v44 = vmul.f32 %v3775_v1, %v3745_v52 }
 0x76b   : > { %v3782_v45 = vmul.f32 %v5678_v36, %v3777_v44 }
 0x76d   : > { %v3787_v48 = vadd.f32 %v5679_v38, %v3782_v45 }
 0x76f   : > { %3789 = vst [vmem:[#allocation17 + $0x8] sm:$0xff] %v3787_v48 }
 0x770   : > { %5587 = dma.vmem_to_hbm [thread:$0]  (%p5626_p4), %s3796_s7, 256, %s3798_s19, [#allocation4], %s6064_s23, %s6064_s23, %s6065_s24  }
 0x771   : > { %6033 = dma.done.wait (%p5626_p4), [#allocation4], 256  }
 0x772   : > { %6035 = vsyncadd (%p5626_p4), [#allocation4], 4294967040 }
 0x773 PF: > { %s7207_s21 = sld [smem:[#allocation27_spill]] }
 0x774   : > { %s7208_s18 = sld [smem:[#allocation24_spill]] }
 0x775   : > { %s7209_s19 = sld [smem:[#allocation25_spill]] }
 0x776   : > { %s7210_s20 = sld [smem:[#allocation28_spill]] }
 0x779   : > { %p34_p5 = scmp.ge.s32.totalorder %s7207_s21, 4  }
 0x77b   :  { %36 = sbr.rel (!%p34_p5) target bundleno = 25 (0x19), region = 211 }
 0x780   :  { %3814 = vsyncpa [#allocation3], 1 }
 0x781   :  { %3816 = vsyncpa [#allocation3 + $0x1], 1 }
 0x782   :  { %3817 = vsyncpa [#allocation6], 1 }
 0x783   :  { %3818 = vsyncpa [#allocation9], 1 }
 0x784   :  { %3820 = vsyncpa [#allocation9 + $0x1], 1 }
 0x785   :  { %3821 = vsyncpa [#allocation12], 1 }
 0x786   :  { %3823 = vsyncpa [#allocation12 + $0x1], 1 }
 0x787   :  { %3824 = vsyncpa [#allocation15], 1 }
 0x788   :  { %3826 = vsyncpa [#allocation15 + $0x1], 1 }
 0x789   :  { %3827 = vsyncpa [#allocation4], 1 }
 0x78a   :  { %3829 = vsyncpa [#allocation4 + $0x1], 1 }

</bundles_post_ra>
